<compile_context>
chip_gen: v7x
topology: tpu7x:2x2x1
jax: 0.10.0
libtpu: 0.0.40
codegen_flags: <defaults>
</compile_context>

<pallas_src>
import jax
import jax.numpy as jnp
import numpy as np
from jax.experimental import pallas as pl
from jax.experimental.pallas import tpu as pltpu

# ---- problem sizes (forward() hardcodes the 784 flatten) --------------------
INPUT_SIZE = 784
OUTPUT_SIZE = 784
HIDDEN = 256
LATENT = 32
BATCH = 64          # total batch streamed through one pallas_call
TILE_B = 16         # batch rows per grid step (multiple of 8 sublanes)
LAT_OUT = 128       # lane-padded fused latent output: [z | mu | logvar | pad]


def _softplus(t):
    # numerically-stable softplus == torch.nn.Softplus()
    return jnp.maximum(t, 0.0) + jnp.log1p(jnp.exp(-jnp.abs(t)))


def vae_kernel(
    # inputs (per batch tile; weights are VMEM-resident across the grid)
    x_ref,
    we1_ref, be1_ref,
    we2_ref, be2_ref,
    wmuvar_ref, bmuvar_ref,
    wd1_ref, bd1_ref,
    wd2m_ref, bd2m_ref,
    wd2v_ref, bd2v_ref,
    eps_z_ref, eps_x_ref,
    # outputs
    recon_ref, lat_ref,
):
    f32 = jnp.float32
    bf16 = jnp.bfloat16

    x = x_ref[...]  # already bf16

    # ---------------- encode ----------------
    # bf16 weights + bf16 activations; accumulate in f32 on the MXU
    h1 = _softplus(
        jnp.dot(x, we1_ref[...], preferred_element_type=f32) + be1_ref[...]
    )
    h2 = _softplus(
        jnp.dot(h1.astype(bf16), we2_ref[...], preferred_element_type=f32) + be2_ref[...]
    )
    # fused mu/var head: one (256, 64) matmul, slice the two 32-wide halves
    muvar = (
        jnp.dot(h2.astype(bf16), wmuvar_ref[...], preferred_element_type=f32)
        + bmuvar_ref[...]
    )
    mu = muvar[:, :LATENT]
    var_pre = muvar[:, LATENT:]
    sp = _softplus(var_pre)
    # NOTE: matches PyTorch semantics; logvar -> -inf if softplus underflows.
    logvar = jnp.log(sp)

    # ---------------- reparametrize ----------------
    # exp(log(softplus(var_pre))) == softplus(var_pre): reuse sp, skip the exp.
    z = mu + sp * eps_z_ref[...]

    # ---------------- decode ----------------
    hd = _softplus(
        jnp.dot(z.astype(bf16), wd1_ref[...], preferred_element_type=f32) + bd1_ref[...]
    )
    hdb = hd.astype(bf16)
    # dec2 split into the (pre-permuted) mu_x / var_x halves; softplus is
    # elementwise so applying it per-half equals applying it to the full output.
    mu_x = _softplus(
        jnp.dot(hdb, wd2m_ref[...], preferred_element_type=f32) + bd2m_ref[...]
    )
    var_x = _softplus(
        jnp.dot(hdb, wd2v_ref[...], preferred_element_type=f32) + bd2v_ref[...]
    )
    # decode() calls reparametrize(mu_x, var_x): mu_x + exp(var_x) * noise
    out = mu_x + jnp.exp(var_x) * eps_x_ref[...]
    recon_ref[...] = jax.nn.sigmoid(out)

    # fused, lane-padded latent output: one unmasked 128-lane store
    pad = jnp.zeros_like(mu)
    lat_ref[...] = jnp.concatenate([z, mu, logvar, pad], axis=1)


@jax.jit
def vae_forward(x_flat_bf16, params, eps_z, eps_x):
    num_tiles = BATCH // TILE_B

    def const_spec(shape):
        # whole-array block, same block for every grid step -> fetched once,
        # stays VMEM-resident while batch tiles pipeline through.
        return pl.BlockSpec(shape, lambda i: (0, 0))

    (we1, be1, we2, be2, wmuvar, bmuvar,
     wd1, bd1, wd2m, bd2m, wd2v, bd2v) = params

    in_specs = [
        pl.BlockSpec((TILE_B, INPUT_SIZE), lambda i: (i, 0)),   # x
        const_spec(we1.shape), const_spec(be1.shape),
        const_spec(we2.shape), const_spec(be2.shape),
        const_spec(wmuvar.shape), const_spec(bmuvar.shape),
        const_spec(wd1.shape), const_spec(bd1.shape),
        const_spec(wd2m.shape), const_spec(bd2m.shape),
        const_spec(wd2v.shape), const_spec(bd2v.shape),
        pl.BlockSpec((TILE_B, LATENT), lambda i: (i, 0)),       # eps_z
        pl.BlockSpec((TILE_B, OUTPUT_SIZE), lambda i: (i, 0)),  # eps_x
    ]
    out_specs = [
        pl.BlockSpec((TILE_B, OUTPUT_SIZE), lambda i: (i, 0)),  # reconstruction
        pl.BlockSpec((TILE_B, LAT_OUT), lambda i: (i, 0)),      # [z|mu|logvar|pad]
    ]
    out_shape = [
        jax.ShapeDtypeStruct((BATCH, OUTPUT_SIZE), jnp.float32),
        jax.ShapeDtypeStruct((BATCH, LAT_OUT), jnp.float32),
    ]

    recon, lat = pl.pallas_call(
        vae_kernel,
        grid=(num_tiles,),
        in_specs=in_specs,
        out_specs=out_specs,
        out_shape=out_shape,
        compiler_params=pltpu.CompilerParams(
            dimension_semantics=("parallel",),   # v7x: split batch tiles across TCs
        ),
    )(x_flat_bf16, *params, eps_z, eps_x)

    z = lat[:, :LATENT]
    mu = lat[:, LATENT:2 * LATENT]
    logvar = lat[:, 2 * LATENT:3 * LATENT]
    return recon, z, mu, logvar


def init_params(key):
    """Deterministic parameters, PyTorch nn.Linear shapes, prepped for kernel."""
    def linear(key, in_f, out_f):
        kw, kb = jax.random.split(key)
        bound = 1.0 / np.sqrt(in_f)
        w = jax.random.uniform(kw, (out_f, in_f), jnp.float32, -bound, bound)
        b = jax.random.uniform(kb, (out_f,), jnp.float32, -bound, bound)
        return w, b

    keys = jax.random.split(key, 6)
    w_enc1, b_enc1 = linear(keys[0], INPUT_SIZE, HIDDEN)
    w_enc2, b_enc2 = linear(keys[1], HIDDEN, HIDDEN)
    w_mu, b_mu = linear(keys[2], HIDDEN, LATENT)
    w_var, b_var = linear(keys[3], HIDDEN, LATENT)
    w_dec1, b_dec1 = linear(keys[4], LATENT, HIDDEN)
    w_dec2, b_dec2 = linear(keys[5], HIDDEN, 2 * OUTPUT_SIZE)

    # transpose to (in, out) for x @ W; biases as (1, out) f32 rows
    def prep(w, b):
        return jnp.asarray(w.T, dtype=jnp.bfloat16), jnp.asarray(b[None, :], jnp.float32)

    we1, be1 = prep(w_enc1, b_enc1)
    we2, be2 = prep(w_enc2, b_enc2)
    wmu, bmu = prep(w_mu, b_mu)
    wvar, bvar = prep(w_var, b_var)
    wd1, bd1 = prep(w_dec1, b_dec1)
    wd2, bd2 = prep(w_dec2, b_dec2)

    # fuse mu/var heads into one (HIDDEN, 2*LATENT) weight: cols [0:32]=mu, [32:64]=var
    wmuvar = jnp.concatenate([wmu, wvar], axis=1)
    bmuvar = jnp.concatenate([bmu, bvar], axis=1)

    # split interleaved dec2 columns (even -> mu_x, odd -> var_x)
    wd2m, bd2m = wd2[:, 0::2], bd2[:, 0::2]
    wd2v, bd2v = wd2[:, 1::2], bd2[:, 1::2]

    return (we1, be1, we2, be2, wmuvar, bmuvar,
            wd1, bd1, wd2m, bd2m, wd2v, bd2v)


def reference_forward(x_flat_bf16, params, eps_z, eps_x):
    """Pure-JAX reference mirroring the kernel math (same bf16-weight matmuls)."""
    (we1, be1, we2, be2, wmuvar, bmuvar,
     wd1, bd1, wd2m, bd2m, wd2v, bd2v) = params
    f32, bf16 = jnp.float32, jnp.bfloat16
    h1 = _softplus(jnp.dot(x_flat_bf16, we1, preferred_element_type=f32) + be1)
    h2 = _softplus(jnp.dot(h1.astype(bf16), we2, preferred_element_type=f32) + be2)
    muvar = jnp.dot(h2.astype(bf16), wmuvar, preferred_element_type=f32) + bmuvar
    mu = muvar[:, :LATENT]
    sp = _softplus(muvar[:, LATENT:])
    logvar = jnp.log(sp)
    z = mu + sp * eps_z
    hd = _softplus(jnp.dot(z.astype(bf16), wd1, preferred_element_type=f32) + bd1)
    hdb = hd.astype(bf16)
    mu_x = _softplus(jnp.dot(hdb, wd2m, preferred_element_type=f32) + bd2m)
    var_x = _softplus(jnp.dot(hdb, wd2v, preferred_element_type=f32) + bd2v)
    recon = jax.nn.sigmoid(mu_x + jnp.exp(var_x) * eps_x)
    return recon, z, mu, logvar


if __name__ == "__main__":
    root = jax.random.PRNGKey(0)
    k_param, k_x, k_ez, k_ex = jax.random.split(root, 4)

    params = init_params(k_param)

    # NCHW-style input (B, 1, 28, 28) -> flattened to (B, 784) like x.view(-1, 784)
    x = jax.random.uniform(k_x, (BATCH, 1, 28, 28), jnp.float32)
    x_flat = x.reshape(BATCH, INPUT_SIZE)
    x_flat_bf16 = x_flat.astype(jnp.bfloat16)   # kernel casts anyway; fewer HBM bytes

    # deterministic stand-ins for torch.randn_like
    eps_z = jax.random.normal(k_ez, (BATCH, LATENT), jnp.float32)
    eps_x = jax.random.normal(k_ex, (BATCH, OUTPUT_SIZE), jnp.float32)

    recon, z, mu, logvar = vae_forward(x_flat_bf16, params, eps_z, eps_x)
    jax.block_until_ready((recon, z, mu, logvar))

    # correctness check against pure-JAX reference (same noise, same bf16 weights)
    r_ref, z_r, mu_r, lv_r = reference_forward(x_flat_bf16, params, eps_z, eps_x)
    np.testing.assert_allclose(np.asarray(recon), np.asarray(r_ref), rtol=1e-2, atol=1e-2)
    np.testing.assert_allclose(np.asarray(z), np.asarray(z_r), rtol=1e-2, atol=1e-2)
    np.testing.assert_allclose(np.asarray(mu), np.asarray(mu_r), rtol=1e-2, atol=1e-2)
    np.testing.assert_allclose(np.asarray(logvar), np.asarray(lv_r), rtol=1e-2, atol=1e-2)

    assert recon.shape == (BATCH, OUTPUT_SIZE) and z.shape == (BATCH, LATENT)
    assert mu.shape == (BATCH, LATENT) and logvar.shape == (BATCH, LATENT)
    print("KERNEL_OK")
</pallas_src>

<mosaic_0001>
module attributes {stable_mosaic.version = 11 : i64} {
  func.func @vae_kernel(%arg0: i32, %arg1: memref<16x784xbf16, #tpu.memory_space<vmem>>, %arg2: memref<784x256xbf16, #tpu.memory_space<vmem>>, %arg3: memref<1x256xf32, #tpu.memory_space<vmem>>, %arg4: memref<256x256xbf16, #tpu.memory_space<vmem>>, %arg5: memref<1x256xf32, #tpu.memory_space<vmem>>, %arg6: memref<256x64xbf16, #tpu.memory_space<vmem>>, %arg7: memref<1x64xf32, #tpu.memory_space<vmem>>, %arg8: memref<32x256xbf16, #tpu.memory_space<vmem>>, %arg9: memref<1x256xf32, #tpu.memory_space<vmem>>, %arg10: memref<256x784xbf16, #tpu.memory_space<vmem>>, %arg11: memref<1x784xf32, #tpu.memory_space<vmem>>, %arg12: memref<256x784xbf16, #tpu.memory_space<vmem>>, %arg13: memref<1x784xf32, #tpu.memory_space<vmem>>, %arg14: memref<16x32xf32, #tpu.memory_space<vmem>>, %arg15: memref<16x784xf32, #tpu.memory_space<vmem>>, %arg16: memref<16x784xf32, #tpu.memory_space<vmem>>, %arg17: memref<16x128xf32, #tpu.memory_space<vmem>>) attributes {dimension_semantics = [#tpu.dimension_semantics<parallel>], iteration_bounds = array<i64: 4>, scalar_prefetch = 0 : i64, scratch_operands = 0 : i64, tpu.core_type = #tpu.core_type<tc>, window_params = [{transform_indices = @transform_0, window_bounds = array<i64: 16, 784>}, {pipeline_mode = #tpu.pipeline_mode<synchronous>, transform_indices = @transform_1, window_bounds = array<i64: 784, 256>}, {pipeline_mode = #tpu.pipeline_mode<synchronous>, transform_indices = @transform_2, window_bounds = array<i64: 1, 256>}, {pipeline_mode = #tpu.pipeline_mode<synchronous>, transform_indices = @transform_3, window_bounds = array<i64: 256, 256>}, {pipeline_mode = #tpu.pipeline_mode<synchronous>, transform_indices = @transform_4, window_bounds = array<i64: 1, 256>}, {pipeline_mode = #tpu.pipeline_mode<synchronous>, transform_indices = @transform_5, window_bounds = array<i64: 256, 64>}, {pipeline_mode = #tpu.pipeline_mode<synchronous>, transform_indices = @transform_6, window_bounds = array<i64: 1, 64>}, {pipeline_mode = #tpu.pipeline_mode<synchronous>, transform_indices = @transform_7, window_bounds = array<i64: 32, 256>}, {pipeline_mode = #tpu.pipeline_mode<synchronous>, transform_indices = @transform_8, window_bounds = array<i64: 1, 256>}, {pipeline_mode = #tpu.pipeline_mode<synchronous>, transform_indices = @transform_9, window_bounds = array<i64: 256, 784>}, {pipeline_mode = #tpu.pipeline_mode<synchronous>, transform_indices = @transform_10, window_bounds = array<i64: 1, 784>}, {pipeline_mode = #tpu.pipeline_mode<synchronous>, transform_indices = @transform_11, window_bounds = array<i64: 256, 784>}, {pipeline_mode = #tpu.pipeline_mode<synchronous>, transform_indices = @transform_12, window_bounds = array<i64: 1, 784>}, {transform_indices = @transform_13, window_bounds = array<i64: 16, 32>}, {transform_indices = @transform_14, window_bounds = array<i64: 16, 784>}, {transform_indices = @transform_15, window_bounds = array<i64: 16, 784>}, {transform_indices = @transform_16, window_bounds = array<i64: 16, 128>}]} {
    %c0 = arith.constant 0 : index
    %c0_0 = arith.constant 0 : index
    %0 = vector.load %arg1[%c0, %c0_0] : memref<16x784xbf16, #tpu.memory_space<vmem>>, vector<16x784xbf16>
    %c0_1 = arith.constant 0 : index
    %c0_2 = arith.constant 0 : index
    %1 = vector.load %arg2[%c0_1, %c0_2] : memref<784x256xbf16, #tpu.memory_space<vmem>>, vector<784x256xbf16>
    %cst = arith.constant dense<0.000000e+00> : vector<16x256xf32>
    %2 = tpu.matmul %0, %1, %cst {dimension_numbers = #tpu.dot_dimension_numbers<[1], [0], [0], [1], [0, 0, 1, 1], [], []>} : vector<16x784xbf16>, vector<784x256xbf16>, vector<16x256xf32> -> vector<16x256xf32>
    %c0_3 = arith.constant 0 : index
    %c0_4 = arith.constant 0 : index
    %3 = vector.load %arg3[%c0_3, %c0_4] : memref<1x256xf32, #tpu.memory_space<vmem>>, vector<1x256xf32>
    %4 = vector.broadcast %3 : vector<1x256xf32> to vector<16x256xf32>
    %5 = arith.addf %2, %4 : vector<16x256xf32>
    %cst_5 = arith.constant 0.000000e+00 : f32
    %6 = vector.broadcast %cst_5 : f32 to vector<16x256xf32>
    %7 = arith.maximumf %5, %6 : vector<16x256xf32>
    %8 = math.absf %5 : vector<16x256xf32>
    %cst_6 = arith.constant 0.000000e+00 : f32
    %9 = vector.broadcast %cst_6 : f32 to vector<16x256xf32>
    %10 = arith.subf %9, %8 : vector<16x256xf32>
    %11 = math.exp %10 : vector<16x256xf32>
    %12 = math.log1p %11 : vector<16x256xf32>
    %13 = arith.addf %7, %12 : vector<16x256xf32>
    %14 = arith.truncf %13 : vector<16x256xf32> to vector<16x256xbf16>
    %c0_7 = arith.constant 0 : index
    %c0_8 = arith.constant 0 : index
    %15 = vector.load %arg4[%c0_7, %c0_8] : memref<256x256xbf16, #tpu.memory_space<vmem>>, vector<256x256xbf16>
    %cst_9 = arith.constant dense<0.000000e+00> : vector<16x256xf32>
    %16 = tpu.matmul %14, %15, %cst_9 {dimension_numbers = #tpu.dot_dimension_numbers<[1], [0], [0], [1], [0, 0, 1, 1], [], []>} : vector<16x256xbf16>, vector<256x256xbf16>, vector<16x256xf32> -> vector<16x256xf32>
    %c0_10 = arith.constant 0 : index
    %c0_11 = arith.constant 0 : index
    %17 = vector.load %arg5[%c0_10, %c0_11] : memref<1x256xf32, #tpu.memory_space<vmem>>, vector<1x256xf32>
    %18 = vector.broadcast %17 : vector<1x256xf32> to vector<16x256xf32>
    %19 = arith.addf %16, %18 : vector<16x256xf32>
    %cst_12 = arith.constant 0.000000e+00 : f32
    %20 = vector.broadcast %cst_12 : f32 to vector<16x256xf32>
    %21 = arith.maximumf %19, %20 : vector<16x256xf32>
    %22 = math.absf %19 : vector<16x256xf32>
    %cst_13 = arith.constant 0.000000e+00 : f32
    %23 = vector.broadcast %cst_13 : f32 to vector<16x256xf32>
    %24 = arith.subf %23, %22 : vector<16x256xf32>
    %25 = math.exp %24 : vector<16x256xf32>
    %26 = math.log1p %25 : vector<16x256xf32>
    %27 = arith.addf %21, %26 : vector<16x256xf32>
    %28 = arith.truncf %27 : vector<16x256xf32> to vector<16x256xbf16>
    %c0_14 = arith.constant 0 : index
    %c0_15 = arith.constant 0 : index
    %29 = vector.load %arg6[%c0_14, %c0_15] : memref<256x64xbf16, #tpu.memory_space<vmem>>, vector<256x64xbf16>
    %cst_16 = arith.constant dense<0.000000e+00> : vector<16x64xf32>
    %30 = tpu.matmul %28, %29, %cst_16 {dimension_numbers = #tpu.dot_dimension_numbers<[1], [0], [0], [1], [0, 0, 1, 1], [], []>} : vector<16x256xbf16>, vector<256x64xbf16>, vector<16x64xf32> -> vector<16x64xf32>
    %c0_17 = arith.constant 0 : index
    %c0_18 = arith.constant 0 : index
    %31 = vector.load %arg7[%c0_17, %c0_18] : memref<1x64xf32, #tpu.memory_space<vmem>>, vector<1x64xf32>
    %32 = vector.broadcast %31 : vector<1x64xf32> to vector<16x64xf32>
    %33 = arith.addf %30, %32 : vector<16x64xf32>
    %34 = vector.extract_strided_slice %33 {offsets = [0, 0], sizes = [16, 32], strides = [1, 1]} : vector<16x64xf32> to vector<16x32xf32>
    %35 = vector.extract_strided_slice %33 {offsets = [0, 32], sizes = [16, 32], strides = [1, 1]} : vector<16x64xf32> to vector<16x32xf32>
    %cst_19 = arith.constant 0.000000e+00 : f32
    %36 = vector.broadcast %cst_19 : f32 to vector<16x32xf32>
    %37 = arith.maximumf %35, %36 : vector<16x32xf32>
    %38 = math.absf %35 : vector<16x32xf32>
    %cst_20 = arith.constant 0.000000e+00 : f32
    %39 = vector.broadcast %cst_20 : f32 to vector<16x32xf32>
    %40 = arith.subf %39, %38 : vector<16x32xf32>
    %41 = math.exp %40 : vector<16x32xf32>
    %42 = math.log1p %41 : vector<16x32xf32>
    %43 = arith.addf %37, %42 : vector<16x32xf32>
    %44 = math.log %43 : vector<16x32xf32>
    %c0_21 = arith.constant 0 : index
    %c0_22 = arith.constant 0 : index
    %45 = vector.load %arg14[%c0_21, %c0_22] : memref<16x32xf32, #tpu.memory_space<vmem>>, vector<16x32xf32>
    %46 = arith.mulf %43, %45 : vector<16x32xf32>
    %47 = arith.addf %34, %46 : vector<16x32xf32>
    %48 = arith.truncf %47 : vector<16x32xf32> to vector<16x32xbf16>
    %c0_23 = arith.constant 0 : index
    %c0_24 = arith.constant 0 : index
    %49 = vector.load %arg8[%c0_23, %c0_24] : memref<32x256xbf16, #tpu.memory_space<vmem>>, vector<32x256xbf16>
    %cst_25 = arith.constant dense<0.000000e+00> : vector<16x256xf32>
    %50 = tpu.matmul %48, %49, %cst_25 {dimension_numbers = #tpu.dot_dimension_numbers<[1], [0], [0], [1], [0, 0, 1, 1], [], []>} : vector<16x32xbf16>, vector<32x256xbf16>, vector<16x256xf32> -> vector<16x256xf32>
    %c0_26 = arith.constant 0 : index
    %c0_27 = arith.constant 0 : index
    %51 = vector.load %arg9[%c0_26, %c0_27] : memref<1x256xf32, #tpu.memory_space<vmem>>, vector<1x256xf32>
    %52 = vector.broadcast %51 : vector<1x256xf32> to vector<16x256xf32>
    %53 = arith.addf %50, %52 : vector<16x256xf32>
    %cst_28 = arith.constant 0.000000e+00 : f32
    %54 = vector.broadcast %cst_28 : f32 to vector<16x256xf32>
    %55 = arith.maximumf %53, %54 : vector<16x256xf32>
    %56 = math.absf %53 : vector<16x256xf32>
    %cst_29 = arith.constant 0.000000e+00 : f32
    %57 = vector.broadcast %cst_29 : f32 to vector<16x256xf32>
    %58 = arith.subf %57, %56 : vector<16x256xf32>
    %59 = math.exp %58 : vector<16x256xf32>
    %60 = math.log1p %59 : vector<16x256xf32>
    %61 = arith.addf %55, %60 : vector<16x256xf32>
    %62 = arith.truncf %61 : vector<16x256xf32> to vector<16x256xbf16>
    %c0_30 = arith.constant 0 : index
    %c0_31 = arith.constant 0 : index
    %63 = vector.load %arg10[%c0_30, %c0_31] : memref<256x784xbf16, #tpu.memory_space<vmem>>, vector<256x784xbf16>
    %cst_32 = arith.constant dense<0.000000e+00> : vector<16x784xf32>
    %64 = tpu.matmul %62, %63, %cst_32 {dimension_numbers = #tpu.dot_dimension_numbers<[1], [0], [0], [1], [0, 0, 1, 1], [], []>} : vector<16x256xbf16>, vector<256x784xbf16>, vector<16x784xf32> -> vector<16x784xf32>
    %c0_33 = arith.constant 0 : index
    %c0_34 = arith.constant 0 : index
    %65 = vector.load %arg11[%c0_33, %c0_34] : memref<1x784xf32, #tpu.memory_space<vmem>>, vector<1x784xf32>
    %66 = vector.broadcast %65 : vector<1x784xf32> to vector<16x784xf32>
    %67 = arith.addf %64, %66 : vector<16x784xf32>
    %cst_35 = arith.constant 0.000000e+00 : f32
    %68 = vector.broadcast %cst_35 : f32 to vector<16x784xf32>
    %69 = arith.maximumf %67, %68 : vector<16x784xf32>
    %70 = math.absf %67 : vector<16x784xf32>
    %cst_36 = arith.constant 0.000000e+00 : f32
    %71 = vector.broadcast %cst_36 : f32 to vector<16x784xf32>
    %72 = arith.subf %71, %70 : vector<16x784xf32>
    %73 = math.exp %72 : vector<16x784xf32>
    %74 = math.log1p %73 : vector<16x784xf32>
    %75 = arith.addf %69, %74 : vector<16x784xf32>
    %c0_37 = arith.constant 0 : index
    %c0_38 = arith.constant 0 : index
    %76 = vector.load %arg12[%c0_37, %c0_38] : memref<256x784xbf16, #tpu.memory_space<vmem>>, vector<256x784xbf16>
    %cst_39 = arith.constant dense<0.000000e+00> : vector<16x784xf32>
    %77 = tpu.matmul %62, %76, %cst_39 {dimension_numbers = #tpu.dot_dimension_numbers<[1], [0], [0], [1], [0, 0, 1, 1], [], []>} : vector<16x256xbf16>, vector<256x784xbf16>, vector<16x784xf32> -> vector<16x784xf32>
    %c0_40 = arith.constant 0 : index
    %c0_41 = arith.constant 0 : index
    %78 = vector.load %arg13[%c0_40, %c0_41] : memref<1x784xf32, #tpu.memory_space<vmem>>, vector<1x784xf32>
    %79 = vector.broadcast %78 : vector<1x784xf32> to vector<16x784xf32>
    %80 = arith.addf %77, %79 : vector<16x784xf32>
    %cst_42 = arith.constant 0.000000e+00 : f32
    %81 = vector.broadcast %cst_42 : f32 to vector<16x784xf32>
    %82 = arith.maximumf %80, %81 : vector<16x784xf32>
    %83 = math.absf %80 : vector<16x784xf32>
    %cst_43 = arith.constant 0.000000e+00 : f32
    %84 = vector.broadcast %cst_43 : f32 to vector<16x784xf32>
    %85 = arith.subf %84, %83 : vector<16x784xf32>
    %86 = math.exp %85 : vector<16x784xf32>
    %87 = math.log1p %86 : vector<16x784xf32>
    %88 = arith.addf %82, %87 : vector<16x784xf32>
    %89 = math.exp %88 : vector<16x784xf32>
    %c0_44 = arith.constant 0 : index
    %c0_45 = arith.constant 0 : index
    %90 = vector.load %arg15[%c0_44, %c0_45] : memref<16x784xf32, #tpu.memory_space<vmem>>, vector<16x784xf32>
    %91 = arith.mulf %89, %90 : vector<16x784xf32>
    %92 = arith.addf %75, %91 : vector<16x784xf32>
    %93 = arith.negf %92 : vector<16x784xf32>
    %94 = math.exp %93 : vector<16x784xf32>
    %cst_46 = arith.constant 1.000000e+00 : f32
    %95 = vector.broadcast %cst_46 : f32 to vector<16x784xf32>
    %96 = arith.addf %95, %94 : vector<16x784xf32>
    %97 = arith.divf %95, %96 : vector<16x784xf32>
    %c0_47 = arith.constant 0 : index
    %c0_48 = arith.constant 0 : index
    %98 = vector.load %arg16[%c0_47, %c0_48] : memref<16x784xf32, #tpu.memory_space<vmem>>, vector<16x784xf32>
    tpu.vector_store %arg16[%c0_47, %c0_48], %97 {strides = array<i32>} : memref<16x784xf32, #tpu.memory_space<vmem>>, vector<16x784xf32>,
    %cst_49 = arith.constant 0.000000e+00 : f32
    %99 = vector.broadcast %cst_49 : f32 to vector<16x32xf32>
    %100 = tpu.concatenate %47, %34, %44, %99 in 1 : vector<16x32xf32>, vector<16x32xf32>, vector<16x32xf32>, vector<16x32xf32> -> vector<16x128xf32>
    %c0_50 = arith.constant 0 : index
    %c0_51 = arith.constant 0 : index
    %101 = vector.load %arg17[%c0_50, %c0_51] : memref<16x128xf32, #tpu.memory_space<vmem>>, vector<16x128xf32>
    tpu.vector_store %arg17[%c0_50, %c0_51], %100 {strides = array<i32>} : memref<16x128xf32, #tpu.memory_space<vmem>>, vector<16x128xf32>,
    return
  }
  func.func @transform_0(%arg0: i32) -> (i32, i32) {
    %c0_i32 = arith.constant 0 : i32
    %c0_i32_0 = arith.constant 0 : i32
    return %arg0, %c0_i32 : i32, i32
  }
  func.func @transform_1(%arg0: i32) -> (i32, i32) {
    %c0_i32 = arith.constant 0 : i32
    %c0_i32_0 = arith.constant 0 : i32
    %c0_i32_1 = arith.constant 0 : i32
    return %c0_i32, %c0_i32_0 : i32, i32
  }
  func.func @transform_2(%arg0: i32) -> (i32, i32) {
    %c0_i32 = arith.constant 0 : i32
    %c0_i32_0 = arith.constant 0 : i32
    %c0_i32_1 = arith.constant 0 : i32
    return %c0_i32, %c0_i32_0 : i32, i32
  }
  func.func @transform_3(%arg0: i32) -> (i32, i32) {
    %c0_i32 = arith.constant 0 : i32
    %c0_i32_0 = arith.constant 0 : i32
    %c0_i32_1 = arith.constant 0 : i32
    return %c0_i32, %c0_i32_0 : i32, i32
  }
  func.func @transform_4(%arg0: i32) -> (i32, i32) {
    %c0_i32 = arith.constant 0 : i32
    %c0_i32_0 = arith.constant 0 : i32
    %c0_i32_1 = arith.constant 0 : i32
    return %c0_i32, %c0_i32_0 : i32, i32
  }
  func.func @transform_5(%arg0: i32) -> (i32, i32) {
    %c0_i32 = arith.constant 0 : i32
    %c0_i32_0 = arith.constant 0 : i32
    %c0_i32_1 = arith.constant 0 : i32
    return %c0_i32, %c0_i32_0 : i32, i32
  }
  func.func @transform_6(%arg0: i32) -> (i32, i32) {
    %c0_i32 = arith.constant 0 : i32
    %c0_i32_0 = arith.constant 0 : i32
    %c0_i32_1 = arith.constant 0 : i32
    return %c0_i32, %c0_i32_0 : i32, i32
  }
  func.func @transform_7(%arg0: i32) -> (i32, i32) {
    %c0_i32 = arith.constant 0 : i32
    %c0_i32_0 = arith.constant 0 : i32
    %c0_i32_1 = arith.constant 0 : i32
    return %c0_i32, %c0_i32_0 : i32, i32
  }
  func.func @transform_8(%arg0: i32) -> (i32, i32) {
    %c0_i32 = arith.constant 0 : i32
    %c0_i32_0 = arith.constant 0 : i32
    %c0_i32_1 = arith.constant 0 : i32
    return %c0_i32, %c0_i32_0 : i32, i32
  }
  func.func @transform_9(%arg0: i32) -> (i32, i32) {
    %c0_i32 = arith.constant 0 : i32
    %c0_i32_0 = arith.constant 0 : i32
    %c0_i32_1 = arith.constant 0 : i32
    return %c0_i32, %c0_i32_0 : i32, i32
  }
  func.func @transform_10(%arg0: i32) -> (i32, i32) {
    %c0_i32 = arith.constant 0 : i32
    %c0_i32_0 = arith.constant 0 : i32
    %c0_i32_1 = arith.constant 0 : i32
    return %c0_i32, %c0_i32_0 : i32, i32
  }
  func.func @transform_11(%arg0: i32) -> (i32, i32) {
    %c0_i32 = arith.constant 0 : i32
    %c0_i32_0 = arith.constant 0 : i32
    %c0_i32_1 = arith.constant 0 : i32
    return %c0_i32, %c0_i32_0 : i32, i32
  }
  func.func @transform_12(%arg0: i32) -> (i32, i32) {
    %c0_i32 = arith.constant 0 : i32
    %c0_i32_0 = arith.constant 0 : i32
    %c0_i32_1 = arith.constant 0 : i32
    return %c0_i32, %c0_i32_0 : i32, i32
  }
  func.func @transform_13(%arg0: i32) -> (i32, i32) {
    %c0_i32 = arith.constant 0 : i32
    %c0_i32_0 = arith.constant 0 : i32
    return %arg0, %c0_i32 : i32, i32
  }
  func.func @transform_14(%arg0: i32) -> (i32, i32) {
    %c0_i32 = arith.constant 0 : i32
    %c0_i32_0 = arith.constant 0 : i32
    return %arg0, %c0_i32 : i32, i32
  }
  func.func @transform_15(%arg0: i32) -> (i32, i32) {
    %c0_i32 = arith.constant 0 : i32
    %c0_i32_0 = arith.constant 0 : i32
    return %arg0, %c0_i32 : i32, i32
  }
  func.func @transform_16(%arg0: i32) -> (i32, i32) {
    %c0_i32 = arith.constant 0 : i32
    %c0_i32_0 = arith.constant 0 : i32
    return %arg0, %c0_i32 : i32, i32
  }
}

</mosaic_0001>

<bundles_post_ra>
// kernel: vae_forward.1
= control target key start
LH: loop header
LB: loop body
LE: loop exit
PB: predicated region body
PF: predicated region fallthrough
CT: control target
= control target key end

     0   :  { %s8145_s0 = inlined_call_operand.vmem [shape: bf16[64,784], index: 0, kind: input, shape index: {}]   ;;  %s8146_s1 = inlined_call_operand.vmem [shape: bf16[784,256], index: 1, kind: input, shape index: {}]   ;;  %s8147_s2 = inlined_call_operand.vmem [shape: f32[1,256], index: 2, kind: input, shape index: {}]   ;;  %s8148_s3 = inlined_call_operand.vmem [shape: bf16[256,256], index: 3, kind: input, shape index: {}]   ;;  %s8149_s4 = inlined_call_operand.vmem [shape: f32[1,256], index: 4, kind: input, shape index: {}]   ;;  %s8150_s5 = inlined_call_operand.vmem [shape: bf16[256,64], index: 5, kind: input, shape index: {}]   ;;  %s8151_s6 = inlined_call_operand.vmem [shape: f32[1,64], index: 6, kind: input, shape index: {}]   ;;  %s8152_s7 = inlined_call_operand.vmem [shape: bf16[32,256], index: 7, kind: input, shape index: {}]   ;;  %s8153_s8 = inlined_call_operand.vmem [shape: f32[1,256], index: 8, kind: input, shape index: {}]   ;;  %s8154_s9 = inlined_call_operand.vmem [shape: bf16[256,784], index: 9, kind: input, shape index: {}]   ;;  %s8155_s10 = inlined_call_operand.vmem [shape: f32[1,784], index: 10, kind: input, shape index: {}]   ;;  %s8156_s11 = inlined_call_operand.vmem [shape: bf16[256,784], index: 11, kind: input, shape index: {}]   ;;  %s8157_s12 = inlined_call_operand.vmem [shape: f32[1,784], index: 12, kind: input, shape index: {}]   ;;  %s8158_s13 = inlined_call_operand.vmem [shape: f32[64,32], index: 13, kind: input, shape index: {}]   ;;  %s8159_s14 = inlined_call_operand.vmem [shape: f32[64,784], index: 14, kind: input, shape index: {}]   ;;  %s8160_s15 = inlined_call_operand.hbm [shape: f32[64,784], index: 15, kind: output, shape index: {0}]   ;;  %s8161_s16 = inlined_call_operand.vmem [shape: f32[64,128], index: 16, kind: output, shape index: {1}]  }
   0x1   :  { %8170 = sst [smem:[#allocation11_spill]] %s8145_s0 }
   0x2   :  { %8171 = sst [smem:[#allocation12_spill]] %s8160_s15 }
   0x3   :  { %22 = vsyncpa [#allocation3], 0 }
   0x4   :  { %24 = vsyncpa [#allocation3 + $0x1], 0  ;;  %s6230_s21 = smov 0   ;;  %s6232_s22 = smov 0  }
   0x5   :  { %s6234_s23 = smov 0   ;;  %s6236_s24 = smov 0  }
   0x6 LB: > { %8172 = sst [smem:[#allocation5_spill]] %s6125_s21  ;;  %s6251_s25 = sadd.s32 4294967295, %s6137_s24   ;;  %s6137_s24 = sphi %s6236_s24, %s8224_s24   ;;  %s6133_s23 = sphi %s6234_s23, %s8226_s23   ;;  %s6129_s22 = sphi %s6232_s22, %s8228_s22   ;;  %s6125_s21 = sphi %s6230_s21, %s8227_s21  }
   0x7   : > { %8173 = sst [smem:[#allocation6_spill]] %s6133_s23  ;;  %s4727_s26 = sadd.s32 4294967294, %s6137_s24  }
   0x8   : > { %8174 = sst [smem:[#allocation7_spill]] %s6137_s24  ;;  %s6255_s27 = sadd.s32 1, %s6137_s24  }
   0x9   : > { %8175 = sst [smem:[#allocation8_spill]] %s6255_s27  ;;  %s367_s28 = sadd.s32 1, %s6133_s23 }
   0xa   : > { %s364_s29 = ssub.s32 %s6137_s24, %s6255_s27  ;;  %p377_p0 = scmp.ne.s32.totalorder %s6133_s23, %s6129_s22 }
   0xb   : > { %p365_p1 = scmp.eq.s32.totalorder %s364_s29, 0  ;;  %p378_p2 = scmp.eq.s32.totalorder %s6251_s25, 3 }
   0xc   : > { %p383_p3 = scmp.ne.s32.totalorder %s6129_s22, %s6125_s21  ;;  %p384_p4 = scmp.eq.s32.totalorder %s4727_s26, 3 }
   0xd   : > { %s6266_s30 = scalar_select %p365_p1, %s6133_s23, %s367_s28  }
   0xe   : > { %p6268_p5 = por %p378_p2, %p377_p0  ;;  %p6272_p6 = por %p384_p4, %p383_p3 }
   0xf   : > { %8176 = sst [smem:[#allocation9_spill]] %s6266_s30  ;;  %p4730_p7 = scmp.ge.s32.totalorder %s6137_s24, 1 }
  0x10   : > { %s8178_s17 = scalar_select %p6272_p6, 1, 0 }
  0x11   : > { %p493_p8 = scmp.lt.s32.totalorder %s6137_s24, 5 }
  0x12   : > { %8179 = sst [smem:[#allocation10_spill]] %s8178_s17 }
  0x13   : > { %p494_p9 = pnand %p4730_p7, %p493_p8 }
  0x14   : > { %v5272_v0 = vld [vmem:[%s8146_s1 + $0x4] ss:$8 sps:$4 sm:$0xff] (!%p494_p9)   ;;  %v5274_v1 = vld [vmem:[%s8146_s1] ss:$8 sps:$4 sm:$0xff] (!%p494_p9)   ;;  %v5275_v2 = vld [vmem:[%s8146_s1 + $0x14] ss:$8 sps:$4 sm:$0xff] (!%p494_p9)  }
  0x15   : > { %497 = sbr.rel (%p494_p9) target bundleno = 1863 (0x747), region = 80  ;;  %1235 = vmatprep.subr.bf16.mxu0 (!%p494_p9), %v5272_v0  ;;  %v5277_v3 = vld [vmem:[%s8146_s1 + $0x10] ss:$8 sps:$4 sm:$0xff] (!%p494_p9)   ;;  %v5278_v4 = vld [vmem:[%s8146_s1 + $0x24] ss:$8 sps:$4 sm:$0xff] (!%p494_p9)   ;;  %s4731_s18 = sshll.u32 (!%p494_p9), %s6251_s25, 1 }
  0x16   : > { %1236 = vmatpush1.bf16.msra.mxu0 (!%p494_p9), %v5274_v1  ;;  %v5280_v5 = vld [vmem:[%s8146_s1 + $0x20] ss:$8 sps:$4 sm:$0xff] (!%p494_p9)   ;;  %p561_p10 = scmp.lt.s32.totalorder (!%p494_p9), %s4731_s18, 7  ;;  %v5281_v6 = vld [vmem:[%s8146_s1 + $0x34] ss:$8 sps:$4 sm:$0xff] (!%p494_p9)   ;;  %s8180_s27 = sld [smem:[#allocation11_spill]] (!%p494_p9) }
  0x17   : > { %1237 = vmatprep.subr.bf16.mxu0 (!%p494_p9), %v5275_v2  ;;  %v5283_v7 = vld [vmem:[%s8146_s1 + $0x30] ss:$8 sps:$4 sm:$0xff] (!%p494_p9)   ;;  %v5284_v8 = vld [vmem:[%s8146_s1 + $0x44] ss:$8 sps:$4 sm:$0xff] (!%p494_p9)   ;;  %v5286_v9 = vld [vmem:[%s8146_s1 + $0x40] ss:$8 sps:$4 sm:$0xff] (!%p494_p9)  }
  0x18   : > { %v5287_v10 = vld [vmem:[%s8146_s1 + $0x54] ss:$8 sps:$4 sm:$0xff] (!%p494_p9)   ;;  %v5289_v11 = vld [vmem:[%s8146_s1 + $0x50] ss:$8 sps:$4 sm:$0xff] (!%p494_p9)   ;;  %v5290_v12 = vld [vmem:[%s8146_s1 + $0x64] ss:$8 sps:$4 sm:$0xff] (!%p494_p9)  }
  0x19   : > { %v5292_v14 = vld [vmem:[%s8146_s1 + $0x60] ss:$8 sps:$4 sm:$0xff] (!%p494_p9)   ;;  %v5293_v15 = vld [vmem:[%s8146_s1 + $0x74] ss:$8 sps:$4 sm:$0xff] (!%p494_p9)   ;;  %v5295_v16 = vld [vmem:[%s8146_s1 + $0x70] ss:$8 sps:$4 sm:$0xff] (!%p494_p9)  }
  0x1a   : > { %1238 = vmatpush1.bf16.msra.mxu0 (!%p494_p9), %v5277_v3  ;;  %v5296_v17 = vld [vmem:[%s8146_s1 + $0x84] ss:$8 sps:$4 sm:$0xff] (!%p494_p9)   ;;  %v5298_v18 = vld [vmem:[%s8146_s1 + $0x80] ss:$8 sps:$4 sm:$0xff] (!%p494_p9)   ;;  %v5299_v19 = vld [vmem:[%s8146_s1 + $0x94] ss:$8 sps:$4 sm:$0xff] (!%p494_p9)  }
  0x1b   : > { %1239 = vmatprep.subr.bf16.mxu0 (!%p494_p9), %v5278_v4  ;;  %v5301_v20 = vld [vmem:[%s8146_s1 + $0x90] ss:$8 sps:$4 sm:$0xff] (!%p494_p9)   ;;  %v5302_v21 = vld [vmem:[%s8146_s1 + $0xa4] ss:$8 sps:$4 sm:$0xff] (!%p494_p9)   ;;  %v5304_v22 = vld [vmem:[%s8146_s1 + $0xa0] ss:$8 sps:$4 sm:$0xff] (!%p494_p9)  }
  0x1c   : > { %s8230_s18 = smov (!%p561_p10, %s4731_s18), 7  ;;  %v5305_v23 = vld [vmem:[%s8146_s1 + $0xb4] ss:$8 sps:$4 sm:$0xff]   ;;  %v5307_v24 = vld [vmem:[%s8146_s1 + $0xb0] ss:$8 sps:$4 sm:$0xff]   ;;  %v6139_v38 = vmov 0  }
  0x1d   : > { %s5225_s20 = smul.u32 28, %s8230_s18  ;;  %v5308_v25 = vld [vmem:[%s8146_s1 + $0xc4] ss:$8 sps:$4 sm:$0xff]   ;;  %v5310_v26 = vld [vmem:[%s8146_s1 + $0xc0] ss:$8 sps:$4 sm:$0xff]   ;;  %1396 = vmatprep.mubr.bf16.mxu1 %v6139_v38  ;;  %vm1231_vm0 = vcmask 130048  }
  0x1e   : > { %1240 = vmatpush1.bf16.msra.mxu0 %v5280_v5  ;;  %v5311_v27 = vld [vmem:[%s8146_s1 + $0xd4] ss:$8 sps:$4 sm:$0xff]   ;;  %v5313_v28 = vld [vmem:[%s8146_s1 + $0xd0] ss:$8 sps:$4 sm:$0xff]   ;;  %v5314_v29 = vld [vmem:[%s8146_s1 + $0xe4] ss:$8 sps:$4 sm:$0xff]  }
  0x1f   : > { %1241 = vmatprep.subr.bf16.mxu0 %v5281_v6  ;;  %s6321_s17 = scalar_lea.vmem %s8180_s27, %s5225_s20  ;;  %v5316_v30 = vld [vmem:[%s8146_s1 + $0xe0] ss:$8 sps:$4 sm:$0xff]   ;;  %v5317_v31 = vld [vmem:[%s8146_s1 + $0xf4] ss:$8 sps:$4 sm:$0xff]   ;;  %v5319_v32 = vld [vmem:[%s8146_s1 + $0xf0] ss:$8 sps:$4 sm:$0xff]  }
  0x20   : > { %v5322_v13 = vld [vmem:[%s6321_s17 + $0x4] ss:$28 sps:$4 sm:$0xff]   ;;  %v5373_v36 = vld [vmem:[%s6321_s17 + $0xc] ss:$28 sps:$4 sm:$0xff]   ;;  %v5328_v37 = vld [vmem:[%s8146_s1 + $0x114] ss:$8 sps:$4 sm:$0xff]  }
  0x21   : > { %1267 = vmatprep.mubr.bf16.mxu0 %v5322_v13  ;;  %v5325_v33 = vld [vmem:[%s8146_s1 + $0x104] ss:$8 sps:$4 sm:$0xff]   ;;  %v5320_v34 = vld [vmem:[%s6321_s17] ss:$28 sps:$4 sm:$0xff]   ;;  %v5326_v40 = vld [vmem:[%s8146_s1 + $0x110] ss:$8 sps:$4 sm:$0xff]  }
  0x22   : > { %1242 = vmatpush1.bf16.msra.mxu0 %v5283_v7  ;;  %v5323_v35 = vld [vmem:[%s8146_s1 + $0x100] ss:$8 sps:$4 sm:$0xff]   ;;  %v5419_v39 = vld [vmem:[%s8146_s1 + $0x304] ss:$8 sps:$4 sm:$0xff]   ;;  %v5428_v44 = vld [vmem:[%s6321_s17 + $0x18] ss:$28 sps:$4 sm:$0xff]  }
  0x23   : > { %1243 = vmatprep.subr.bf16.mxu0 %v5284_v8  ;;  %v5424_v41 = vld [vmem:[%s8146_s1 + $0x300] ss:$8 sps:$4 sm:$0xff]   ;;  %v5331_v42 = vld [vmem:[%s8146_s1 + $0x124] ss:$8 sps:$4 sm:$0xff]   ;;  %1364 = vmatprep.subr.bf16.mxu1 %v5419_v39  ;;  %v5334_v47 = vld [vmem:[%s8146_s1 + $0x134] ss:$8 sps:$4 sm:$0xff]  }
  0x24   : > { %v5329_v43 = vld [vmem:[%s8146_s1 + $0x120] ss:$8 sps:$4 sm:$0xff]   ;;  %1365 = vmatpush1.bf16.msra.mxu1 %v5424_v41  ;;  %v5431_v46 = vld [vmem:[%s8148_s3 + $0x4] ss:$8 sps:$4 sm:$0xff]   ;;  %v5434_v48 = vld [vmem:[%s8148_s3 + $0x14] ss:$8 sps:$4 sm:$0xff]  }
  0x25   : > { %v5429_v45 = vld [vmem:[%s8148_s3] ss:$8 sps:$4 sm:$0xff]   ;;  %1673 = vmatprep.subr.bf16.mxu1 %v5431_v46  ;;  %v5432_v49 = vld [vmem:[%s8148_s3 + $0x10] ss:$8 sps:$4 sm:$0xff]   ;;  %v5437_v51 = vld [vmem:[%s8148_s3 + $0x24] ss:$8 sps:$4 sm:$0xff]  }
  0x26   : > { %1244 = vmatpush1.bf16.msra.mxu0 %v5286_v9  ;;  %v5332_v50 = vld [vmem:[%s8146_s1 + $0x130] ss:$8 sps:$4 sm:$0xff]   ;;  %v5337_v52 = vld [vmem:[%s8146_s1 + $0x144] ss:$8 sps:$4 sm:$0xff]   ;;  %v5435_v53 = vld [vmem:[%s8148_s3 + $0x20] ss:$8 sps:$4 sm:$0xff]  }
  0x27   : > { %1245 = vmatprep.subr.bf16.mxu0 %v5287_v10  ;;  %4844 = vmatmul.mubr.msk.bf16.vlgmr.msra.gmra.mrb[0].mxu1 %vm1231_vm0, %v5428_v44  ;;  %v5335_v54 = vld [vmem:[%s8146_s1 + $0x140] ss:$8 sps:$4 sm:$0xff]   ;;  %v5440_v55 = vld [vmem:[%s8148_s3 + $0x34] ss:$8 sps:$4 sm:$0xff]   ;;  %v5438_v57 = vld [vmem:[%s8148_s3 + $0x30] ss:$8 sps:$4 sm:$0xff]  }
  0x28   : > { %1674 = vmatpush1.bf16.msra.mxu1 %v5429_v45  ;;  %v5340_v56 = vld [vmem:[%s8146_s1 + $0x154] ss:$8 sps:$4 sm:$0xff]   ;;  %v5338_v58 = vld [vmem:[%s8146_s1 + $0x150] ss:$8 sps:$4 sm:$0xff]   ;;  %v5443_v59 = vld [vmem:[%s8148_s3 + $0x44] ss:$8 sps:$4 sm:$0xff]  }
  0x29   : > { %1675 = vmatprep.subr.bf16.mxu1 %v5434_v48  ;;  %v5343_v60 = vld [vmem:[%s8146_s1 + $0x164] ss:$8 sps:$4 sm:$0xff]   ;;  %v5441_v61 = vld [vmem:[%s8148_s3 + $0x40] ss:$8 sps:$4 sm:$0xff]   ;;  %v5346_v63 = vld [vmem:[%s8146_s1 + $0x174] ss:$8 sps:$4 sm:$0xff]  }
  0x2a   : > { %1246 = vmatpush1.bf16.msra.mxu0 %v5289_v11  ;;  %v5341_v62 = vld [vmem:[%s8146_s1 + $0x160] ss:$8 sps:$4 sm:$0xff]   ;;  %v5344_v0 = vld [vmem:[%s8146_s1 + $0x170] ss:$8 sps:$4 sm:$0xff]   ;;  %v5349_v1 = vld [vmem:[%s8146_s1 + $0x184] ss:$8 sps:$4 sm:$0xff]  }
  0x2b   : > { %1247 = vmatprep.subr.bf16.mxu0 %v5290_v12  ;;  %v5347_v2 = vld [vmem:[%s8146_s1 + $0x180] ss:$8 sps:$4 sm:$0xff]   ;;  %v5352_v3 = vld [vmem:[%s8146_s1 + $0x194] ss:$8 sps:$4 sm:$0xff]   ;;  %v5350_v4 = vld [vmem:[%s8146_s1 + $0x190] ss:$8 sps:$4 sm:$0xff]  }
  0x2c   : > { %1676 = vmatpush1.bf16.msra.mxu1 %v5432_v49  ;;  %v5355_v5 = vld [vmem:[%s8146_s1 + $0x1a4] ss:$8 sps:$4 sm:$0xff]   ;;  %v5353_v6 = vld [vmem:[%s8146_s1 + $0x1a0] ss:$8 sps:$4 sm:$0xff]   ;;  %v5358_v7 = vld [vmem:[%s8146_s1 + $0x1b4] ss:$8 sps:$4 sm:$0xff]  }
  0x2d   : > { %1677 = vmatprep.subr.bf16.mxu1 %v5437_v51  ;;  %v5356_v8 = vld [vmem:[%s8146_s1 + $0x1b0] ss:$8 sps:$4 sm:$0xff]   ;;  %v5361_v9 = vld [vmem:[%s8146_s1 + $0x1c4] ss:$8 sps:$4 sm:$0xff]   ;;  %v5359_v10 = vld [vmem:[%s8146_s1 + $0x1c0] ss:$8 sps:$4 sm:$0xff]  }
  0x2e   : > { %1248 = vmatpush1.bf16.msra.mxu0 %v5292_v14  ;;  %v5364_v11 = vld [vmem:[%s8146_s1 + $0x1d4] ss:$8 sps:$4 sm:$0xff]   ;;  %v5362_v12 = vld [vmem:[%s8146_s1 + $0x1d0] ss:$8 sps:$4 sm:$0xff]   ;;  %v5367_v13 = vld [vmem:[%s8146_s1 + $0x1e4] ss:$8 sps:$4 sm:$0xff]  }
  0x2f   : > { %1249 = vmatprep.subr.bf16.mxu0 %v5293_v15  ;;  %v5365_v14 = vld [vmem:[%s8146_s1 + $0x1e0] ss:$8 sps:$4 sm:$0xff]   ;;  %v5370_v15 = vld [vmem:[%s8146_s1 + $0x1f4] ss:$8 sps:$4 sm:$0xff]   ;;  %v5401_v39 = vld [vmem:[%s8146_s1 + $0x290] ss:$8 sps:$4 sm:$0xff]  }
  0x30   : > { %1678 = vmatpush1.bf16.msra.mxu1 %v5435_v53  ;;  %v5404_v41 = vld [vmem:[%s8146_s1 + $0x2a0] ss:$8 sps:$4 sm:$0xff]   ;;  %v5412_v44 = vld [vmem:[%s8146_s1 + $0x2c4] ss:$8 sps:$4 sm:$0xff]   ;;  %v5415_v46 = vld [vmem:[%s8146_s1 + $0x2d4] ss:$8 sps:$4 sm:$0xff]  }
  0x31   : > { %1679 = vmatprep.subr.bf16.mxu1 %v5440_v55  ;;  %v5410_v45 = vld [vmem:[%s8146_s1 + $0x2c0] ss:$8 sps:$4 sm:$0xff]   ;;  %v5418_v48 = vld [vmem:[%s8146_s1 + $0x2e4] ss:$8 sps:$4 sm:$0xff]   ;;  %v5421_v51 = vld [vmem:[%s8146_s1 + $0x2f0] ss:$8 sps:$4 sm:$0xff]  }
  0x32   : > { %1250 = vmatpush1.bf16.msra.mxu0 %v5295_v16  ;;  %v5368_v16 = vld [vmem:[%s8146_s1 + $0x1f0] ss:$8 sps:$4 sm:$0xff]   ;;  %v5416_v49 = vld [vmem:[%s8146_s1 + $0x2e0] ss:$8 sps:$4 sm:$0xff]   ;;  %v5446_v53 = vld [vmem:[%s8148_s3 + $0x54] ss:$8 sps:$4 sm:$0xff]  }
  0x33   : > { %1251 = vmatprep.subr.bf16.mxu0 %v5296_v17  ;;  %v5376_v17 = vld [vmem:[%s8146_s1 + $0x204] ss:$8 sps:$4 sm:$0xff]   ;;  %s8169_s15 = sshll.u32 %s8230_s18, 3  ;;  %s6140_s27 = smov 32   ;;  %vm2047_vm11 = vcmask 261120   ;;  %vm4584_vm12 = vcmask 523264  }
  0x34   : > { %1680 = vmatpush1.bf16.msra.mxu1 %v5438_v57  ;;  %v5449_v55 = vld [vmem:[%s8148_s3 + $0x64] ss:$8 sps:$4 sm:$0xff]   ;;  %v5447_v57 = vld [vmem:[%s8148_s3 + $0x60] ss:$8 sps:$4 sm:$0xff]   ;;  %s571_s20 = scalar_lea.vmem %s8158_s13, %s8169_s15  ;;  %s6141_s26 = smov 96   ;;  %vm4587_vm13 = vcmask 785408  }
  0x35   : > { %1681 = vmatprep.subr.bf16.mxu1 %v5443_v59  ;;  %s8185_s19 = sshll.u32 %s8230_s18, 3  ;;  %s8220_s30 = sld [smem:[#allocation12_spill]] }
  0x36   : > { %1252 = vmatpush1.bf16.msra.mxu0 %v5298_v18  ;;  %v5371_v18 = vld [vmem:[%s6321_s17 + $0x8] ss:$28 sps:$4 sm:$0xff]  }
  0x37   : > { %1253 = vmatprep.subr.bf16.mxu0 %v5299_v19  ;;  %v5374_v19 = vld [vmem:[%s8146_s1 + $0x200] ss:$8 sps:$4 sm:$0xff]  }
  0x38   : > { %1682 = vmatpush1.bf16.msra.mxu1 %v5441_v61  ;;  %v5452_v61 = vld [vmem:[%s8148_s3 + $0x74] ss:$8 sps:$4 sm:$0xff]  }
  0x39   : > { %1683 = vmatprep.subr.bf16.mxu1 %v5446_v53 }
  0x3a   : > { %1254 = vmatpush1.bf16.msra.mxu0 %v5301_v20  ;;  %v5427_v20 = vld [vmem:[%s6321_s17 + $0x14] ss:$28 sps:$4 sm:$0xff]  }
  0x3b   : > { %1255 = vmatprep.subr.bf16.mxu0 %v5302_v21  ;;  %v5379_v21 = vld [vmem:[%s8146_s1 + $0x214] ss:$8 sps:$4 sm:$0xff]  }
  0x3e   : > { %1256 = vmatpush1.bf16.msra.mxu0 %v5304_v22  ;;  %v5377_v22 = vld [vmem:[%s8146_s1 + $0x210] ss:$8 sps:$4 sm:$0xff]  }
  0x3f   : > { %1257 = vmatprep.subr.bf16.mxu0 %v5305_v23  ;;  %v5382_v23 = vld [vmem:[%s8146_s1 + $0x224] ss:$8 sps:$4 sm:$0xff]  }
  0x42   : > { %1258 = vmatpush1.bf16.msra.mxu0 %v5307_v24  ;;  %v5380_v24 = vld [vmem:[%s8146_s1 + $0x220] ss:$8 sps:$4 sm:$0xff]  }
  0x43   : > { %1259 = vmatprep.subr.bf16.mxu0 %v5308_v25  ;;  %v5385_v25 = vld [vmem:[%s8146_s1 + $0x234] ss:$8 sps:$4 sm:$0xff]  }
  0x46   : > { %1260 = vmatpush1.bf16.msra.mxu0 %v5310_v26  ;;  %v5383_v26 = vld [vmem:[%s8146_s1 + $0x230] ss:$8 sps:$4 sm:$0xff]  }
  0x47   : > { %1261 = vmatprep.subr.bf16.mxu0 %v5311_v27  ;;  %v5388_v27 = vld [vmem:[%s8146_s1 + $0x244] ss:$8 sps:$4 sm:$0xff]  }
  0x4a   : > { %1262 = vmatpush1.bf16.msra.mxu0 %v5313_v28  ;;  %v5386_v28 = vld [vmem:[%s8146_s1 + $0x240] ss:$8 sps:$4 sm:$0xff]  }
  0x4b   : > { %1263 = vmatprep.subr.bf16.mxu0 %v5314_v29  ;;  %v5391_v29 = vld [vmem:[%s8146_s1 + $0x254] ss:$8 sps:$4 sm:$0xff]  }
  0x4e   : > { %1264 = vmatpush1.bf16.msra.mxu0 %v5316_v30  ;;  %v5389_v30 = vld [vmem:[%s8146_s1 + $0x250] ss:$8 sps:$4 sm:$0xff]  }
  0x4f   : > { %1265 = vmatprep.subr.bf16.mxu0 %v5317_v31  ;;  %v5394_v31 = vld [vmem:[%s8146_s1 + $0x264] ss:$8 sps:$4 sm:$0xff]  }
  0x52   : > { %1266 = vmatpush1.bf16.msra.mxu0 %v5319_v32  ;;  %v5392_v32 = vld [vmem:[%s8146_s1 + $0x260] ss:$8 sps:$4 sm:$0xff]  }
  0x53   : > { %1278 = vmatprep.subr.bf16.mxu0 %v5325_v33  ;;  %v5397_v33 = vld [vmem:[%s8146_s1 + $0x274] ss:$8 sps:$4 sm:$0xff]  }
  0x55   : > { %1268 = vmatmul.mubr.bf16.vlgmr.msra.gmra.mrb[0].mxu0 %v5320_v34  ;;  %v5395_v34 = vld [vmem:[%s8146_s1 + $0x270] ss:$8 sps:$4 sm:$0xff]  }
  0x56   : > { %1279 = vmatpush1.bf16.msra.mxu0 %v5323_v35  ;;  %1310 = vmatprep.mubr.bf16.mxu0 %v5373_v36  ;;  %v5400_v35 = vld [vmem:[%s8146_s1 + $0x284] ss:$8 sps:$4 sm:$0xff]   ;;  %v5398_v36 = vld [vmem:[%s8146_s1 + $0x280] ss:$8 sps:$4 sm:$0xff]  }
  0x57   : > { %1280 = vmatprep.subr.bf16.mxu0 %v5328_v37  ;;  %v5403_v37 = vld [vmem:[%s8146_s1 + $0x294] ss:$8 sps:$4 sm:$0xff]  }
  0x5a   : > { %1281 = vmatpush1.bf16.msra.mxu0 %v5326_v40  ;;  %v5406_v40 = vld [vmem:[%s8146_s1 + $0x2a4] ss:$8 sps:$4 sm:$0xff]  }
  0x5b   : > { %1282 = vmatprep.subr.bf16.mxu0 %v5331_v42  ;;  %v5409_v42 = vld [vmem:[%s8146_s1 + $0x2b4] ss:$8 sps:$4 sm:$0xff]  }
  0x5e   : > { %1283 = vmatpush1.bf16.msra.mxu0 %v5329_v43  ;;  %v5407_v43 = vld [vmem:[%s8146_s1 + $0x2b0] ss:$8 sps:$4 sm:$0xff]  }
  0x5f   : > { %1284 = vmatprep.subr.bf16.mxu0 %v5334_v47  ;;  %v5413_v47 = vld [vmem:[%s8146_s1 + $0x2d0] ss:$8 sps:$4 sm:$0xff]  }
  0x62   : > { %1285 = vmatpush1.bf16.msra.mxu0 %v5332_v50  ;;  %v5423_v50 = vld [vmem:[%s8146_s1 + $0x2f4] ss:$8 sps:$4 sm:$0xff]  }
  0x63   : > { %1286 = vmatprep.subr.bf16.mxu0 %v5337_v52  ;;  %v5425_v52 = vld [vmem:[%s6321_s17 + $0x10] ss:$28 sps:$4 sm:$0xff]   ;;  %s550_s17 = sand.u32 1, %s6129_s22  }
  0x66   : > { %1287 = vmatpush1.bf16.msra.mxu0 %v5335_v54  ;;  %v5444_v54 = vld [vmem:[%s8148_s3 + $0x50] ss:$8 sps:$4 sm:$0xff]  }
  0x67   : > { %1288 = vmatprep.subr.bf16.mxu0 %v5340_v56  ;;  %1684 = vmatpush1.bf16.msra.mxu1 %v5444_v54 }
  0x68   : > { %1685 = vmatprep.subr.bf16.mxu1 %v5449_v55 }
  0x6a   : > { %1289 = vmatpush1.bf16.msra.mxu0 %v5338_v58 }
  0x6b   : > { %1290 = vmatprep.subr.bf16.mxu0 %v5343_v60  ;;  %1686 = vmatpush1.bf16.msra.mxu1 %v5447_v57 }
  0x6c   : > { %1687 = vmatprep.subr.bf16.mxu1 %v5452_v61 }
  0x6e   : > { %1291 = vmatpush1.bf16.msra.mxu0 %v5341_v62  ;;  %v5450_v62 = vld [vmem:[%s8148_s3 + $0x70] ss:$8 sps:$4 sm:$0xff]  }
  0x6f   : > { %1292 = vmatprep.subr.bf16.mxu0 %v5346_v63  ;;  %1688 = vmatpush1.bf16.msra.mxu1 %v5450_v62  ;;  %v5455_v63 = vld [vmem:[%s8148_s3 + $0x84] ss:$8 sps:$4 sm:$0xff]  }
  0x70   : > { %1689 = vmatprep.subr.bf16.mxu1 %v5455_v63 }
  0x72   : > { %1293 = vmatpush1.bf16.msra.mxu0 %v5344_v0  ;;  %v5453_v0 = vld [vmem:[%s8148_s3 + $0x80] ss:$8 sps:$4 sm:$0xff]  }
  0x73   : > { %1294 = vmatprep.subr.bf16.mxu0 %v5349_v1  ;;  %1690 = vmatpush1.bf16.msra.mxu1 %v5453_v0  ;;  %v5458_v1 = vld [vmem:[%s8148_s3 + $0x94] ss:$8 sps:$4 sm:$0xff]  }
  0x74   : > { %1691 = vmatprep.subr.bf16.mxu1 %v5458_v1 }
  0x76   : > { %1295 = vmatpush1.bf16.msra.mxu0 %v5347_v2  ;;  %v5456_v2 = vld [vmem:[%s8148_s3 + $0x90] ss:$8 sps:$4 sm:$0xff]  }
  0x77   : > { %1296 = vmatprep.subr.bf16.mxu0 %v5352_v3  ;;  %1692 = vmatpush1.bf16.msra.mxu1 %v5456_v2  ;;  %v5461_v3 = vld [vmem:[%s8148_s3 + $0xa4] ss:$8 sps:$4 sm:$0xff]  }
  0x78   : > { %1693 = vmatprep.subr.bf16.mxu1 %v5461_v3 }
  0x7a   : > { %1297 = vmatpush1.bf16.msra.mxu0 %v5350_v4  ;;  %v5459_v4 = vld [vmem:[%s8148_s3 + $0xa0] ss:$8 sps:$4 sm:$0xff]  }
  0x7b   : > { %1298 = vmatprep.subr.bf16.mxu0 %v5355_v5  ;;  %1694 = vmatpush1.bf16.msra.mxu1 %v5459_v4  ;;  %v5464_v5 = vld [vmem:[%s8148_s3 + $0xb4] ss:$8 sps:$4 sm:$0xff]  }
  0x7c   : > { %1695 = vmatprep.subr.bf16.mxu1 %v5464_v5 }
  0x7e   : > { %1299 = vmatpush1.bf16.msra.mxu0 %v5353_v6  ;;  %v5462_v6 = vld [vmem:[%s8148_s3 + $0xb0] ss:$8 sps:$4 sm:$0xff]  }
  0x7f   : > { %1300 = vmatprep.subr.bf16.mxu0 %v5358_v7  ;;  %1696 = vmatpush1.bf16.msra.mxu1 %v5462_v6  ;;  %v5467_v7 = vld [vmem:[%s8148_s3 + $0xc4] ss:$8 sps:$4 sm:$0xff]  }
  0x80   : > { %1697 = vmatprep.subr.bf16.mxu1 %v5467_v7 }
  0x82   : > { %1301 = vmatpush1.bf16.msra.mxu0 %v5356_v8  ;;  %v5465_v8 = vld [vmem:[%s8148_s3 + $0xc0] ss:$8 sps:$4 sm:$0xff]  }
  0x83   : > { %1302 = vmatprep.subr.bf16.mxu0 %v5361_v9  ;;  %1698 = vmatpush1.bf16.msra.mxu1 %v5465_v8  ;;  %v5470_v9 = vld [vmem:[%s8148_s3 + $0xd4] ss:$8 sps:$4 sm:$0xff]  }
  0x84   : > { %1699 = vmatprep.subr.bf16.mxu1 %v5470_v9 }
  0x86   : > { %1303 = vmatpush1.bf16.msra.mxu0 %v5359_v10  ;;  %v5468_v10 = vld [vmem:[%s8148_s3 + $0xd0] ss:$8 sps:$4 sm:$0xff]  }
  0x87   : > { %1304 = vmatprep.subr.bf16.mxu0 %v5364_v11  ;;  %1700 = vmatpush1.bf16.msra.mxu1 %v5468_v10  ;;  %v5473_v11 = vld [vmem:[%s8148_s3 + $0xe4] ss:$8 sps:$4 sm:$0xff]  }
  0x88   : > { %1701 = vmatprep.subr.bf16.mxu1 %v5473_v11 }
  0x8a   : > { %1305 = vmatpush1.bf16.msra.mxu0 %v5362_v12  ;;  %v5471_v12 = vld [vmem:[%s8148_s3 + $0xe0] ss:$8 sps:$4 sm:$0xff]  }
  0x8b   : > { %1306 = vmatprep.subr.bf16.mxu0 %v5367_v13  ;;  %1702 = vmatpush1.bf16.msra.mxu1 %v5471_v12  ;;  %v5474_v13 = vld [vmem:[%s8148_s3 + $0xf0] ss:$8 sps:$4 sm:$0xff]  }
  0x8e   : > { %1307 = vmatpush1.bf16.msra.mxu0 %v5365_v14  ;;  %v5476_v14 = vld [vmem:[%s8148_s3 + $0xf4] ss:$8 sps:$4 sm:$0xff]  }
  0x8f   : > { %1308 = vmatprep.subr.bf16.mxu0 %v5370_v15  ;;  %1703 = vmatprep.subr.bf16.mxu1 %v5476_v14  ;;  %v696_v15 = vlaneseq }
  0x90   : > { %1704 = vmatpush1.bf16.msra.mxu1 %v5474_v13 }
  0x92   : > { %1309 = vmatpush1.bf16.msra.mxu0 %v5368_v16  ;;  %v6686_v16 = vshrl.u32 %v696_v15, 7 }
  0x93   : > { %1321 = vmatprep.subr.bf16.mxu0 %v5376_v17 }
  0x94   : > { %v6689_v17 = vsub.s32 0, %v6686_v16 }
  0x95   : > { %1311 = vmatmul.mubr.bf16.vlgmr.msra.gmra.mrb[0].mxu0 %v5371_v18  ;;  %v694_v18 = vld [vmem:[%s8147_s2] sm:$0x3] }
  0x96   : > { %1322 = vmatpush1.bf16.msra.mxu0 %v5374_v19  ;;  %1353 = vmatprep.mubr.bf16.mxu0 %v5427_v20  ;;  %v6695_v19 = vsub.s32 1, %v6686_v16  ;;  %v699_v20 = vrot.slane %v694_v18, %v6689_v17 }
  0x97   : > { %1323 = vmatprep.subr.bf16.mxu0 %v5379_v21 }
  0x98   : > { %v703_v21 = vrot.slane %v694_v18, %v6695_v19 }
  0x9a   : > { %1324 = vmatpush1.bf16.msra.mxu0 %v5377_v22 }
  0x9b   : > { %1325 = vmatprep.subr.bf16.mxu0 %v5382_v23 }
  0x9e   : > { %1326 = vmatpush1.bf16.msra.mxu0 %v5380_v24 }
  0x9f   : > { %1327 = vmatprep.subr.bf16.mxu0 %v5385_v25 }
  0xa2   : > { %1328 = vmatpush1.bf16.msra.mxu0 %v5383_v26 }
  0xa3   : > { %1329 = vmatprep.subr.bf16.mxu0 %v5388_v27 }
  0xa6   : > { %1330 = vmatpush1.bf16.msra.mxu0 %v5386_v28 }
  0xa7   : > { %1331 = vmatprep.subr.bf16.mxu0 %v5391_v29 }
  0xaa   : > { %1332 = vmatpush1.bf16.msra.mxu0 %v5389_v30 }
  0xab   : > { %1333 = vmatprep.subr.bf16.mxu0 %v5394_v31 }
  0xae   : > { %1334 = vmatpush1.bf16.msra.mxu0 %v5392_v32 }
  0xaf   : > { %1335 = vmatprep.subr.bf16.mxu0 %v5397_v33 }
  0xb2   : > { %1336 = vmatpush1.bf16.msra.mxu0 %v5395_v34 }
  0xb3   : > { %1337 = vmatprep.subr.bf16.mxu0 %v5400_v35 }
  0xb6   : > { %1338 = vmatpush1.bf16.msra.mxu0 %v5398_v36 }
  0xb7   : > { %1339 = vmatprep.subr.bf16.mxu0 %v5403_v37 }
  0xba   : > { %1340 = vmatpush1.bf16.msra.mxu0 %v5401_v39 }
  0xbb   : > { %1341 = vmatprep.subr.bf16.mxu0 %v5406_v40 }
  0xbe   : > { %1342 = vmatpush1.bf16.msra.mxu0 %v5404_v41 }
  0xbf   : > { %1343 = vmatprep.subr.bf16.mxu0 %v5409_v42 }
  0xc2   : > { %1344 = vmatpush1.bf16.msra.mxu0 %v5407_v43 }
  0xc3   : > { %1345 = vmatprep.subr.bf16.mxu0 %v5412_v44 }
  0xc6   : > { %1346 = vmatpush1.bf16.msra.mxu0 %v5410_v45 }
  0xc7   : > { %1347 = vmatprep.subr.bf16.mxu0 %v5415_v46 }
  0xca   : > { %1348 = vmatpush1.bf16.msra.mxu0 %v5413_v47 }
  0xcb   : > { %1349 = vmatprep.subr.bf16.mxu0 %v5418_v48 }
  0xce   : > { %1350 = vmatpush1.bf16.msra.mxu0 %v5416_v49 }
  0xcf   : > { %1351 = vmatprep.subr.bf16.mxu0 %v5423_v50 }
  0xd2   : > { %1352 = vmatpush1.bf16.msra.mxu0 %v5421_v51 }
  0xd5   : > { %1354 = vmatmul.mubr.bf16.vlgmr.msra.gmra.mrb[0].mxu0 %v5425_v52 }
  0xfa   : > { %v1398_v56 = vpop.f32.mrb[0].mxu1 }
  0xfb   : > { %v1400_v58 = vpop.f32.mrb[1].mxu1 }
  0xfc   : > { %v1402_v59 = vpop.f32.mrb[2].mxu1 }
  0xfd   : > { %v1404_v60 = vpop.f32.mrb[3].mxu1 }
 0x1a8   : > { %v1355_v22 = vpop.f32.mrb[0].mxu0 }
 0x1a9   : > { %v5208_v23 = vadd.f32 %v1355_v22, %v699_v20  ;;  %v1357_v24 = vpop.f32.mrb[1].mxu0 }
 0x1aa   : > { %v5210_v25 = vadd.f32 %v1357_v24, %v703_v21  ;;  %v1359_v26 = vpop.f32.mrb[2].mxu0 }
 0x1ab   : > { %v6699_v27 = vadd.f32 %v5208_v23, %v1398_v56  ;;  %v5212_v28 = vadd.f32 %v1359_v26, %v699_v20  ;;  %v1361_v29 = vpop.f32.mrb[3].mxu0 }
 0x1ac   : > { %v6701_v30 = vadd.f32 %v5210_v25, %v1400_v58  ;;  %v5214_v31 = vadd.f32 %v1361_v29, %v703_v21 }
 0x1ad   : > { %v1411_v32 = vand.u32 2147483647, %v6699_v27  ;;  %v6704_v33 = vadd.f32 %v5212_v28, %v1402_v59  ;;  %v1407_v3 = vmax.f32 %v6699_v27, 0.0 }
 0x1ae   : > { %v1412_v34 = vand.u32 2147483647, %v6701_v30  ;;  %v6707_v35 = vadd.f32 %v5214_v31, %v1404_v60  ;;  %v1408_v18 = vmax.f32 %v6701_v30, 0.0  ;;  %v5477_v30 = vld [vmem:[%s8150_s5 + $0x40] sm:$0xff]  }
 0x1af   : > { %v1415_v36 = vsub.f32 0.0, %v1411_v32  ;;  %v1413_v37 = vand.u32 2147483647, %v6704_v33  ;;  %v1409_v20 = vmax.f32 %v6704_v33, 0.0  ;;  %v5478_v33 = vld [vmem:[%s8150_s5] sm:$0xff]   ;;  %5142 = vmatprep.subr.bf16.mxu1 %v5477_v30 }
 0x1b0   : > { %v1416_v39 = vsub.f32 0.0, %v1412_v34  ;;  %v1414_v40 = vand.u32 2147483647, %v6707_v35  ;;  %v1410_v27 = vmax.f32 %v6707_v35, 0.0  ;;  %v5479_v35 = vld [vmem:[%s8150_s5 + $0x48] sm:$0xff]  }
 0x1b1   : > { %v1419_v41 = vmul.f32 1.442695, %v1415_v36  ;;  %v1417_v42 = vsub.f32 0.0, %v1413_v37  ;;  %v5480_v36 = vld [vmem:[%s8150_s5 + $0x8] sm:$0xff]   ;;  %v5481_v37 = vld [vmem:[%s8150_s5 + $0x50] sm:$0xff]  }
 0x1b2   : > { %v1421_v43 = vmul.f32 1.442695, %v1416_v39  ;;  %v1418_v44 = vsub.f32 0.0, %v1414_v40  ;;  %v5482_v39 = vld [vmem:[%s8150_s5 + $0x10] sm:$0xff]   ;;  %v5483_v40 = vld [vmem:[%s8150_s5 + $0x58] sm:$0xff]  }
 0x1b3   : > { %5819 = vpow2.f32 %v1419_v41  ;;  %v1423_v45 = vmul.f32 1.442695, %v1417_v42  ;;  %v5484_v41 = vld [vmem:[%s8150_s5 + $0x18] sm:$0xff]   ;;  %v5485_v42 = vld [vmem:[%s8150_s5 + $0x60] sm:$0xff]  }
 0x1b4   : > { %5821 = vpow2.f32 %v1421_v43  ;;  %v1425_v46 = vmul.f32 1.442695, %v1418_v44  ;;  %v5486_v43 = vld [vmem:[%s8150_s5 + $0x20] sm:$0xff]   ;;  %v5487_v44 = vld [vmem:[%s8150_s5 + $0x68] sm:$0xff]  }
 0x1b5   : > { %5823 = vpow2.f32 %v1423_v45  ;;  %v5488_v45 = vld [vmem:[%s8150_s5 + $0x28] sm:$0xff]  }
 0x1b6   : > { %5825 = vpow2.f32 %v1425_v46  ;;  %v5489_v46 = vld [vmem:[%s8150_s5 + $0x70] sm:$0xff]  }
 0x1bd   : > { %v5820_v47 = vpop.eup %5819 }
 0x1be   : > { %v5822_v48 = vpop.eup %5821  ;;  %v1427_v49 = vadd.f32 1.0, %v5820_v47  ;;  %v1430_v55 = vmul.f32 -0.5, %v5820_v47  ;;  %v1433_v60 = vand.u32 2147483647, %v5820_v47 }
 0x1bf   : > { %v5824_v50 = vpop.eup %5823  ;;  %v1436_v51 = vadd.f32 1.0, %v5822_v48  ;;  %v1439_v57 = vmul.f32 -0.5, %v5822_v48  ;;  %v1442_v1 = vand.u32 2147483647, %v5822_v48 }
 0x1c0   : > { %v5826_v52 = vpop.eup %5825  ;;  %5827 = vlog2.f32 %v1427_v49  ;;  %v1445_v53 = vadd.f32 1.0, %v5824_v50  ;;  %v1448_v56 = vmul.f32 -0.5, %v5824_v50  ;;  %v1431_v58 = vadd.f32 1.0, %v1430_v55  ;;  %v5492_v49 = vld [vmem:[%s8150_s5 + $0x38] sm:$0xff]  }
 0x1c1   : > { %5829 = vlog2.f32 %v1436_v51  ;;  %v1454_v54 = vadd.f32 1.0, %v5826_v52  ;;  %v1457_v59 = vmul.f32 -0.5, %v5826_v52  ;;  %v1440_v62 = vadd.f32 1.0, %v1439_v57  ;;  %v1989_v51 = vld [vmem:[%s571_s20 + $0x8] sm:$0xff] }
 0x1c2   : > { %5831 = vlog2.f32 %v1445_v53  ;;  %v1449_v61 = vadd.f32 1.0, %v1448_v56  ;;  %v1451_v0 = vand.u32 2147483647, %v5824_v50  ;;  %v1432_v5 = vmul.f32 %v5820_v47, %v1431_v58  ;;  %v5490_v47 = vld [vmem:[%s8150_s5 + $0x30] sm:$0xff]  }
 0x1c3   : > { %5833 = vlog2.f32 %v1454_v54  ;;  %v1458_v6 = vadd.f32 1.0, %v1457_v59  ;;  %vm6712_vm1 = vcmp.lt.f32.partialorder %v1433_v60, 0.0004427343  ;;  %v1460_v10 = vand.u32 2147483647, %v5826_v52 }
 0x1c4   : > { %v1450_v13 = vmul.f32 %v5824_v50, %v1449_v61  ;;  %v1441_v14 = vmul.f32 %v5822_v48, %v1440_v62  ;;  %vm1452_vm2 = vcmp.lt.f32.partialorder %v1451_v0, 0.0004427343  ;;  %vm1443_vm3 = vcmp.lt.f32.partialorder %v1442_v1, 0.0004427343  ;;  %v5491_v48 = vld [vmem:[%s8150_s5 + $0x78] sm:$0xff]   ;;  %v1988_v50 = vld [vmem:[%s571_s20] sm:$0xff] }
 0x1c5   : > { %v1459_v24 = vmul.f32 %v5826_v52, %v1458_v6  ;;  %vm1461_vm4 = vcmp.lt.f32.partialorder %v1460_v10, 0.0004427343  ;;  %1992 = vrot.lane.b32.xlu0 %v1988_v50, %s6140_s27  ;;  %v1501_v52 = vld [vmem:[%s8149_s4] sm:$0x3]  ;;  %s5224_s20 = smul.u32 112, %s550_s17 }
 0x1c6   : > { %v1506_v53 = vrot.slane %v1501_v52, %v6689_v17  ;;  %v1510_v54 = vrot.slane %v1501_v52, %v6695_v19 }
 0x1c7   : > { %s7774_s29 = scalar_lea.vmem [#allocation2], %s5224_s20 }
 0x1c8   : > { %s4612_s28 = sshll.u32 %s7774_s29, 4  ;;  %s8098_s28 = int_to_ptr.vmem [resolvable:$true] %s4612_s28 }
 0x1c9   : > { %1994 = vrot.lane.b32.xlu0 %v1989_v51, %s6140_s27 }
 0x1ca   : > { %v5828_v63 = vpop.eup %5827 }
 0x1cb   : > { %v5830_v2 = vpop.eup %5829  ;;  %v1429_v4 = vmul.f32 0.6931472, %v5828_v63 }
 0x1cc   : > { %v5832_v7 = vpop.eup %5831  ;;  %v1438_v9 = vmul.f32 0.6931472, %v5830_v2 }
 0x1cd   : > { %v1435_v11 = vsel %vm6712_vm1, %v1432_v5, %v1429_v4  ;;  %v1447_v12 = vmul.f32 0.6931472, %v5832_v7  ;;  %v5834_v15 = vpop.eup %5833 }
 0x1ce   : > { %v1444_v22 = vsel %vm1443_vm3, %v1441_v14, %v1438_v9  ;;  %v1456_v23 = vmul.f32 0.6931472, %v5834_v15  ;;  %v1463_v25 = vadd.f32 %v1435_v11, %v1407_v3 }
 0x1cf   : > { %v1453_v21 = vsel %vm1452_vm2, %v1450_v13, %v1447_v12  ;;  %v1464_v29 = vadd.f32 %v1444_v22, %v1408_v18 }
 0x1d0   : > { %v1465_v26 = vadd.f32 %v1453_v21, %v1409_v20  ;;  %v1462_v28 = vsel %vm1461_vm4, %v1459_v24, %v1456_v23 }
 0x1d1   : > { %v1466_v31 = vadd.f32 %v1462_v28, %v1410_v27 }
 0x1d2   : > { %v1467_v32 = vpack.c.bf16 %v1465_v26, %v1463_v25 }
 0x1d3   : > { %v1468_v34 = vpack.c.bf16 %v1466_v31, %v1464_v29 }
 0x1d5   : > { %1705 = vmatprep.mubr.bf16.mxu1 %v1468_v34 }
 0x1d6   : > { %1706 = vmatmul.mubr.bf16.vlgmr.msra.gmra.mrb[4].mxu1 %v1467_v32 }
 0x1d7   : > { %5143 = vmatpush3.bf16.msra.mxu1 %v5478_v33 }
 0x1d8   : > { %5144 = vmatprep.subr.bf16.mxu1 %v5479_v35 }
 0x1db   : > { %5145 = vmatpush3.bf16.msra.mxu1 %v5480_v36 }
 0x1dc   : > { %5146 = vmatprep.subr.bf16.mxu1 %v5481_v37 }
 0x1df   : > { %5147 = vmatpush3.bf16.msra.mxu1 %v5482_v39 }
 0x1e0   : > { %5148 = vmatprep.subr.bf16.mxu1 %v5483_v40 }
 0x1e3   : > { %5149 = vmatpush3.bf16.msra.mxu1 %v5484_v41 }
 0x1e4   : > { %5150 = vmatprep.subr.bf16.mxu1 %v5485_v42 }
 0x1e7   : > { %5151 = vmatpush3.bf16.msra.mxu1 %v5486_v43 }
 0x1e8   : > { %5152 = vmatprep.subr.bf16.mxu1 %v5487_v44 }
 0x1eb   : > { %5153 = vmatpush3.bf16.msra.mxu1 %v5488_v45 }
 0x1ec   : > { %5154 = vmatprep.subr.bf16.mxu1 %v5489_v46 }
 0x1ef   : > { %5155 = vmatpush3.bf16.msra.mxu1 %v5490_v47 }
 0x1f0   : > { %5156 = vmatprep.subr.bf16.mxu1 %v5491_v48 }
 0x1f3   : > { %5157 = vmatpush3.bf16.msra.mxu1 %v5492_v49 }
 0x2a9   : > { %v1707_v55 = vpop.f32.mrb[4].mxu1 }
 0x2aa   : > { %v6782_v56 = vadd.f32 %v1707_v55, %v1506_v53  ;;  %v1709_v57 = vpop.f32.mrb[5].mxu1 }
 0x2ab   : > { %v6784_v58 = vadd.f32 %v1709_v57, %v1510_v54  ;;  %v1711_v59 = vpop.f32.mrb[6].mxu1 }
 0x2ac   : > { %v1720_v60 = vand.u32 2147483647, %v6782_v56  ;;  %v6787_v61 = vadd.f32 %v1711_v59, %v1506_v53  ;;  %v1713_v62 = vpop.f32.mrb[7].mxu1  ;;  %v1716_v33 = vmax.f32 %v6782_v56, 0.0 }
 0x2ad   : > { %v1721_v63 = vand.u32 2147483647, %v6784_v58  ;;  %v6790_v0 = vadd.f32 %v1713_v62, %v1510_v54  ;;  %v1717_v48 = vmax.f32 %v6784_v58, 0.0  ;;  %v5493_v58 = vld [vmem:[%s8152_s7] ss:$8 sps:$4 sm:$0xff]  }
 0x2ae   : > { %v1724_v1 = vsub.f32 0.0, %v1720_v60  ;;  %v1722_v2 = vand.u32 2147483647, %v6787_v61  ;;  %v1718_v49 = vmax.f32 %v6787_v61, 0.0  ;;  %v5495_v61 = vld [vmem:[%s8152_s7 + $0x4] ss:$8 sps:$4 sm:$0xff]  }
 0x2af   : > { %v1725_v3 = vsub.f32 0.0, %v1721_v63  ;;  %v1723_v4 = vand.u32 2147483647, %v6790_v0  ;;  %v1719_v56 = vmax.f32 %v6790_v0, 0.0  ;;  %2051 = vmatprep.subr.bf16.mxu1 %v5495_v61 }
 0x2b0   : > { %v1728_v5 = vmul.f32 1.442695, %v1724_v1  ;;  %v1726_v6 = vsub.f32 0.0, %v1722_v2  ;;  %v4877_v1 = vld [vmem:[%s8151_s6] ss:$0 sm:$0xff] }
 0x2b1   : > { %v1730_v7 = vmul.f32 1.442695, %v1725_v3  ;;  %v1727_v8 = vsub.f32 0.0, %v1723_v4 }
 0x2b2   : > { %5835 = vpow2.f32 %v1728_v5  ;;  %v1732_v9 = vmul.f32 1.442695, %v1726_v6 }
 0x2b3   : > { %5837 = vpow2.f32 %v1730_v7  ;;  %v1734_v10 = vmul.f32 1.442695, %v1727_v8 }
 0x2b4   : > { %5839 = vpow2.f32 %v1732_v9 }
 0x2b5   : > { %5841 = vpow2.f32 %v1734_v10 }
 0x2bc   : > { %v5836_v11 = vpop.eup %5835 }
 0x2bd   : > { %v5838_v12 = vpop.eup %5837  ;;  %v1736_v13 = vadd.f32 1.0, %v5836_v11  ;;  %v1739_v22 = vmul.f32 -0.5, %v5836_v11  ;;  %v1742_v27 = vand.u32 2147483647, %v5836_v11 }
 0x2be   : > { %v5840_v14 = vpop.eup %5839  ;;  %v1745_v15 = vadd.f32 1.0, %v5838_v12  ;;  %v1748_v23 = vmul.f32 -0.5, %v5838_v12  ;;  %v1751_v32 = vand.u32 2147483647, %v5838_v12 }
 0x2bf   : > { %v5842_v18 = vpop.eup %5841  ;;  %5843 = vlog2.f32 %v1736_v13  ;;  %v1754_v20 = vadd.f32 1.0, %v5840_v14  ;;  %v1757_v24 = vmul.f32 -0.5, %v5840_v14  ;;  %v1740_v25 = vadd.f32 1.0, %v1739_v22 }
 0x2c0   : > { %5845 = vlog2.f32 %v1745_v15  ;;  %v1763_v21 = vadd.f32 1.0, %v5842_v18  ;;  %v1766_v26 = vmul.f32 -0.5, %v5842_v18  ;;  %v1749_v28 = vadd.f32 1.0, %v1748_v23  ;;  %v5496_v23 = vld [vmem:[%s8152_s7 + $0x10] ss:$8 sps:$4 sm:$0xff]  }
 0x2c1   : > { %5847 = vlog2.f32 %v1754_v20  ;;  %v1758_v29 = vadd.f32 1.0, %v1757_v24  ;;  %v1760_v34 = vand.u32 2147483647, %v5840_v14  ;;  %v1741_v36 = vmul.f32 %v5836_v11, %v1740_v25  ;;  %v5498_v24 = vld [vmem:[%s8152_s7 + $0x14] ss:$8 sps:$4 sm:$0xff]  }
 0x2c2   : > { %5849 = vlog2.f32 %v1763_v21  ;;  %v1767_v37 = vadd.f32 1.0, %v1766_v26  ;;  %vm6795_vm5 = vcmp.lt.f32.partialorder %v1742_v27, 0.0004427343  ;;  %v1769_v42 = vand.u32 2147483647, %v5842_v18 }
 0x2c3   : > { %v1750_v44 = vmul.f32 %v5838_v12, %v1749_v28  ;;  %v1759_v46 = vmul.f32 %v5840_v14, %v1758_v29  ;;  %vm1752_vm6 = vcmp.lt.f32.partialorder %v1751_v32, 0.0004427343  ;;  %vm1761_vm7 = vcmp.lt.f32.partialorder %v1760_v34, 0.0004427343 }
 0x2c4   : > { %v1768_v53 = vmul.f32 %v5842_v18, %v1767_v37  ;;  %vm1770_vm8 = vcmp.lt.f32.partialorder %v1769_v42, 0.0004427343 }
 0x2c9   : > { %v5844_v31 = vpop.eup %5843 }
 0x2ca   : > { %v5846_v30 = vpop.eup %5845  ;;  %v1738_v35 = vmul.f32 0.6931472, %v5844_v31  ;;  %v1993_v31 = vpop.permute.xlu0 %1992 }
 0x2cb   : > { %v5848_v39 = vpop.eup %5847  ;;  %v1747_v41 = vmul.f32 0.6931472, %v5846_v30 }
 0x2cc   : > { %v1744_v43 = vsel %vm6795_vm5, %v1741_v36, %v1738_v35  ;;  %v1756_v45 = vmul.f32 0.6931472, %v5848_v39  ;;  %v5850_v47 = vpop.eup %5849 }
 0x2cd   : > { %v1753_v50 = vsel %vm1752_vm6, %v1750_v44, %v1747_v41  ;;  %v1765_v52 = vmul.f32 0.6931472, %v5850_v47  ;;  %v1772_v54 = vadd.f32 %v1744_v43, %v1716_v33  ;;  %v5502_v47 = vld [vmem:[%s8154_s9 + $0x10] ss:$28 sps:$4 sm:$0xff]  }
 0x2ce   : > { %v1762_v51 = vsel %vm1761_vm7, %v1759_v46, %v1756_v45  ;;  %v1773_v59 = vadd.f32 %v1753_v50, %v1717_v48  ;;  %v1995_v44 = vpop.permute.xlu0 %1994  ;;  %v5501_v46 = vld [vmem:[%s8154_s9 + $0x4] ss:$28 sps:$4 sm:$0xff]   ;;  %v5504_v48 = vld [vmem:[%s8154_s9 + $0x14] ss:$28 sps:$4 sm:$0xff]  }
 0x2cf   : > { %v1774_v55 = vadd.f32 %v1762_v51, %v1718_v49  ;;  %v1771_v57 = vsel %vm1770_vm8, %v1768_v53, %v1765_v52  ;;  %v5510_v49 = vld [vmem:[%s8154_s9 + $0x4c] ss:$28 sps:$4 sm:$0xff]   ;;  %2983 = vmatprep.subr.bf16.mxu0 %v5504_v48  ;;  %v5516_v51 = vld [vmem:[%s8154_s9 + $0x84] ss:$28 sps:$4 sm:$0xff]  }
 0x2d0   : > { %v1775_v62 = vadd.f32 %v1771_v57, %v1719_v56  ;;  %2984 = vmatpush1.bf16.msra.mxu0 %v5502_v47  ;;  %v5508_v50 = vld [vmem:[%s8154_s9 + $0x48] ss:$28 sps:$4 sm:$0xff]   ;;  %v5522_v57 = vld [vmem:[%s8154_s9 + $0xbc] ss:$28 sps:$4 sm:$0xff]  }
 0x2d1   : > { %v1776_v60 = vpack.c.bf16 %v1774_v55, %v1772_v54  ;;  %2985 = vmatprep.subr.bf16.mxu0 %v5510_v49  ;;  %v5514_v55 = vld [vmem:[%s8154_s9 + $0x80] ss:$28 sps:$4 sm:$0xff]   ;;  %v5567_v48 = vld [vmem:[%s8154_s9 + $0x26c] ss:$28 sps:$4 sm:$0xff]  }
 0x2d2   : > { %v1777_v63 = vpack.c.bf16 %v1775_v62, %v1773_v59  ;;  %v5520_v59 = vld [vmem:[%s8154_s9 + $0xb8] ss:$28 sps:$4 sm:$0xff]   ;;  %v5526_v62 = vld [vmem:[%s8154_s9 + $0xf0] ss:$28 sps:$4 sm:$0xff]   ;;  %v5562_v47 = vld [vmem:[%s8154_s9 + $0x240] ss:$28 sps:$4 sm:$0xff]  }
 0x2d3   : > { %v5570_v49 = vld [vmem:[%s8154_s9 + $0x27c] ss:$28 sps:$4 sm:$0xff]  }
 0x2d4   : > { %1945 = vmatprep.mubr.bf16.mxu1 %v1777_v63  ;;  %2986 = vmatpush1.bf16.msra.mxu0 %v5508_v50  ;;  %v5534_v63 = vld [vmem:[%s8154_s9 + $0x12c] ss:$28 sps:$4 sm:$0xff]  }
 0x2d5   : > { %1946 = vmatmul.mubr.bf16.vlgmr.msra.gmra.mrb[8].mxu1 %v1776_v60  ;;  %2987 = vmatprep.subr.bf16.mxu0 %v5516_v51  ;;  %v5528_v60 = vld [vmem:[%s8154_s9 + $0xf4] ss:$28 sps:$4 sm:$0xff]   ;;  %v5565_v50 = vld [vmem:[%s8154_s9 + $0x268] ss:$28 sps:$4 sm:$0xff]  }
 0x2d6   : > { %2083 = vmatprep.mubr.bf16.mxu1 %v6139_v38  ;;  %2052 = vmatpush1.bf16.msra.mxu1 %v5493_v58  ;;  %v5532_v58 = vld [vmem:[%s8154_s9 + $0x128] ss:$28 sps:$4 sm:$0xff]   ;;  %v5568_v51 = vld [vmem:[%s8154_s9 + $0x278] ss:$28 sps:$4 sm:$0xff]  }
 0x2d7   : > { %2053 = vmatprep.subr.bf16.mxu1 %v5498_v24  ;;  %v5523_v24 = vld [vmem:[%s8154_s9 + $0xe0] ss:$28 sps:$4 sm:$0xff]  }
 0x2d8   : > { %2988 = vmatpush1.bf16.msra.mxu0 %v5514_v55  ;;  %v5574_v55 = vld [vmem:[%s8154_s9 + $0x2b0] ss:$28 sps:$4 sm:$0xff]  }
 0x2d9   : > { %2989 = vmatprep.subr.bf16.mxu0 %v5522_v57  ;;  %v5582_v57 = vld [vmem:[%s8154_s9 + $0x2ec] ss:$28 sps:$4 sm:$0xff]  }
 0x2da   : > { %2054 = vmatpush1.bf16.msra.mxu1 %v5496_v23  ;;  %v5525_v23 = vld [vmem:[%s8154_s9 + $0xe4] ss:$28 sps:$4 sm:$0xff]  }
 0x2db   : > { %2897 = vmatprep.subr.bf16.mxu1 %v5501_v46  ;;  %v5559_v46 = vld [vmem:[%s8154_s9 + $0x230] ss:$28 sps:$4 sm:$0xff]  }
 0x2dc   : > { %2990 = vmatpush1.bf16.msra.mxu0 %v5520_v59  ;;  %v5577_v59 = vld [vmem:[%s8154_s9 + $0x2d8] ss:$28 sps:$4 sm:$0xff]  }
 0x2dd   : > { %2991 = vmatprep.subr.bf16.mxu0 %v5528_v60  ;;  %v5580_v60 = vld [vmem:[%s8154_s9 + $0x2e8] ss:$28 sps:$4 sm:$0xff]  }
 0x2e0   : > { %2992 = vmatpush1.bf16.msra.mxu0 %v5526_v62  ;;  %v5585_v62 = vld [vmem:[%s8154_s9 + $0x314] ss:$28 sps:$4 sm:$0xff]  }
 0x2e1   : > { %2993 = vmatprep.subr.bf16.mxu0 %v5534_v63  ;;  %v5588_v63 = vld [vmem:[%s8154_s9 + $0x324] ss:$28 sps:$4 sm:$0xff]  }
 0x2e4   : > { %2994 = vmatpush1.bf16.msra.mxu0 %v5532_v58  ;;  %v5583_v58 = vld [vmem:[%s8154_s9 + $0x310] ss:$28 sps:$4 sm:$0xff]  }
 0x3a8   : > { %v5158_v0 = vpop.f32.mrb[8].mxu1 }
 0x3a9   : > { %v5159_v2 = vpop.f32.mrb[9].mxu1 }
 0x3aa   : > { %v5160_v3 = vadd.f32 %v5159_v2, %v5158_v0  ;;  %v5161_v4 = vpop.f32.mrb[10].mxu1 }
 0x3ab   : > { %v5162_v5 = vpop.f32.mrb[11].mxu1 }
 0x3ac   : > { %v6814_v38 = vadd.f32 %v5160_v3, %v4877_v1  ;;  %v5163_v6 = vadd.f32 %v5162_v5, %v5161_v4  ;;  %v5499_v3 = vld [vmem:[%s8154_s9] ss:$28 sps:$4 sm:$0xff]  }
 0x3ae   : > { %v1956_v7 = vand.u32 2147483647, %v6814_v38  ;;  %v6817_v8 = vadd.f32 %v5163_v6, %v4877_v1  ;;  %4568 = vrot.lane.b32.xlu0 %v6814_v38, %s6140_s27  ;;  %v1954_v33 = vmax.f32 %v6814_v38, 0.0  ;;  %v5507_v6 = vld [vmem:[%s8154_s9 + $0x3c] ss:$28 sps:$4 sm:$0xff]  }
 0x3b0   : > { %v1958_v9 = vsub.f32 0.0, %v1956_v7  ;;  %v1957_v10 = vand.u32 2147483647, %v6817_v8  ;;  %v1955_v40 = vmax.f32 %v6817_v8, 0.0 }
 0x3b2   : > { %v1960_v11 = vmul.f32 1.442695, %v1958_v9  ;;  %v1959_v12 = vsub.f32 0.0, %v1957_v10  ;;  %v5513_v10 = vld [vmem:[%s8154_s9 + $0x74] ss:$28 sps:$4 sm:$0xff]  }
 0x3b4   : > { %5851 = vpow2.f32 %v1960_v11  ;;  %v1962_v13 = vmul.f32 1.442695, %v1959_v12 }
 0x3b6   : > { %5853 = vpow2.f32 %v1962_v13 }
 0x3be   : > { %v5852_v14 = vpop.eup %5851 }
 0x3bf   : > { %v1964_v15 = vadd.f32 1.0, %v5852_v14  ;;  %v1967_v21 = vmul.f32 -0.5, %v5852_v14  ;;  %v1970_v26 = vand.u32 2147483647, %v5852_v14 }
 0x3c0   : > { %v5854_v18 = vpop.eup %5853 }
 0x3c1   : > { %5855 = vlog2.f32 %v1964_v15  ;;  %v1973_v20 = vadd.f32 1.0, %v5854_v18  ;;  %v1976_v22 = vmul.f32 -0.5, %v5854_v18  ;;  %v1968_v25 = vadd.f32 1.0, %v1967_v21  ;;  %v5519_v21 = vld [vmem:[%s8154_s9 + $0xac] ss:$28 sps:$4 sm:$0xff]  }
 0x3c2   : > { %v1979_v29 = vand.u32 2147483647, %v5854_v18  ;;  %vm1971_vm9 = vcmp.lt.f32.partialorder %v1970_v26, 0.0004427343  ;;  %v5529_v26 = vld [vmem:[%s8154_s9 + $0x118] ss:$28 sps:$4 sm:$0xff]  }
 0x3c3   : > { %5857 = vlog2.f32 %v1973_v20  ;;  %v1977_v27 = vadd.f32 1.0, %v1976_v22  ;;  %v1969_v34 = vmul.f32 %v5852_v14, %v1968_v25  ;;  %v5517_v22 = vld [vmem:[%s8154_s9 + $0xa8] ss:$28 sps:$4 sm:$0xff]   ;;  %v5531_v25 = vld [vmem:[%s8154_s9 + $0x11c] ss:$28 sps:$4 sm:$0xff]  }
 0x3c4   : > { %vm1980_vm10 = vcmp.lt.f32.partialorder %v1979_v29, 0.0004427343  ;;  %v5535_v29 = vld [vmem:[%s8154_s9 + $0x150] ss:$28 sps:$4 sm:$0xff]  }
 0x3c5   : > { %v1978_v37 = vmul.f32 %v5854_v18, %v1977_v27  ;;  %v5511_v18 = vld [vmem:[%s8154_s9 + $0x70] ss:$28 sps:$4 sm:$0xff]  }
 0x3c6   : > { %v5537_v27 = vld [vmem:[%s8154_s9 + $0x154] ss:$28 sps:$4 sm:$0xff]  }
 0x3cb   : > { %v5856_v28 = vpop.eup %5855 }
 0x3cc   : > { %v1966_v32 = vmul.f32 0.6931472, %v5856_v28  ;;  %v5540_v28 = vld [vmem:[%s8154_s9 + $0x164] ss:$28 sps:$4 sm:$0xff]  }
 0x3cd   : > { %v5858_v30 = vpop.eup %5857  ;;  %2995 = vmatprep.subr.bf16.mxu0 %v5540_v28 }
 0x3ce   : > { %v1972_v35 = vsel %vm1971_vm9, %v1969_v34, %v1966_v32  ;;  %v1975_v36 = vmul.f32 0.6931472, %v5858_v30  ;;  %v5543_v32 = vld [vmem:[%s8154_s9 + $0x18c] ss:$28 sps:$4 sm:$0xff]   ;;  %v5546_v34 = vld [vmem:[%s8154_s9 + $0x19c] ss:$28 sps:$4 sm:$0xff]  }
 0x3cf   : > { %v1982_v39 = vadd.f32 %v1972_v35, %v1954_v33  ;;  %v5541_v30 = vld [vmem:[%s8154_s9 + $0x188] ss:$28 sps:$4 sm:$0xff]   ;;  %v5544_v33 = vld [vmem:[%s8154_s9 + $0x198] ss:$28 sps:$4 sm:$0xff]  }
 0x3d0   : > { %v1981_v41 = vsel %vm1980_vm10, %v1978_v37, %v1975_v36  ;;  %v5549_v35 = vld [vmem:[%s8154_s9 + $0x1c4] ss:$28 sps:$4 sm:$0xff]   ;;  %v5552_v36 = vld [vmem:[%s8154_s9 + $0x1d4] ss:$28 sps:$4 sm:$0xff]  }
 0x3d1   : > { %5859 = vlog2.f32 %v1982_v39  ;;  %v1998_v42 = vmul.f32 %v1993_v31, %v1982_v39  ;;  %v1983_v43 = vadd.f32 %v1981_v41, %v1955_v40  ;;  %v5538_v31 = vld [vmem:[%s8154_s9 + $0x160] ss:$28 sps:$4 sm:$0xff]   ;;  %v5550_v39 = vld [vmem:[%s8154_s9 + $0x1d0] ss:$28 sps:$4 sm:$0xff]  }
 0x3d2   : > { %2996 = vmatpush1.bf16.msra.mxu0 %v5538_v31  ;;  %v5547_v37 = vld [vmem:[%s8154_s9 + $0x1c0] ss:$28 sps:$4 sm:$0xff]   ;;  %v5558_v41 = vld [vmem:[%s8154_s9 + $0x20c] ss:$28 sps:$4 sm:$0xff]  }
 0x3d3   : > { %5861 = vlog2.f32 %v1983_v43  ;;  %2002 = vrot.lane.b32.xlu1 %v1998_v42, %s6141_s26  ;;  %v1999_v45 = vmul.f32 %v1995_v44, %v1983_v43  ;;  %2997 = vmatprep.subr.bf16.mxu0 %v5546_v34  ;;  %v5555_v40 = vld [vmem:[%s8154_s9 + $0x1fc] ss:$28 sps:$4 sm:$0xff]   ;;  %v5556_v43 = vld [vmem:[%s8154_s9 + $0x208] ss:$28 sps:$4 sm:$0xff]   ;;  %v5561_v44 = vld [vmem:[%s8154_s9 + $0x234] ss:$28 sps:$4 sm:$0xff]  }
 0x3d4   : > { %v5553_v42 = vld [vmem:[%s8154_s9 + $0x1f8] ss:$28 sps:$4 sm:$0xff]  }
 0x3d6   : > { %2998 = vmatpush1.bf16.msra.mxu0 %v5544_v33 }
 0x3d7   : > { %2004 = vrot.lane.b32.xlu1 %v1999_v45, %s6141_s26  ;;  %s585_s26 = scalar_lea.vmem %s8161_s16, %s8185_s19  ;;  %2999 = vmatprep.subr.bf16.mxu0 %v5552_v36  ;;  %v5564_v45 = vld [vmem:[%s8154_s9 + $0x244] ss:$28 sps:$4 sm:$0xff]   ;;  %s5227_s19 = smul.u32 1792, %s6251_s25 }
 0x3d8   : > { %s6075_s25 = scalar_lea.vmem %s8098_s28, 1792 }
 0x3d9   : > { %s8094_s15 = scalar_lea.hbm %s8220_s30, %s5227_s19  ;;  %p6076_p11 = scmp.ne.s32.totalorder %s8098_s28, %s6075_s25 }
 0x3da   : > { %3000 = vmatpush1.bf16.msra.mxu0 %v5550_v39 }
 0x3db   : > { %v5860_v52 = vpop.eup %5859  ;;  %4570 = vrot.lane.b32.xlu1 %v6817_v8, %s6140_s27  ;;  %3001 = vmatprep.subr.bf16.mxu0 %v5558_v41  ;;  %p6077_p12 = pnand %p6076_p11, %p6268_p5 }
 0x3dc   : > { %v1985_v53 = vmul.f32 0.6931472, %v5860_v52  ;;  %v5573_v52 = vld [vmem:[%s8154_s9 + $0x2a4] ss:$28 sps:$4 sm:$0xff]  }
 0x3dd   : > { %v5862_v54 = vpop.eup %5861  ;;  %p6078_p13 = pneg %p6077_p12 }
 0x3de   : > { %4576 = vrot.lane.b32.xlu0 %v1985_v53, %s6140_s27  ;;  %v1987_v56 = vmul.f32 0.6931472, %v5862_v54  ;;  %3002 = vmatpush1.bf16.msra.mxu0 %v5556_v43  ;;  %v5576_v53 = vld [vmem:[%s8154_s9 + $0x2b4] ss:$28 sps:$4 sm:$0xff]   ;;  %v5571_v54 = vld [vmem:[%s8154_s9 + $0x2a0] ss:$28 sps:$4 sm:$0xff]  }
 0x3df   : > { %3003 = vmatprep.subr.bf16.mxu0 %v5564_v45 }
 0x3e0   : > { %4578 = vrot.lane.b32.xlu1 %v1987_v56, %s6140_s27  ;;  %v5579_v56 = vld [vmem:[%s8154_s9 + $0x2dc] ss:$28 sps:$4 sm:$0xff]  }
 0x3e2   : > { %3004 = vmatpush1.bf16.msra.mxu0 %v5562_v47 }
 0x3e3   : > { %3005 = vmatprep.subr.bf16.mxu0 %v5570_v49 }
 0x3e6   : > { %3006 = vmatpush1.bf16.msra.mxu0 %v5568_v51 }
 0x3e7   : > { %3007 = vmatprep.subr.bf16.mxu0 %v5576_v53 }
 0x3ea   : > { %3008 = vmatpush1.bf16.msra.mxu0 %v5574_v55 }
 0x3eb   : > { %3009 = vmatprep.subr.bf16.mxu0 %v5582_v57  ;;  %v5660_v57 = vld [vmem:[%s8156_s11 + $0x234] ss:$28 sps:$4 sm:$0xff]  }
 0x3ee   : > { %3010 = vmatpush1.bf16.msra.mxu0 %v5580_v60 }
 0x3ef   : > { %3011 = vmatprep.subr.bf16.mxu0 %v5588_v63 }
 0x420   : > { %v4569_v4 = vpop.permute.xlu0 %4568 }
 0x445   : > { %v2003_v61 = vpop.permute.xlu1 %2002 }
 0x446   : > { %v2008_v1 = vadd.f32 %v2003_v61, %v6814_v38  ;;  %v5505_v38 = vld [vmem:[%s8154_s9 + $0x38] ss:$28 sps:$4 sm:$0xff]   ;;  %v5586_v61 = vld [vmem:[%s8154_s9 + $0x320] ss:$28 sps:$4 sm:$0xff]  }
 0x447   : > { %3012 = vmatpush1.bf16.msra.mxu0 %v5586_v61 }
 0x449   : > { %v2005_v0 = vpop.permute.xlu1 %2004 }
 0x44a   : > { %v2009_v2 = vadd.f32 %v2005_v0, %v6817_v8  ;;  %v4582_v8 = vsel %vm2047_vm11, %v2008_v1, %v4569_v4  ;;  %v5591_v0 = vld [vmem:[%s8154_s9 + $0x34c] ss:$28 sps:$4 sm:$0xff]  }
 0x44b   : > { %v5597_v4 = vld [vmem:[%s8154_s9 + $0xc] ss:$28 sps:$4 sm:$0xff]  }
 0x44c   : > { %v2010_v5 = vpack.c.bf16 %v2009_v2, %v2008_v1  ;;  %v5594_v1 = vld [vmem:[%s8154_s9 + $0x35c] ss:$28 sps:$4 sm:$0xff]  }
 0x44d   : > { %v4571_v7 = vpop.permute.xlu1 %4570  ;;  %3013 = vmatprep.subr.bf16.mxu0 %v5594_v1 }
 0x44e   : > { %4898 = vmatmul.mubr.msk.bf16.vlgmr.msra.gmra.mrb[12].mxu1 %vm2047_vm11, %v2010_v5  ;;  %v4583_v12 = vsel %vm2047_vm11, %v2009_v2, %v4571_v7  ;;  %v5589_v2 = vld [vmem:[%s8154_s9 + $0x348] ss:$28 sps:$4 sm:$0xff]  }
 0x44f   : > { %2898 = vmatpush1.bf16.msra.mxu1 %v5499_v3  ;;  %v5592_v3 = vld [vmem:[%s8154_s9 + $0x358] ss:$28 sps:$4 sm:$0xff]   ;;  %v5600_v5 = vld [vmem:[%s8156_s11 + $0x4] ss:$28 sps:$4 sm:$0xff]  }
 0x450   : > { %v4577_v9 = vpop.permute.xlu0 %4576  ;;  %2899 = vmatprep.subr.bf16.mxu1 %v5507_v6  ;;  %3014 = vmatpush1.bf16.msra.mxu0 %v5592_v3  ;;  %v2015_v6 = vld [vmem:[%s8153_s8] sm:$0x3] }
 0x451   : > { %v4585_v11 = vsel %vm4584_vm12, %v4582_v8, %v4577_v9  ;;  %4018 = vmatprep.subr.bf16.mxu0 %v5600_v5  ;;  %v2020_v7 = vrot.slane %v2015_v6, %v6689_v17 }
 0x452   : > { %v4588_v13 = vsel %vm4587_vm13, %v4585_v11, 0.0  ;;  %v4579_v14 = vpop.permute.xlu1 %4578 }
 0x453   : > { %4590 = vst [vmem:[%s585_s26] sm:$0xff] %v4588_v13  ;;  %v4586_v15 = vsel %vm4584_vm12, %v4583_v12, %v4579_v14  ;;  %2900 = vmatpush1.bf16.msra.mxu1 %v5505_v38  ;;  %v2024_v38 = vrot.slane %v2015_v6, %v6695_v19 }
 0x454   : > { %v4589_v20 = vsel %vm4587_vm13, %v4586_v15, 0.0  ;;  %2901 = vmatprep.subr.bf16.mxu1 %v5513_v10 }
 0x455   : > { %4591 = vst [vmem:[%s585_s26 + $0x8] sm:$0xff] %v4589_v20  ;;  %s5226_s26 = smul.u32 56, %s8230_s18  ;;  %s6142_s18 = smov [#allocation2]  }
 0x456   : > { %s6079_s21 = sshll.u32 %s6142_s18, 4  ;;  %s6080_s21 = int_to_ptr.vmem [resolvable:$false] %s6079_s21 }
 0x457   : > { %2902 = vmatpush1.bf16.msra.mxu1 %v5511_v18  ;;  %s7667_s24 = scalar_lea.vmem %s8159_s14, %s5226_s26  ;;  %s8104_s26 = scalar_lea.sflag [#allocation3], %s550_s17 }
 0x458   : > { %2903 = vmatprep.subr.bf16.mxu1 %v5519_v21  ;;  %p6082_p0 = scmp.lt.s32.totalorder %s8098_s28, %s6080_s21 }
 0x45b   : > { %2904 = vmatpush1.bf16.msra.mxu1 %v5517_v22 }
 0x45c   : > { %2905 = vmatprep.subr.bf16.mxu1 %v5525_v23 }
 0x45f   : > { %2906 = vmatpush1.bf16.msra.mxu1 %v5523_v24 }
 0x460   : > { %2907 = vmatprep.subr.bf16.mxu1 %v5531_v25 }
 0x463   : > { %2908 = vmatpush1.bf16.msra.mxu1 %v5529_v26 }
 0x464   : > { %2909 = vmatprep.subr.bf16.mxu1 %v5537_v27 }
 0x467   : > { %2910 = vmatpush1.bf16.msra.mxu1 %v5535_v29 }
 0x468   : > { %2911 = vmatprep.subr.bf16.mxu1 %v5543_v32 }
 0x46b   : > { %2912 = vmatpush1.bf16.msra.mxu1 %v5541_v30 }
 0x46c   : > { %2913 = vmatprep.subr.bf16.mxu1 %v5549_v35 }
 0x46f   : > { %2914 = vmatpush1.bf16.msra.mxu1 %v5547_v37 }
 0x470   : > { %2915 = vmatprep.subr.bf16.mxu1 %v5555_v40 }
 0x473   : > { %2916 = vmatpush1.bf16.msra.mxu1 %v5553_v42 }
 0x474   : > { %2917 = vmatprep.subr.bf16.mxu1 %v5561_v44 }
 0x477   : > { %2918 = vmatpush1.bf16.msra.mxu1 %v5559_v46 }
 0x478   : > { %2919 = vmatprep.subr.bf16.mxu1 %v5567_v48 }
 0x47b   : > { %2920 = vmatpush1.bf16.msra.mxu1 %v5565_v50 }
 0x47c   : > { %2921 = vmatprep.subr.bf16.mxu1 %v5573_v52 }
 0x47f   : > { %2922 = vmatpush1.bf16.msra.mxu1 %v5571_v54 }
 0x480   : > { %2923 = vmatprep.subr.bf16.mxu1 %v5579_v56 }
 0x483   : > { %2924 = vmatpush1.bf16.msra.mxu1 %v5577_v59 }
 0x484   : > { %2925 = vmatprep.subr.bf16.mxu1 %v5585_v62 }
 0x487   : > { %2926 = vmatpush1.bf16.msra.mxu1 %v5583_v58 }
 0x488   : > { %2927 = vmatprep.subr.bf16.mxu1 %v5591_v0 }
 0x48b   : > { %2928 = vmatpush1.bf16.msra.mxu1 %v5589_v2 }
 0x48c   : > { %2940 = vmatprep.subr.bf16.mxu1 %v5597_v4 }
 0x521   : > { %v2085_v8 = vpop.f32.mrb[12].mxu1 }
 0x522   : > { %v7046_v9 = vadd.f32 %v2085_v8, %v2020_v7  ;;  %v2087_v10 = vpop.f32.mrb[13].mxu1 }
 0x523   : > { %v7048_v11 = vadd.f32 %v2087_v10, %v2024_v38  ;;  %v2089_v12 = vpop.f32.mrb[14].mxu1 }
 0x524   : > { %v2098_v13 = vand.u32 2147483647, %v7046_v9  ;;  %v7051_v14 = vadd.f32 %v2089_v12, %v2020_v7  ;;  %v2091_v15 = vpop.f32.mrb[15].mxu1  ;;  %v2094_v52 = vmax.f32 %v7046_v9, 0.0 }
 0x525   : > { %v2099_v18 = vand.u32 2147483647, %v7048_v11  ;;  %v7054_v20 = vadd.f32 %v2091_v15, %v2024_v38  ;;  %v2095_v1 = vmax.f32 %v7048_v11, 0.0  ;;  %v5595_v11 = vld [vmem:[%s8154_s9 + $0x8] ss:$28 sps:$4 sm:$0xff]  }
 0x526   : > { %v2102_v21 = vsub.f32 0.0, %v2098_v13  ;;  %v2100_v22 = vand.u32 2147483647, %v7051_v14  ;;  %v2096_v2 = vmax.f32 %v7051_v14, 0.0  ;;  %v5598_v14 = vld [vmem:[%s8156_s11] ss:$28 sps:$4 sm:$0xff]  }
 0x527   : > { %v2103_v23 = vsub.f32 0.0, %v2099_v18  ;;  %v2101_v24 = vand.u32 2147483647, %v7054_v20  ;;  %v2097_v8 = vmax.f32 %v7054_v20, 0.0  ;;  %v5603_v18 = vld [vmem:[%s8154_s9 + $0x44] ss:$28 sps:$4 sm:$0xff]  }
 0x528   : > { %v2106_v25 = vmul.f32 1.442695, %v2102_v21  ;;  %v2104_v26 = vsub.f32 0.0, %v2100_v22  ;;  %v5606_v20 = vld [vmem:[%s8156_s11 + $0x3c] ss:$28 sps:$4 sm:$0xff]  }
 0x529   : > { %v2108_v27 = vmul.f32 1.442695, %v2103_v23  ;;  %v2105_v28 = vsub.f32 0.0, %v2101_v24  ;;  %v5601_v21 = vld [vmem:[%s8154_s9 + $0x40] ss:$28 sps:$4 sm:$0xff]  }
 0x52a   : > { %5863 = vpow2.f32 %v2106_v25  ;;  %v2110_v29 = vmul.f32 1.442695, %v2104_v26  ;;  %v5604_v22 = vld [vmem:[%s8156_s11 + $0x38] ss:$28 sps:$4 sm:$0xff]   ;;  %v5610_v26 = vld [vmem:[%s8156_s11 + $0x70] ss:$28 sps:$4 sm:$0xff]  }
 0x52b   : > { %5865 = vpow2.f32 %v2108_v27  ;;  %v2112_v31 = vmul.f32 1.442695, %v2105_v28  ;;  %v5609_v23 = vld [vmem:[%s8154_s9 + $0x7c] ss:$28 sps:$4 sm:$0xff]   ;;  %v5612_v24 = vld [vmem:[%s8156_s11 + $0x74] ss:$28 sps:$4 sm:$0xff]  }
 0x52c   : > { %5867 = vpow2.f32 %v2110_v29  ;;  %v5607_v25 = vld [vmem:[%s8154_s9 + $0x78] ss:$28 sps:$4 sm:$0xff]   ;;  %v5618_v28 = vld [vmem:[%s8156_s11 + $0xac] ss:$28 sps:$4 sm:$0xff]  }
 0x52d   : > { %5869 = vpow2.f32 %v2112_v31  ;;  %v5615_v27 = vld [vmem:[%s8154_s9 + $0xb4] ss:$28 sps:$4 sm:$0xff]   ;;  %v5616_v31 = vld [vmem:[%s8156_s11 + $0xa8] ss:$28 sps:$4 sm:$0xff]  }
 0x52e   : > { %v5613_v29 = vld [vmem:[%s8154_s9 + $0xb0] ss:$28 sps:$4 sm:$0xff]  }
 0x534   : > { %v5864_v32 = vpop.eup %5863 }
 0x535   : > { %v5866_v34 = vpop.eup %5865  ;;  %v2114_v30 = vadd.f32 1.0, %v5864_v32  ;;  %v2117_v40 = vmul.f32 -0.5, %v5864_v32  ;;  %v2120_v45 = vand.u32 2147483647, %v5864_v32 }
 0x536   : > { %v5868_v33 = vpop.eup %5867  ;;  %v2123_v35 = vadd.f32 1.0, %v5866_v34  ;;  %v2126_v41 = vmul.f32 -0.5, %v5866_v34  ;;  %v2129_v49 = vand.u32 2147483647, %v5866_v34 }
 0x537   : > { %v5870_v36 = vpop.eup %5869  ;;  %5871 = vlog2.f32 %v2114_v30  ;;  %v2132_v37 = vadd.f32 1.0, %v5868_v33  ;;  %v2135_v42 = vmul.f32 -0.5, %v5868_v33  ;;  %v2118_v43 = vadd.f32 1.0, %v2117_v40  ;;  %v5619_v30 = vld [vmem:[%s8154_s9 + $0xe8] ss:$28 sps:$4 sm:$0xff]  }
 0x538   : > { %5873 = vlog2.f32 %v2123_v35  ;;  %v2141_v39 = vadd.f32 1.0, %v5870_v36  ;;  %v2144_v44 = vmul.f32 -0.5, %v5870_v36  ;;  %v2127_v46 = vadd.f32 1.0, %v2126_v41  ;;  %v5627_v35 = vld [vmem:[%s8154_s9 + $0x124] ss:$28 sps:$4 sm:$0xff]  }
 0x539   : > { %5875 = vlog2.f32 %v2132_v37  ;;  %v2136_v47 = vadd.f32 1.0, %v2135_v42  ;;  %v2138_v50 = vand.u32 2147483647, %v5868_v33  ;;  %v2119_v54 = vmul.f32 %v5864_v32, %v2118_v43  ;;  %v5621_v32 = vld [vmem:[%s8154_s9 + $0xec] ss:$28 sps:$4 sm:$0xff]  }
 0x53a   : > { %5877 = vlog2.f32 %v2141_v39  ;;  %v2145_v55 = vadd.f32 1.0, %v2144_v44  ;;  %vm7059_vm14 = vcmp.lt.f32.partialorder %v2120_v45, 0.0004427343  ;;  %v2147_v60 = vand.u32 2147483647, %v5870_v36 }
 0x53b   : > { %v2128_v63 = vmul.f32 %v5866_v34, %v2127_v46  ;;  %v2137_v61 = vmul.f32 %v5868_v33, %v2136_v47  ;;  %vm2130_vm15 = vcmp.lt.f32.partialorder %v2129_v49, 0.0004427343  ;;  %vm2139_vm1 = vcmp.lt.f32.partialorder %v2138_v50, 0.0004427343  ;;  %v5624_v34 = vld [vmem:[%s8156_s11 + $0xe4] ss:$28 sps:$4 sm:$0xff]  }
 0x53c   : > { %v2146_v6 = vmul.f32 %v5870_v36, %v2145_v55  ;;  %vm2148_vm2 = vcmp.lt.f32.partialorder %v2147_v60, 0.0004427343  ;;  %v5622_v33 = vld [vmem:[%s8156_s11 + $0xe0] ss:$28 sps:$4 sm:$0xff]   ;;  %v5628_v39 = vld [vmem:[%s8156_s11 + $0x118] ss:$28 sps:$4 sm:$0xff]  }
 0x53d   : > { %v5630_v36 = vld [vmem:[%s8156_s11 + $0x11c] ss:$28 sps:$4 sm:$0xff]   ;;  %v5636_v41 = vld [vmem:[%s8156_s11 + $0x154] ss:$28 sps:$4 sm:$0xff]   ;;  %v5642_v45 = vld [vmem:[%s8156_s11 + $0x18c] ss:$28 sps:$4 sm:$0xff]  }
 0x53e   : > { %v5625_v37 = vld [vmem:[%s8154_s9 + $0x120] ss:$28 sps:$4 sm:$0xff]   ;;  %v5631_v42 = vld [vmem:[%s8154_s9 + $0x158] ss:$28 sps:$4 sm:$0xff]   ;;  %v5634_v43 = vld [vmem:[%s8156_s11 + $0x150] ss:$28 sps:$4 sm:$0xff]  }
 0x53f   : > { %v5633_v40 = vld [vmem:[%s8154_s9 + $0x15c] ss:$28 sps:$4 sm:$0xff]   ;;  %v5639_v44 = vld [vmem:[%s8154_s9 + $0x194] ss:$28 sps:$4 sm:$0xff]   ;;  %v5640_v47 = vld [vmem:[%s8156_s11 + $0x188] ss:$28 sps:$4 sm:$0xff]  }
 0x540   : > { %v5637_v46 = vld [vmem:[%s8154_s9 + $0x190] ss:$28 sps:$4 sm:$0xff]   ;;  %v5648_v49 = vld [vmem:[%s8156_s11 + $0x1c4] ss:$28 sps:$4 sm:$0xff]   ;;  %v5652_v55 = vld [vmem:[%s8156_s11 + $0x1f8] ss:$28 sps:$4 sm:$0xff]  }
 0x541   : > { %v5872_v48 = vpop.eup %5871  ;;  %v5643_v50 = vld [vmem:[%s8154_s9 + $0x1c8] ss:$28 sps:$4 sm:$0xff]   ;;  %v5658_v60 = vld [vmem:[%s8156_s11 + $0x230] ss:$28 sps:$4 sm:$0xff]  }
 0x542   : > { %v5874_v51 = vpop.eup %5873  ;;  %v2116_v53 = vmul.f32 0.6931472, %v5872_v48  ;;  %v5645_v48 = vld [vmem:[%s8154_s9 + $0x1cc] ss:$28 sps:$4 sm:$0xff]  }
 0x543   : > { %v5876_v56 = vpop.eup %5875  ;;  %v2125_v59 = vmul.f32 0.6931472, %v5874_v51  ;;  %v5646_v51 = vld [vmem:[%s8156_s11 + $0x1c0] ss:$28 sps:$4 sm:$0xff]  }
 0x544   : > { %v2122_v62 = vsel %vm7059_vm14, %v2119_v54, %v2116_v53  ;;  %v2134_v58 = vmul.f32 0.6931472, %v5876_v56  ;;  %v5878_v0 = vpop.eup %5877  ;;  %v5654_v53 = vld [vmem:[%s8156_s11 + $0x1fc] ss:$28 sps:$4 sm:$0xff]  }
 0x545   : > { %v2131_v3 = vsel %vm2130_vm15, %v2128_v63, %v2125_v59  ;;  %v2143_v5 = vmul.f32 0.6931472, %v5878_v0  ;;  %v2150_v7 = vadd.f32 %v2122_v62, %v2094_v52  ;;  %v5651_v52 = vld [vmem:[%s8154_s9 + $0x204] ss:$28 sps:$4 sm:$0xff]   ;;  %v5657_v56 = vld [vmem:[%s8154_s9 + $0x23c] ss:$28 sps:$4 sm:$0xff]  }
 0x546   : > { %v2140_v4 = vsel %vm2139_vm1, %v2137_v61, %v2134_v58  ;;  %v2151_v10 = vadd.f32 %v2131_v3, %v2095_v1  ;;  %v5649_v54 = vld [vmem:[%s8154_s9 + $0x200] ss:$28 sps:$4 sm:$0xff]   ;;  %v5655_v59 = vld [vmem:[%s8154_s9 + $0x238] ss:$28 sps:$4 sm:$0xff]   ;;  %v5666_v63 = vld [vmem:[%s8156_s11 + $0x26c] ss:$28 sps:$4 sm:$0xff]  }
 0x547   : > { %v2152_v38 = vadd.f32 %v2140_v4, %v2096_v2  ;;  %v2149_v9 = vsel %vm2148_vm2, %v2146_v6, %v2143_v5  ;;  %v5663_v62 = vld [vmem:[%s8154_s9 + $0x274] ss:$28 sps:$4 sm:$0xff]   ;;  %v5664_v61 = vld [vmem:[%s8156_s11 + $0x268] ss:$28 sps:$4 sm:$0xff]   ;;  %v5670_v3 = vld [vmem:[%s8156_s11 + $0x2a0] ss:$28 sps:$4 sm:$0xff]  }
 0x548   : > { %v2153_v13 = vadd.f32 %v2149_v9, %v2097_v8  ;;  %v5661_v58 = vld [vmem:[%s8154_s9 + $0x270] ss:$28 sps:$4 sm:$0xff]   ;;  %v5672_v1 = vld [vmem:[%s8156_s11 + $0x2a4] ss:$28 sps:$4 sm:$0xff]   ;;  %v5678_v5 = vld [vmem:[%s8156_s11 + $0x2dc] ss:$28 sps:$4 sm:$0xff]  }
 0x549   : > { %v7068_v12 = vpack.c.bf16 %v2152_v38, %v2150_v7  ;;  %v5669_v0 = vld [vmem:[%s8154_s9 + $0x2ac] ss:$28 sps:$4 sm:$0xff]   ;;  %v5675_v4 = vld [vmem:[%s8154_s9 + $0x2e4] ss:$28 sps:$4 sm:$0xff]   ;;  %v5676_v7 = vld [vmem:[%s8156_s11 + $0x2d8] ss:$28 sps:$4 sm:$0xff]  }
 0x54a   : > { %v7070_v15 = vpack.c.bf16 %v2153_v13, %v2151_v10  ;;  %v5667_v2 = vld [vmem:[%s8154_s9 + $0x2a8] ss:$28 sps:$4 sm:$0xff]   ;;  %v5673_v6 = vld [vmem:[%s8154_s9 + $0x2e0] ss:$28 sps:$4 sm:$0xff]   ;;  %v5684_v8 = vld [vmem:[%s8156_s11 + $0x314] ss:$28 sps:$4 sm:$0xff]  }
 0x54b   : > { %v5681_v38 = vld [vmem:[%s8154_s9 + $0x31c] ss:$28 sps:$4 sm:$0xff]   ;;  %v5682_v10 = vld [vmem:[%s8156_s11 + $0x310] ss:$28 sps:$4 sm:$0xff]  }
 0x54c   : > { %2929 = vmatprep.mubr.bf16.mxu1 %v7070_v15  ;;  %3015 = vmatprep.mubr.bf16.mxu0 %v7070_v15  ;;  %v5679_v9 = vld [vmem:[%s8154_s9 + $0x318] ss:$28 sps:$4 sm:$0xff]  }
 0x54d   : > { %2930 = vmatmul.mubr.bf16.vlgmr.msra.gmra.mrb[16].mxu1 %v7068_v12  ;;  %3016 = vmatmul.mubr.bf16.vlgmr.msra.gmra.mrb[4].mxu0 %v7068_v12  ;;  %v5687_v13 = vld [vmem:[%s8154_s9 + $0x354] ss:$28 sps:$4 sm:$0xff]  }
 0x54e   : > { %2941 = vmatpush1.bf16.msra.mxu1 %v5595_v11  ;;  %4019 = vmatpush1.bf16.msra.mxu0 %v5598_v14  ;;  %v5690_v11 = vld [vmem:[%s8156_s11 + $0x34c] ss:$28 sps:$4 sm:$0xff]  }
 0x54f   : > { %2972 = vmatprep.mubr.bf16.mxu1 %v7070_v15  ;;  %4050 = vmatprep.mubr.bf16.mxu0 %v7070_v15  ;;  %v5685_v14 = vld [vmem:[%s8154_s9 + $0x350] ss:$28 sps:$4 sm:$0xff]  }
 0x550   : > { %2942 = vmatprep.subr.bf16.mxu1 %v5603_v18  ;;  %4020 = vmatprep.subr.bf16.mxu0 %v5606_v20  ;;  %v5688_v18 = vld [vmem:[%s8156_s11 + $0x348] ss:$28 sps:$4 sm:$0xff]   ;;  %v5691_v20 = vld [vmem:[%s8154_s9 + $0x1d8] ss:$28 sps:$4 sm:$0xff]  }
 0x552   : > { %2943 = vmatpush1.bf16.msra.mxu1 %v5601_v21  ;;  %4021 = vmatpush1.bf16.msra.mxu0 %v5604_v22  ;;  %v5694_v21 = vld [vmem:[%s8156_s11 + $0x14] ss:$28 sps:$4 sm:$0xff]  }
 0x553   : > { %2944 = vmatprep.subr.bf16.mxu1 %v5609_v23  ;;  %4022 = vmatprep.subr.bf16.mxu0 %v5612_v24  ;;  %v5695_v22 = vld [vmem:[%s8154_s9 + $0x18] ss:$28 sps:$4 sm:$0xff]   ;;  %v5692_v23 = vld [vmem:[%s8156_s11 + $0x10] ss:$28 sps:$4 sm:$0xff]  }
 0x554   : > { %v5696_v24 = vld [vmem:[%s8154_s9 + $0x210] ss:$28 sps:$4 sm:$0xff]  }
 0x556   : > { %2945 = vmatpush1.bf16.msra.mxu1 %v5607_v25  ;;  %4023 = vmatpush1.bf16.msra.mxu0 %v5610_v26  ;;  %v5699_v25 = vld [vmem:[%s8156_s11 + $0x4c] ss:$28 sps:$4 sm:$0xff]  }
 0x557   : > { %2946 = vmatprep.subr.bf16.mxu1 %v5615_v27  ;;  %4024 = vmatprep.subr.bf16.mxu0 %v5618_v28  ;;  %v5700_v26 = vld [vmem:[%s8154_s9 + $0x50] ss:$28 sps:$4 sm:$0xff]   ;;  %v5697_v27 = vld [vmem:[%s8156_s11 + $0x48] ss:$28 sps:$4 sm:$0xff]  }
 0x558   : > { %v5701_v28 = vld [vmem:[%s8154_s9 + $0x248] ss:$28 sps:$4 sm:$0xff]  }
 0x55a   : > { %2947 = vmatpush1.bf16.msra.mxu1 %v5613_v29  ;;  %4025 = vmatpush1.bf16.msra.mxu0 %v5616_v31  ;;  %v5704_v29 = vld [vmem:[%s8156_s11 + $0x84] ss:$28 sps:$4 sm:$0xff]  }
 0x55b   : > { %2948 = vmatprep.subr.bf16.mxu1 %v5621_v32  ;;  %4026 = vmatprep.subr.bf16.mxu0 %v5624_v34  ;;  %v5705_v31 = vld [vmem:[%s8154_s9 + $0x88] ss:$28 sps:$4 sm:$0xff]   ;;  %v5702_v32 = vld [vmem:[%s8156_s11 + $0x80] ss:$28 sps:$4 sm:$0xff]  }
 0x55c   : > { %v5706_v34 = vld [vmem:[%s8154_s9 + $0x280] ss:$28 sps:$4 sm:$0xff]  }
 0x55e   : > { %2949 = vmatpush1.bf16.msra.mxu1 %v5619_v30  ;;  %4027 = vmatpush1.bf16.msra.mxu0 %v5622_v33  ;;  %v5709_v30 = vld [vmem:[%s8156_s11 + $0xbc] ss:$28 sps:$4 sm:$0xff]  }
 0x55f   : > { %2950 = vmatprep.subr.bf16.mxu1 %v5627_v35  ;;  %4028 = vmatprep.subr.bf16.mxu0 %v5630_v36  ;;  %v5710_v33 = vld [vmem:[%s8154_s9 + $0xc0] ss:$28 sps:$4 sm:$0xff]   ;;  %v5707_v35 = vld [vmem:[%s8156_s11 + $0xb8] ss:$28 sps:$4 sm:$0xff]  }
 0x560   : > { %v5711_v36 = vld [vmem:[%s8154_s9 + $0x2b8] ss:$28 sps:$4 sm:$0xff]  }
 0x562   : > { %2951 = vmatpush1.bf16.msra.mxu1 %v5625_v37  ;;  %4029 = vmatpush1.bf16.msra.mxu0 %v5628_v39  ;;  %v5714_v37 = vld [vmem:[%s8156_s11 + $0xf4] ss:$28 sps:$4 sm:$0xff]  }
 0x563   : > { %2952 = vmatprep.subr.bf16.mxu1 %v5633_v40  ;;  %4030 = vmatprep.subr.bf16.mxu0 %v5636_v41  ;;  %v5715_v39 = vld [vmem:[%s8154_s9 + $0xf8] ss:$28 sps:$4 sm:$0xff]   ;;  %v5712_v40 = vld [vmem:[%s8156_s11 + $0xf0] ss:$28 sps:$4 sm:$0xff]  }
 0x564   : > { %v5716_v41 = vld [vmem:[%s8154_s9 + $0x2f0] ss:$28 sps:$4 sm:$0xff]  }
 0x566   : > { %2953 = vmatpush1.bf16.msra.mxu1 %v5631_v42  ;;  %4031 = vmatpush1.bf16.msra.mxu0 %v5634_v43  ;;  %v5719_v42 = vld [vmem:[%s8156_s11 + $0x12c] ss:$28 sps:$4 sm:$0xff]  }
 0x567   : > { %2954 = vmatprep.subr.bf16.mxu1 %v5639_v44  ;;  %4032 = vmatprep.subr.bf16.mxu0 %v5642_v45  ;;  %v5720_v43 = vld [vmem:[%s8154_s9 + $0x130] ss:$28 sps:$4 sm:$0xff]   ;;  %v5717_v44 = vld [vmem:[%s8156_s11 + $0x128] ss:$28 sps:$4 sm:$0xff]  }
 0x568   : > { %v5721_v45 = vld [vmem:[%s8154_s9 + $0x328] ss:$28 sps:$4 sm:$0xff]  }
 0x56a   : > { %2955 = vmatpush1.bf16.msra.mxu1 %v5637_v46  ;;  %4033 = vmatpush1.bf16.msra.mxu0 %v5640_v47  ;;  %v5724_v46 = vld [vmem:[%s8156_s11 + $0x164] ss:$28 sps:$4 sm:$0xff]  }
 0x56b   : > { %2956 = vmatprep.subr.bf16.mxu1 %v5645_v48  ;;  %4034 = vmatprep.subr.bf16.mxu0 %v5648_v49  ;;  %v5725_v47 = vld [vmem:[%s8154_s9 + $0x168] ss:$28 sps:$4 sm:$0xff]   ;;  %v5722_v48 = vld [vmem:[%s8156_s11 + $0x160] ss:$28 sps:$4 sm:$0xff]  }
 0x56c   : > { %v5726_v49 = vld [vmem:[%s8154_s9 + $0x360] ss:$28 sps:$4 sm:$0xff]  }
 0x56e   : > { %2957 = vmatpush1.bf16.msra.mxu1 %v5643_v50  ;;  %4035 = vmatpush1.bf16.msra.mxu0 %v5646_v51  ;;  %v5729_v50 = vld [vmem:[%s8156_s11 + $0x19c] ss:$28 sps:$4 sm:$0xff]  }
 0x56f   : > { %2958 = vmatprep.subr.bf16.mxu1 %v5651_v52  ;;  %4036 = vmatprep.subr.bf16.mxu0 %v5654_v53  ;;  %v5730_v51 = vld [vmem:[%s8154_s9 + $0x1a0] ss:$28 sps:$4 sm:$0xff]   ;;  %v5727_v52 = vld [vmem:[%s8156_s11 + $0x198] ss:$28 sps:$4 sm:$0xff]   ;;  %v5733_v53 = vld [vmem:[%s8156_s11 + $0xc] ss:$28 sps:$4 sm:$0xff]  }
 0x572   : > { %2959 = vmatpush1.bf16.msra.mxu1 %v5649_v54  ;;  %4037 = vmatpush1.bf16.msra.mxu0 %v5652_v55  ;;  %v5736_v54 = vld [vmem:[%s8156_s11 + $0x1d4] ss:$28 sps:$4 sm:$0xff]   ;;  %v5731_v55 = vld [vmem:[%s8156_s11 + $0x8] ss:$28 sps:$4 sm:$0xff]  }
 0x573   : > { %2960 = vmatprep.subr.bf16.mxu1 %v5657_v56  ;;  %4038 = vmatprep.subr.bf16.mxu0 %v5660_v57  ;;  %v5734_v56 = vld [vmem:[%s8156_s11 + $0x1d0] ss:$28 sps:$4 sm:$0xff]   ;;  %v5739_v57 = vld [vmem:[%s8156_s11 + $0x44] ss:$28 sps:$4 sm:$0xff]  }
 0x576   : > { %2961 = vmatpush1.bf16.msra.mxu1 %v5655_v59  ;;  %4039 = vmatpush1.bf16.msra.mxu0 %v5658_v60  ;;  %v5742_v59 = vld [vmem:[%s8156_s11 + $0x20c] ss:$28 sps:$4 sm:$0xff]   ;;  %v5737_v60 = vld [vmem:[%s8156_s11 + $0x40] ss:$28 sps:$4 sm:$0xff]  }
 0x577   : > { %2962 = vmatprep.subr.bf16.mxu1 %v5663_v62  ;;  %4040 = vmatprep.subr.bf16.mxu0 %v5666_v63  ;;  %v5740_v62 = vld [vmem:[%s8156_s11 + $0x208] ss:$28 sps:$4 sm:$0xff]   ;;  %v5745_v63 = vld [vmem:[%s8156_s11 + $0x7c] ss:$28 sps:$4 sm:$0xff]  }
 0x57a   : > { %2963 = vmatpush1.bf16.msra.mxu1 %v5661_v58  ;;  %4041 = vmatpush1.bf16.msra.mxu0 %v5664_v61  ;;  %v5748_v58 = vld [vmem:[%s8156_s11 + $0x244] ss:$28 sps:$4 sm:$0xff]   ;;  %v5743_v61 = vld [vmem:[%s8156_s11 + $0x78] ss:$28 sps:$4 sm:$0xff]  }
 0x57b   : > { %2964 = vmatprep.subr.bf16.mxu1 %v5669_v0  ;;  %4042 = vmatprep.subr.bf16.mxu0 %v5672_v1  ;;  %v5746_v0 = vld [vmem:[%s8156_s11 + $0x240] ss:$28 sps:$4 sm:$0xff]   ;;  %v5751_v1 = vld [vmem:[%s8156_s11 + $0xb4] ss:$28 sps:$4 sm:$0xff]  }
 0x57e   : > { %2965 = vmatpush1.bf16.msra.mxu1 %v5667_v2  ;;  %4043 = vmatpush1.bf16.msra.mxu0 %v5670_v3  ;;  %v5754_v2 = vld [vmem:[%s8156_s11 + $0x27c] ss:$28 sps:$4 sm:$0xff]   ;;  %v5749_v3 = vld [vmem:[%s8156_s11 + $0xb0] ss:$28 sps:$4 sm:$0xff]  }
 0x57f   : > { %2966 = vmatprep.subr.bf16.mxu1 %v5675_v4  ;;  %4044 = vmatprep.subr.bf16.mxu0 %v5678_v5  ;;  %v5752_v4 = vld [vmem:[%s8156_s11 + $0x278] ss:$28 sps:$4 sm:$0xff]   ;;  %v5757_v5 = vld [vmem:[%s8156_s11 + $0xec] ss:$28 sps:$4 sm:$0xff]  }
 0x582   : > { %2967 = vmatpush1.bf16.msra.mxu1 %v5673_v6  ;;  %4045 = vmatpush1.bf16.msra.mxu0 %v5676_v7  ;;  %v5760_v6 = vld [vmem:[%s8156_s11 + $0x2b4] ss:$28 sps:$4 sm:$0xff]   ;;  %v5755_v7 = vld [vmem:[%s8156_s11 + $0xe8] ss:$28 sps:$4 sm:$0xff]  }
 0x583   : > { %2968 = vmatprep.subr.bf16.mxu1 %v5681_v38  ;;  %4046 = vmatprep.subr.bf16.mxu0 %v5684_v8  ;;  %v5758_v38 = vld [vmem:[%s8156_s11 + $0x2b0] ss:$28 sps:$4 sm:$0xff]   ;;  %v5763_v8 = vld [vmem:[%s8156_s11 + $0x124] ss:$28 sps:$4 sm:$0xff]  }
 0x586   : > { %2969 = vmatpush1.bf16.msra.mxu1 %v5679_v9  ;;  %4047 = vmatpush1.bf16.msra.mxu0 %v5682_v10  ;;  %v5766_v9 = vld [vmem:[%s8156_s11 + $0x2ec] ss:$28 sps:$4 sm:$0xff]   ;;  %v5761_v10 = vld [vmem:[%s8156_s11 + $0x120] ss:$28 sps:$4 sm:$0xff]  }
 0x587   : > { %2970 = vmatprep.subr.bf16.mxu1 %v5687_v13  ;;  %4048 = vmatprep.subr.bf16.mxu0 %v5690_v11  ;;  %v5764_v13 = vld [vmem:[%s8156_s11 + $0x2e8] ss:$28 sps:$4 sm:$0xff]   ;;  %v5769_v11 = vld [vmem:[%s8156_s11 + $0x15c] ss:$28 sps:$4 sm:$0xff]  }
 0x58a   : > { %2971 = vmatpush1.bf16.msra.mxu1 %v5685_v14  ;;  %4049 = vmatpush1.bf16.msra.mxu0 %v5688_v18  ;;  %v5772_v14 = vld [vmem:[%s8156_s11 + $0x324] ss:$28 sps:$4 sm:$0xff]   ;;  %v5767_v18 = vld [vmem:[%s8156_s11 + $0x158] ss:$28 sps:$4 sm:$0xff]  }
 0x58b   : > { %5164 = vmatprep.subr.bf16.mxu1 %v5691_v20  ;;  %4104 = vmatprep.subr.bf16.mxu0 %v5694_v21  ;;  %v5770_v20 = vld [vmem:[%s8156_s11 + $0x320] ss:$28 sps:$4 sm:$0xff]   ;;  %v5775_v21 = vld [vmem:[%s8156_s11 + $0x194] ss:$28 sps:$4 sm:$0xff]  }
 0x58d   : > { %2973 = vmatmul.mubr.bf16.vlgmr.msra.gmra.mrb[20].mxu1 %v7068_v12  ;;  %4051 = vmatmul.mubr.bf16.vlgmr.msra.gmra.mrb[8].mxu0 %v7068_v12 }
 0x58e   : > { %5165 = vmatpush3.bf16.msra.mxu1 %v5695_v22  ;;  %3058 = vmatprep.mubr.bf16.mxu1 %v7070_v15  ;;  %v5778_v22 = vld [vmem:[%s8156_s11 + $0x35c] ss:$28 sps:$4 sm:$0xff]  }
 0x58f   : > { %4105 = vmatpush1.bf16.msra.mxu0 %v5692_v23  ;;  %4136 = vmatprep.mubr.bf16.mxu0 %v7070_v15  ;;  %v5773_v23 = vld [vmem:[%s8156_s11 + $0x190] ss:$28 sps:$4 sm:$0xff]  }
 0x590   : > { %5166 = vmatprep.subr.bf16.mxu1 %v5696_v24  ;;  %4106 = vmatprep.subr.bf16.mxu0 %v5699_v25  ;;  %v5776_v24 = vld [vmem:[%s8156_s11 + $0x358] ss:$28 sps:$4 sm:$0xff]   ;;  %v5781_v25 = vld [vmem:[%s8156_s11 + $0x1cc] ss:$28 sps:$4 sm:$0xff]  }
 0x592   : > { %5167 = vmatpush3.bf16.msra.mxu1 %v5700_v26  ;;  %v5779_v26 = vld [vmem:[%s8156_s11 + $0x1c8] ss:$28 sps:$4 sm:$0xff]  }
 0x593   : > { %4107 = vmatpush1.bf16.msra.mxu0 %v5697_v27  ;;  %5168 = vmatprep.subr.bf16.mxu1 %v5701_v28  ;;  %v5784_v27 = vld [vmem:[%s8156_s11 + $0x204] ss:$28 sps:$4 sm:$0xff]  }
 0x594   : > { %4108 = vmatprep.subr.bf16.mxu0 %v5704_v29  ;;  %v5782_v28 = vld [vmem:[%s8156_s11 + $0x200] ss:$28 sps:$4 sm:$0xff]  }
 0x595   : > { %v5787_v29 = vld [vmem:[%s8156_s11 + $0x23c] ss:$28 sps:$4 sm:$0xff]  }
 0x596   : > { %5169 = vmatpush3.bf16.msra.mxu1 %v5705_v31  ;;  %v5785_v31 = vld [vmem:[%s8156_s11 + $0x238] ss:$28 sps:$4 sm:$0xff]  }
 0x597   : > { %4109 = vmatpush1.bf16.msra.mxu0 %v5702_v32  ;;  %5170 = vmatprep.subr.bf16.mxu1 %v5706_v34  ;;  %v5790_v32 = vld [vmem:[%s8156_s11 + $0x274] ss:$28 sps:$4 sm:$0xff]  }
 0x598   : > { %4110 = vmatprep.subr.bf16.mxu0 %v5709_v30  ;;  %v5788_v34 = vld [vmem:[%s8156_s11 + $0x270] ss:$28 sps:$4 sm:$0xff]  }
 0x599   : > { %v5793_v30 = vld [vmem:[%s8156_s11 + $0x2ac] ss:$28 sps:$4 sm:$0xff]  }
 0x59a   : > { %5171 = vmatpush3.bf16.msra.mxu1 %v5710_v33  ;;  %v5791_v33 = vld [vmem:[%s8156_s11 + $0x2a8] ss:$28 sps:$4 sm:$0xff]  }
 0x59b   : > { %4111 = vmatpush1.bf16.msra.mxu0 %v5707_v35  ;;  %5172 = vmatprep.subr.bf16.mxu1 %v5711_v36  ;;  %v5796_v35 = vld [vmem:[%s8156_s11 + $0x2e4] ss:$28 sps:$4 sm:$0xff]  }
 0x59c   : > { %4112 = vmatprep.subr.bf16.mxu0 %v5714_v37  ;;  %v5794_v36 = vld [vmem:[%s8156_s11 + $0x2e0] ss:$28 sps:$4 sm:$0xff]  }
 0x59d   : > { %v5799_v37 = vld [vmem:[%s8156_s11 + $0x31c] ss:$28 sps:$4 sm:$0xff]  }
 0x59e   : > { %5173 = vmatpush3.bf16.msra.mxu1 %v5715_v39  ;;  %v5797_v39 = vld [vmem:[%s8156_s11 + $0x318] ss:$28 sps:$4 sm:$0xff]  }
 0x59f   : > { %4113 = vmatpush1.bf16.msra.mxu0 %v5712_v40  ;;  %5174 = vmatprep.subr.bf16.mxu1 %v5716_v41  ;;  %v5802_v40 = vld [vmem:[%s8156_s11 + $0x354] ss:$28 sps:$4 sm:$0xff]  }
 0x5a0   : > { %4114 = vmatprep.subr.bf16.mxu0 %v5719_v42  ;;  %v5800_v41 = vld [vmem:[%s8156_s11 + $0x350] ss:$28 sps:$4 sm:$0xff]   ;;  %v5803_v42 = vld [vmem:[%s8156_s11 + $0x1d8] ss:$28 sps:$4 sm:$0xff]  }
 0x5a2   : > { %5175 = vmatpush3.bf16.msra.mxu1 %v5720_v43  ;;  %v5804_v43 = vld [vmem:[%s8156_s11 + $0x18] ss:$28 sps:$4 sm:$0xff]  }
 0x5a3   : > { %4115 = vmatpush1.bf16.msra.mxu0 %v5717_v44  ;;  %5176 = vmatprep.subr.bf16.mxu1 %v5721_v45  ;;  %v5805_v44 = vld [vmem:[%s8156_s11 + $0x210] ss:$28 sps:$4 sm:$0xff]  }
 0x5a4   : > { %4116 = vmatprep.subr.bf16.mxu0 %v5724_v46  ;;  %v5806_v45 = vld [vmem:[%s8156_s11 + $0x50] ss:$28 sps:$4 sm:$0xff]   ;;  %v5807_v46 = vld [vmem:[%s8156_s11 + $0x248] ss:$28 sps:$4 sm:$0xff]  }
 0x5a6   : > { %5177 = vmatpush3.bf16.msra.mxu1 %v5725_v47  ;;  %v5808_v47 = vld [vmem:[%s8156_s11 + $0x88] ss:$28 sps:$4 sm:$0xff]  }
 0x5a7   : > { %4117 = vmatpush1.bf16.msra.mxu0 %v5722_v48  ;;  %5178 = vmatprep.subr.bf16.mxu1 %v5726_v49  ;;  %v5809_v48 = vld [vmem:[%s8156_s11 + $0x280] ss:$28 sps:$4 sm:$0xff]   ;;  %v5811_v49 = vld [vmem:[%s8156_s11 + $0x2b8] ss:$28 sps:$4 sm:$0xff]  }
 0x5a8   : > { %4118 = vmatprep.subr.bf16.mxu0 %v5729_v50  ;;  %v5812_v50 = vld [vmem:[%s8156_s11 + $0xf8] ss:$28 sps:$4 sm:$0xff]  }
 0x5aa   : > { %5179 = vmatpush3.bf16.msra.mxu1 %v5730_v51  ;;  %v5813_v51 = vld [vmem:[%s8156_s11 + $0x2f0] ss:$28 sps:$4 sm:$0xff]  }
 0x5ab   : > { %4119 = vmatpush1.bf16.msra.mxu0 %v5727_v52  ;;  %4061 = vmatprep.subr.bf16.mxu1 %v5733_v53  ;;  %v5814_v52 = vld [vmem:[%s8156_s11 + $0x130] ss:$28 sps:$4 sm:$0xff]   ;;  %v5815_v53 = vld [vmem:[%s8156_s11 + $0x328] ss:$28 sps:$4 sm:$0xff]  }
 0x5ac   : > { %4120 = vmatprep.subr.bf16.mxu0 %v5736_v54  ;;  %v5816_v54 = vld [vmem:[%s8156_s11 + $0x168] ss:$28 sps:$4 sm:$0xff]  }
 0x5ad   : > { %3059 = vmatmul.mubr.bf16.vlgmr.msra.gmra.mrb[24].mxu1 %v7068_v12 }
 0x5ae   : > { %4062 = vmatpush1.bf16.msra.mxu1 %v5731_v55  ;;  %4093 = vmatprep.mubr.bf16.mxu1 %v7070_v15  ;;  %v5817_v55 = vld [vmem:[%s8156_s11 + $0x360] ss:$28 sps:$4 sm:$0xff]  }
 0x5af   : > { %4121 = vmatpush1.bf16.msra.mxu0 %v5734_v56  ;;  %4063 = vmatprep.subr.bf16.mxu1 %v5739_v57  ;;  %v5818_v56 = vld [vmem:[%s8156_s11 + $0x1a0] ss:$28 sps:$4 sm:$0xff]  }
 0x5b0   : > { %4122 = vmatprep.subr.bf16.mxu0 %v5742_v59 }
 0x5b2   : > { %4064 = vmatpush1.bf16.msra.mxu1 %v5737_v60 }
 0x5b3   : > { %4123 = vmatpush1.bf16.msra.mxu0 %v5740_v62  ;;  %4065 = vmatprep.subr.bf16.mxu1 %v5745_v63 }
 0x5b4   : > { %4124 = vmatprep.subr.bf16.mxu0 %v5748_v58 }
 0x5b6   : > { %4066 = vmatpush1.bf16.msra.mxu1 %v5743_v61 }
 0x5b7   : > { %4125 = vmatpush1.bf16.msra.mxu0 %v5746_v0  ;;  %4067 = vmatprep.subr.bf16.mxu1 %v5751_v1  ;;  %v7573_v1 = vld [vmem:[%s8155_s10] sm:$0x7f] }
 0x5b8   : > { %4126 = vmatprep.subr.bf16.mxu0 %v5754_v2  ;;  %v7580_v2 = vld [vmem:[%s8157_s12] sm:$0x7f] }
 0x5ba   : > { %4068 = vmatpush1.bf16.msra.mxu1 %v5749_v3  ;;  %v2293_v3 = vrot.slane %v7573_v1, %v6695_v19 }
 0x5bb   : > { %4127 = vmatpush1.bf16.msra.mxu0 %v5752_v4  ;;  %4069 = vmatprep.subr.bf16.mxu1 %v5757_v5  ;;  %v3410_v4 = vrot.slane %v7580_v2, %v6689_v17 }
 0x5bc   : > { %4128 = vmatprep.subr.bf16.mxu0 %v5760_v6  ;;  %v3414_v6 = vrot.slane %v7580_v2, %v6695_v19 }
 0x5be   : > { %4070 = vmatpush1.bf16.msra.mxu1 %v5755_v7 }
 0x5bf   : > { %4129 = vmatpush1.bf16.msra.mxu0 %v5758_v38  ;;  %4071 = vmatprep.subr.bf16.mxu1 %v5763_v8 }
 0x5c0   : > { %4130 = vmatprep.subr.bf16.mxu0 %v5766_v9 }
 0x5c2   : > { %4072 = vmatpush1.bf16.msra.mxu1 %v5761_v10 }
 0x5c3   : > { %4131 = vmatpush1.bf16.msra.mxu0 %v5764_v13  ;;  %4073 = vmatprep.subr.bf16.mxu1 %v5769_v11 }
 0x5c4   : > { %4132 = vmatprep.subr.bf16.mxu0 %v5772_v14 }
 0x5c6   : > { %4074 = vmatpush1.bf16.msra.mxu1 %v5767_v18 }
 0x5c7   : > { %4133 = vmatpush1.bf16.msra.mxu0 %v5770_v20  ;;  %4075 = vmatprep.subr.bf16.mxu1 %v5775_v21 }
 0x5c8   : > { %4134 = vmatprep.subr.bf16.mxu0 %v5778_v22 }
 0x5ca   : > { %4076 = vmatpush1.bf16.msra.mxu1 %v5773_v23 }
 0x5cb   : > { %4135 = vmatpush1.bf16.msra.mxu0 %v5776_v24  ;;  %4077 = vmatprep.subr.bf16.mxu1 %v5781_v25 }
 0x5ce   : > { %4137 = vmatmul.mubr.bf16.vlgmr.msra.gmra.mrb[12].mxu0 %v7068_v12  ;;  %4078 = vmatpush1.bf16.msra.mxu1 %v5779_v26 }
 0x5cf   : > { %4079 = vmatprep.subr.bf16.mxu1 %v5784_v27 }
 0x5d2   : > { %4080 = vmatpush1.bf16.msra.mxu1 %v5782_v28 }
 0x5d3   : > { %4081 = vmatprep.subr.bf16.mxu1 %v5787_v29 }
 0x5d6   : > { %4082 = vmatpush1.bf16.msra.mxu1 %v5785_v31 }
 0x5d7   : > { %4083 = vmatprep.subr.bf16.mxu1 %v5790_v32 }
 0x5da   : > { %4084 = vmatpush1.bf16.msra.mxu1 %v5788_v34 }
 0x5db   : > { %4085 = vmatprep.subr.bf16.mxu1 %v5793_v30 }
 0x5de   : > { %4086 = vmatpush1.bf16.msra.mxu1 %v5791_v33 }
 0x5df   : > { %4087 = vmatprep.subr.bf16.mxu1 %v5796_v35 }
 0x5e2   : > { %4088 = vmatpush1.bf16.msra.mxu1 %v5794_v36 }
 0x5e3   : > { %4089 = vmatprep.subr.bf16.mxu1 %v5799_v37 }
 0x5e6   : > { %4090 = vmatpush1.bf16.msra.mxu1 %v5797_v39 }
 0x5e7   : > { %4091 = vmatprep.subr.bf16.mxu1 %v5802_v40 }
 0x5ea   : > { %4092 = vmatpush1.bf16.msra.mxu1 %v5800_v41 }
 0x5eb   : > { %5186 = vmatprep.subr.bf16.mxu1 %v5803_v42 }
 0x5ed   : > { %4094 = vmatmul.mubr.bf16.vlgmr.msra.gmra.mrb[28].mxu1 %v7068_v12 }
 0x5ee   : > { %5187 = vmatpush3.bf16.msra.mxu1 %v5804_v43  ;;  %4179 = vmatprep.mubr.bf16.mxu1 %v7070_v15  ;;  %v5810_v15 = vld [vmem:[%s8156_s11 + $0xc0] ss:$28 sps:$4 sm:$0xff]  }
 0x5ef   : > { %5188 = vmatprep.subr.bf16.mxu1 %v5805_v44 }
 0x5f2   : > { %5189 = vmatpush3.bf16.msra.mxu1 %v5806_v45 }
 0x5f3   : > { %5190 = vmatprep.subr.bf16.mxu1 %v5807_v46 }
 0x5f6   : > { %5191 = vmatpush3.bf16.msra.mxu1 %v5808_v47 }
 0x5f7   : > { %5192 = vmatprep.subr.bf16.mxu1 %v5809_v48 }
 0x5fa   : > { %5193 = vmatpush3.bf16.msra.mxu1 %v5810_v15 }
 0x5fb   : > { %5194 = vmatprep.subr.bf16.mxu1 %v5811_v49 }
 0x5fe   : > { %5195 = vmatpush3.bf16.msra.mxu1 %v5812_v50 }
 0x5ff   : > { %5196 = vmatprep.subr.bf16.mxu1 %v5813_v51 }
 0x602   : > { %5197 = vmatpush3.bf16.msra.mxu1 %v5814_v52 }
 0x603   : > { %5198 = vmatprep.subr.bf16.mxu1 %v5815_v53 }
 0x606   : > { %5199 = vmatpush3.bf16.msra.mxu1 %v5816_v54 }
 0x607   : > { %5200 = vmatprep.subr.bf16.mxu1 %v5817_v55 }
 0x60a   : > { %5201 = vmatpush3.bf16.msra.mxu1 %v5818_v56 }
 0x60d   : > { %4180 = vmatmul.mubr.bf16.vlgmr.msra.gmra.mrb[32].mxu1 %v7068_v12  ;;  %v2289_v12 = vrot.slane %v7573_v1, %v6689_v17 }
 0x620   : > { %v2931_v57 = vpop.f32.mrb[16].mxu1  ;;  %v7562_v59 = vpop.f32.mrb[4].mxu0 }
 0x621   : > { %v2933_v60 = vpop.f32.mrb[17].mxu1  ;;  %v7564_v62 = vpop.f32.mrb[5].mxu0  ;;  %v7586_v5 = vadd.f32 %v2931_v57, %v2289_v12 }
 0x622   : > { %v2935_v63 = vpop.f32.mrb[18].mxu1  ;;  %v7566_v58 = vpop.f32.mrb[6].mxu0  ;;  %v7592_v8 = vadd.f32 %v2933_v60, %v2293_v3 }
 0x623   : > { %v2937_v61 = vpop.f32.mrb[19].mxu1  ;;  %v7568_v0 = vpop.f32.mrb[7].mxu0  ;;  %v3081_v11 = vand.u32 2147483647, %v7586_v5  ;;  %v7610_v27 = vadd.f32 %v2935_v63, %v2289_v12 }
 0x624   : > { %v3082_v21 = vand.u32 2147483647, %v7592_v8  ;;  %v7614_v30 = vadd.f32 %v2937_v61, %v2293_v3 }
 0x625   : > { %v3095_v26 = vsub.f32 0.0, %v3081_v11  ;;  %v3088_v36 = vand.u32 2147483647, %v7610_v27 }
 0x626   : > { %v3096_v34 = vsub.f32 0.0, %v3082_v21  ;;  %v3089_v42 = vand.u32 2147483647, %v7614_v30 }
 0x627   : > { %v3109_v35 = vmul.f32 1.442695, %v3095_v26  ;;  %v3102_v44 = vsub.f32 0.0, %v3088_v36 }
 0x628   : > { %v3111_v41 = vmul.f32 1.442695, %v3096_v34  ;;  %v3103_v46 = vsub.f32 0.0, %v3089_v42 }
 0x629   : > { %v3123_v47 = vmul.f32 1.442695, %v3102_v44 }
 0x62a   : > { %v3125_v15 = vmul.f32 1.442695, %v3103_v46 }
 0x660   : > { %v7590_v7 = vpop.f32.mrb[20].mxu1  ;;  %v4052_v38 = vpop.f32.mrb[8].mxu0 }
 0x661   : > { %v7594_v9 = vadd.f32 %v4052_v38, %v3410_v4  ;;  %v7596_v10 = vpop.f32.mrb[21].mxu1  ;;  %v4054_v13 = vpop.f32.mrb[9].mxu0 }
 0x662   : > { %v7599_v14 = vadd.f32 %v4054_v13, %v3414_v6  ;;  %v7601_v17 = vpop.f32.mrb[22].mxu1  ;;  %v4056_v18 = vpop.f32.mrb[10].mxu0 }
 0x663   : > { %v4202_v20 = vand.u32 2147483647, %v7594_v9  ;;  %v7606_v23 = vadd.f32 %v4056_v18, %v3410_v4  ;;  %v7608_v24 = vpop.f32.mrb[23].mxu1  ;;  %v4058_v25 = vpop.f32.mrb[11].mxu0 }
 0x664   : > { %v4203_v19 = vand.u32 2147483647, %v7599_v14  ;;  %v7612_v29 = vadd.f32 %v4058_v25, %v3414_v6 }
 0x665   : > { %v4216_v22 = vsub.f32 0.0, %v4202_v20  ;;  %v4209_v33 = vand.u32 2147483647, %v7606_v23 }
 0x666   : > { %v4217_v28 = vsub.f32 0.0, %v4203_v19  ;;  %v4210_v37 = vand.u32 2147483647, %v7612_v29 }
 0x667   : > { %v4230_v31 = vmul.f32 1.442695, %v4216_v22  ;;  %v4223_v39 = vsub.f32 0.0, %v4209_v33 }
 0x668   : > { %v4232_v32 = vmul.f32 1.442695, %v4217_v28  ;;  %v4224_v40 = vsub.f32 0.0, %v4210_v37 }
 0x669   : > { %5879 = vpow2.f32 %v4230_v31  ;;  %v4244_v43 = vmul.f32 1.442695, %v4223_v39  ;;  %v4188_v31 = vmax.f32 %v7594_v9, 0.0  ;;  %v4189_v9 = vmax.f32 %v7599_v14, 0.0 }
 0x66a   : > { %5881 = vpow2.f32 %v4232_v32  ;;  %v4246_v45 = vmul.f32 1.442695, %v4224_v40 }
 0x66b   : > { %5883 = vpow2.f32 %v3109_v35  ;;  %v2304_v35 = vsub.s32 4, %v6686_v16 }
 0x66c   : > { %5885 = vpow2.f32 %v4244_v43 }
 0x66d   : > { %5887 = vpow2.f32 %v3111_v41 }
 0x66e   : > { %5889 = vpow2.f32 %v4246_v45 }
 0x66f   : > { %5891 = vpow2.f32 %v3123_v47 }
 0x673   : > { %v5880_v48 = vpop.eup %5879 }
 0x674   : > { %v4258_v49 = vadd.f32 1.0, %v5880_v48  ;;  %v5882_v50 = vpop.eup %5881  ;;  %v4261_v54 = vmul.f32 -0.5, %v5880_v48  ;;  %v4264_v3 = vand.u32 2147483647, %v5880_v48 }
 0x675   : > { %v7620_v51 = vpop.eup %5883  ;;  %v4267_v52 = vadd.f32 1.0, %v5882_v50  ;;  %v4270_v63 = vmul.f32 -0.5, %v5882_v50  ;;  %v4273_v22 = vand.u32 2147483647, %v5882_v50 }
 0x676   : > { %5893 = vlog2.f32 %v4258_v49  ;;  %v7622_v53 = vpop.eup %5885  ;;  %v3137_v57 = vadd.f32 1.0, %v7620_v51  ;;  %v4262_v12 = vadd.f32 1.0, %v4261_v54  ;;  %vm4265_vm3 = vcmp.lt.f32.partialorder %v4264_v3, 0.0004427343 }
 0x677   : > { %5895 = vpow2.f32 %v3125_v15  ;;  %v7624_v55 = vpop.eup %5887  ;;  %v4321_v60 = vadd.f32 1.0, %v7622_v53  ;;  %v4271_v11 = vadd.f32 1.0, %v4270_v63  ;;  %v4324_v18 = vmul.f32 -0.5, %v7622_v53 }
 0x678   : > { %5897 = vlog2.f32 %v4267_v52  ;;  %v7626_v56 = vpop.eup %5889  ;;  %v3146_v61 = vadd.f32 1.0, %v7624_v55  ;;  %v4263_v21 = vmul.f32 %v5880_v48, %v4262_v12  ;;  %vm4274_vm4 = vcmp.lt.f32.partialorder %v4273_v22, 0.0004427343 }
 0x679   : > { %5899 = vlog2.f32 %v4321_v60  ;;  %v4330_v4 = vadd.f32 1.0, %v7626_v56  ;;  %v7632_v6 = vpop.eup %5891  ;;  %v4333_v37 = vmul.f32 -0.5, %v7626_v56  ;;  %v4272_v42 = vmul.f32 %v5882_v50, %v4271_v11 }
 0x67a   : > { %5901 = vlog2.f32 %v3137_v57  ;;  %v3200_v28 = vadd.f32 1.0, %v7632_v6  ;;  %v4325_v43 = vadd.f32 1.0, %v4324_v18  ;;  %v4327_v45 = vand.u32 2147483647, %v7622_v53 }
 0x67b   : > { %5903 = vlog2.f32 %v4330_v4  ;;  %v3140_v46 = vmul.f32 -0.5, %v7620_v51  ;;  %v3149_v49 = vmul.f32 -0.5, %v7624_v55  ;;  %v2308_v52 = vsub.s32 5, %v6686_v16 }
 0x67c   : > { %5905 = vlog2.f32 %v3146_v61  ;;  %v4334_v54 = vadd.f32 1.0, %v4333_v37  ;;  %v4326_v14 = vmul.f32 %v7622_v53, %v4325_v43  ;;  %v4336_v60 = vand.u32 2147483647, %v7626_v56  ;;  %v4434_v37 = vld [vmem:[%s7667_s24 + $0x40] sm:$0xff] }
 0x67d   : > { %5907 = vlog2.f32 %v3200_v28  ;;  %v4195_v12 = vmax.f32 %v7606_v23, 0.0  ;;  %vm4328_vm5 = vcmp.lt.f32.partialorder %v4327_v45, 0.0004427343  ;;  %v3141_v4 = vadd.f32 1.0, %v3140_v46 }
 0x67e   : > { %v2309_v23 = vrot.slane %v7573_v1, %v2308_v52  ;;  %v4196_v22 = vmax.f32 %v7612_v29, 0.0  ;;  %vm4337_vm6 = vcmp.lt.f32.partialorder %v4336_v60, 0.0004427343  ;;  %v3203_v28 = vmul.f32 -0.5, %v7632_v6 }
 0x680   : > { %v5180_v38 = vpop.f32.mrb[24].mxu1  ;;  %v5894_v13 = vpop.eup %5893  ;;  %v7682_v43 = vadd.f32 %v7564_v62, %v2309_v23  ;;  %v3204_v46 = vadd.f32 1.0, %v3203_v28  ;;  %v3206_v62 = vand.u32 2147483647, %v7632_v6 }
 0x681   : > { %v5181_v20 = vpop.f32.mrb[25].mxu1  ;;  %v4260_v19 = vmul.f32 0.6931472, %v5894_v13  ;;  %v7635_v26 = vpop.eup %5895  ;;  %v2305_v13 = vrot.slane %v7573_v1, %v2304_v35 }
 0x682   : > { %v5183_v25 = vpop.f32.mrb[26].mxu1  ;;  %v7639_v32 = vadd.f32 %v5181_v20, %v5180_v38  ;;  %v5898_v33 = vpop.eup %5897  ;;  %v3209_v44 = vadd.f32 1.0, %v7635_v26  ;;  %v3143_v38 = vand.u32 2147483647, %v7620_v51  ;;  %v3086_v60 = vand.u32 2147483647, %v7682_v43 }
 0x683   : > { %v5184_v34 = vpop.f32.mrb[27].mxu1  ;;  %v4266_v36 = vsel %vm4265_vm3, %v4263_v21, %v4260_v19  ;;  %v4269_v41 = vmul.f32 0.6931472, %v5898_v33  ;;  %v5900_v15 = vpop.eup %5899  ;;  %v4335_v19 = vmul.f32 %v7626_v56, %v4334_v54  ;;  %v3142_v56 = vmul.f32 %v7620_v51, %v3141_v4 }
 0x684   : > { %v7643_v39 = vadd.f32 %v5184_v34, %v5183_v25  ;;  %v4384_v40 = vadd.f32 %v4266_v36, %v4188_v31  ;;  %v4323_v57 = vmul.f32 0.6931472, %v5900_v15  ;;  %v5902_v63 = vpop.eup %5901  ;;  %v3150_v25 = vadd.f32 1.0, %v3149_v49 }
 0x685   : > { %v4275_v48 = vsel %vm4274_vm4, %v4272_v42, %v4269_v41  ;;  %v5904_v3 = vpop.eup %5903  ;;  %v3139_v21 = vmul.f32 0.6931472, %v5902_v63  ;;  %v7672_v33 = vadd.f32 %v7562_v59, %v2305_v13  ;;  %v3152_v36 = vand.u32 2147483647, %v7624_v55  ;;  %v4426_v59 = vld [vmem:[%s7667_s24] sm:$0xff] }
 0x686   : > { %v4398_v47 = vmul.f32 1.442695, %v4384_v40  ;;  %v4385_v50 = vadd.f32 %v4275_v48, %v4189_v9  ;;  %v4329_v11 = vsel %vm4328_vm5, %v4326_v14, %v4323_v57  ;;  %v5906_v18 = vpop.eup %5905  ;;  %v4332_v20 = vmul.f32 0.6931472, %v5904_v3  ;;  %v4427_v14 = vld [vmem:[%s7667_s24 + $0x8] sm:$0xff] }
 0x687   : > { %v4391_v53 = vadd.f32 %v4329_v11, %v4195_v12  ;;  %vm7675_vm7 = vcmp.lt.f32.partialorder %v3143_v38, 0.0004427343  ;;  %v3148_v40 = vmul.f32 0.6931472, %v5906_v18  ;;  %v5908_v41 = vpop.eup %5907  ;;  %v3212_v51 = vmul.f32 -0.5, %v7635_v26 }
 0x688   : > { %5909 = vpow2.f32 %v4398_v47  ;;  %v4400_v61 = vmul.f32 1.442695, %v4385_v50  ;;  %v4338_v34 = vsel %vm4337_vm6, %v4335_v19, %v4332_v20  ;;  %v3145_v42 = vsel %vm7675_vm7, %v3142_v56, %v3139_v21 }
 0x689   : > { %5911 = vlog2.f32 %v3209_v44  ;;  %v4412_v31 = vmul.f32 1.442695, %v4391_v53  ;;  %v4392_v29 = vadd.f32 %v4338_v34, %v4196_v22  ;;  %v3067_v9 = vmax.f32 %v7586_v5, 0.0 }
 0x68a   : > { %5913 = vpow2.f32 %v4400_v61  ;;  %v3151_v45 = vmul.f32 %v7624_v55, %v3150_v25  ;;  %v3085_v48 = vand.u32 2147483647, %v7672_v33  ;;  %vm7689_vm8 = vcmp.lt.f32.partialorder %v3152_v36, 0.0004427343 }
 0x68b   : > { %5915 = vpow2.f32 %v4412_v31  ;;  %v4414_v44 = vmul.f32 1.442695, %v4392_v29  ;;  %v3263_v50 = vadd.f32 %v3145_v42, %v3067_v9  ;;  %v3202_v57 = vmul.f32 0.6931472, %v5908_v41 }
 0x68c   : > { %v3154_v54 = vsel %vm7689_vm8, %v3151_v45, %v3148_v40  ;;  %v3068_v55 = vmax.f32 %v7592_v8, 0.0  ;;  %v7700_v63 = vadd.f32 %v7566_v58, %v2305_v13  ;;  %v3213_v61 = vadd.f32 1.0, %v3212_v51 }
 0x68d   : > { %5917 = vpow2.f32 %v4414_v44  ;;  %v3205_v3 = vmul.f32 %v7632_v6, %v3204_v46  ;;  %v3215_v4 = vand.u32 2147483647, %v7635_v26  ;;  %v7705_v38 = vadd.f32 %v7568_v0, %v2309_v23  ;;  %v4433_v6 = vld [vmem:[%s7667_s24 + $0x38] sm:$0xff] }
 0x68e   : > { %v3264_v18 = vadd.f32 %v3154_v54, %v3068_v55  ;;  %vm7707_vm9 = vcmp.lt.f32.partialorder %v3206_v62, 0.0004427343  ;;  %v3099_v19 = vsub.f32 0.0, %v3085_v48  ;;  %v3074_v21 = vmax.f32 %v7610_v27, 0.0 }
 0x68f   : > { %v3208_v58 = vsel %vm7707_vm9, %v3205_v3, %v3202_v57  ;;  %v3092_v0 = vand.u32 2147483647, %v7700_v63  ;;  %v3214_v23 = vmul.f32 %v7635_v26, %v3213_v61  ;;  %v3100_v28 = vsub.f32 0.0, %v3086_v60 }
 0x690   : > { %vm3216_vm10 = vcmp.lt.f32.partialorder %v3215_v4, 0.0004427343  ;;  %v3093_v31 = vand.u32 2147483647, %v7705_v38  ;;  %v3270_v34 = vadd.f32 %v3208_v58, %v3074_v21  ;;  %v3075_v40 = vmax.f32 %v7614_v30, 0.0 }
 0x691   : > { %v3117_v27 = vmul.f32 1.442695, %v3099_v19  ;;  %v3106_v42 = vsub.f32 0.0, %v3092_v0  ;;  %v3426_v9 = vrot.slane %v7580_v2, %v2304_v35  ;;  %v3119_v45 = vmul.f32 1.442695, %v3100_v28 }
 0x692   : > { %v5910_v47 = vpop.eup %5909  ;;  %v2296_v57 = vsub.s32 2, %v6686_v16 }
 0x693   : > { %v5912_v49 = vpop.eup %5911  ;;  %v4440_v5 = vmul.f32 %v5910_v47, %v4426_v59  ;;  %v3107_v59 = vsub.f32 0.0, %v3093_v31  ;;  %v3430_v47 = vrot.slane %v7580_v2, %v2308_v52  ;;  %v3131_v30 = vmul.f32 1.442695, %v3106_v42 }
 0x694   : > { %v5914_v12 = vpop.eup %5913  ;;  %v3211_v8 = vmul.f32 0.6931472, %v5912_v49  ;;  %v2300_v52 = vsub.s32 3, %v6686_v16 }
 0x695   : > { %v4454_v11 = vadd.f32 %v4440_v5, %v3263_v50  ;;  %v4441_v20 = vmul.f32 %v5914_v12, %v4427_v14  ;;  %v5916_v25 = vpop.eup %5915  ;;  %v3133_v62 = vmul.f32 1.442695, %v3107_v59 }
 0x696   : > { %v3217_v56 = vsel %vm3216_vm10, %v3214_v23, %v3211_v8  ;;  %v4447_v29 = vmul.f32 %v5916_v25, %v4433_v6  ;;  %v2297_v8 = vrot.slane %v7573_v1, %v2296_v57  ;;  %v2301_v21 = vrot.slane %v7573_v1, %v2300_v52 }
 0x697   : > { %v5123_v13 = vmul.f32 -1.442695, %v4454_v11  ;;  %v4455_v22 = vadd.f32 %v4441_v20, %v3264_v18  ;;  %v5918_v41 = vpop.eup %5917  ;;  %v3271_v26 = vadd.f32 %v3217_v56, %v3075_v40 }
 0x698   : > { %v4461_v51 = vadd.f32 %v4447_v29, %v3270_v34  ;;  %v4448_v44 = vmul.f32 %v5918_v41, %v4434_v37  ;;  %v7748_v28 = vadd.f32 %v7590_v7, %v2297_v8  ;;  %v7757_v29 = vadd.f32 %v7596_v10, %v2301_v21 }
 0x699   : > { %5919 = vpow2.f32 %v5123_v13  ;;  %v5124_v36 = vmul.f32 -1.442695, %v4455_v22  ;;  %v7760_v40 = vadd.f32 %v7601_v17, %v2297_v8 }
 0x69a   : > { %v5130_v46 = vmul.f32 -1.442695, %v4461_v51  ;;  %v4462_v48 = vadd.f32 %v4448_v44, %v3271_v26  ;;  %v3083_v41 = vand.u32 2147483647, %v7748_v28  ;;  %v3084_v17 = vand.u32 2147483647, %v7757_v29 }
 0x69b   : > { %5921 = vpow2.f32 %v5124_v36 }
 0x69c   : > { %5923 = vpow2.f32 %v5130_v46  ;;  %v5131_v49 = vmul.f32 -1.442695, %v4462_v48  ;;  %v3097_v46 = vsub.f32 0.0, %v3083_v41 }
 0x69d   : > { %5925 = vpow2.f32 %v3117_v27  ;;  %v7766_v27 = vadd.f32 %v7608_v24, %v2301_v21  ;;  %v3090_v24 = vand.u32 2147483647, %v7760_v40 }
 0x69e   : > { %5927 = vpow2.f32 %v3119_v45 }
 0x69f   : > { %5929 = vpow2.f32 %v5131_v49  ;;  %v3104_v49 = vsub.f32 0.0, %v3090_v24 }
 0x6a0   : > { %5931 = vpow2.f32 %v3131_v30 }
 0x6a1   : > { %v4138_v15 = vpop.f32.mrb[12].mxu0  ;;  %5933 = vpow2.f32 %v3133_v62 }
 0x6a2   : > { %v7726_v50 = vadd.f32 %v4138_v15, %v3426_v9  ;;  %v4140_v54 = vpop.f32.mrb[13].mxu0  ;;  %v3098_v15 = vsub.f32 0.0, %v3084_v17  ;;  %v3422_v17 = vrot.slane %v7580_v2, %v2300_v52 }
 0x6a3   : > { %v7729_v35 = vadd.f32 %v4140_v54, %v3430_v47  ;;  %v4142_v5 = vpop.f32.mrb[14].mxu0  ;;  %v5920_v14 = vpop.eup %5919 }
 0x6a4   : > { %v4206_v55 = vand.u32 2147483647, %v7726_v50  ;;  %v7733_v60 = vadd.f32 %v4142_v5, %v3426_v9  ;;  %v4144_v61 = vpop.f32.mrb[15].mxu0  ;;  %v4510_v12 = vadd.f32 1.0, %v5920_v14  ;;  %v2312_v9 = vsub.s32 6, %v6686_v16 }
 0x6a5   : > { %v4207_v3 = vand.u32 2147483647, %v7729_v35  ;;  %v7736_v4 = vadd.f32 %v4144_v61, %v3430_v47  ;;  %v5922_v53 = vpop.eup %5921  ;;  %v3091_v47 = vand.u32 2147483647, %v7766_v27 }
 0x6a6   : > { %v4220_v11 = vsub.f32 0.0, %v4206_v55  ;;  %v4213_v18 = vand.u32 2147483647, %v7733_v60  ;;  %5935 = vrcp.f32 %v4510_v12  ;;  %v4511_v19 = vadd.f32 1.0, %v5922_v53  ;;  %v5924_v25 = vpop.eup %5923 }
 0x6a7   : > { %v4221_v20 = vsub.f32 0.0, %v4207_v3  ;;  %v4214_v6 = vand.u32 2147483647, %v7736_v4  ;;  %v7752_v31 = vpop.eup %5925  ;;  %v4517_v34 = vadd.f32 1.0, %v5924_v25  ;;  %v7789_v54 = vrot.slane %v7573_v1, %v2312_v9 }
 0x6a8   : > { %v4238_v58 = vmul.f32 1.442695, %v4220_v11  ;;  %v4227_v13 = vsub.f32 0.0, %v4213_v18  ;;  %5937 = vrcp.f32 %v4511_v19  ;;  %v7754_v36 = vpop.eup %5927  ;;  %v3173_v10 = vadd.f32 1.0, %v7752_v31 }
 0x6a9   : > { %v4240_v0 = vmul.f32 1.442695, %v4221_v20  ;;  %v4228_v22 = vsub.f32 0.0, %v4214_v6  ;;  %v5930_v37 = vpop.eup %5929  ;;  %v3182_v59 = vadd.f32 1.0, %v7754_v36  ;;  %v3113_v55 = vmul.f32 1.442695, %v3097_v46 }
 0x6aa   : > { %v4252_v23 = vmul.f32 1.442695, %v4227_v13  ;;  %5939 = vpow2.f32 %v4238_v58  ;;  %v7762_v7 = vpop.eup %5931  ;;  %v4518_v42 = vadd.f32 1.0, %v5930_v37  ;;  %v3105_v61 = vsub.f32 0.0, %v3091_v47 }
 0x6ab   : > { %5941 = vpow2.f32 %v4240_v0  ;;  %v4254_v56 = vmul.f32 1.442695, %v4228_v22  ;;  %v7768_v51 = vpop.eup %5933  ;;  %v3236_v44 = vadd.f32 1.0, %v7762_v7  ;;  %v3071_v11 = vmax.f32 %v7672_v33, 0.0 }
 0x6ac   : > { %5943 = vpow2.f32 %v4252_v23  ;;  %v3245_v45 = vadd.f32 1.0, %v7768_v51  ;;  %v3072_v18 = vmax.f32 %v7682_v43, 0.0  ;;  %v7801_v8 = vmul.f32 -0.5, %v7752_v31 }
 0x6ad   : > { %5945 = vrcp.f32 %v4517_v34  ;;  %v3078_v20 = vmax.f32 %v7700_v63, 0.0  ;;  %v3115_v19 = vmul.f32 1.442695, %v3098_v15  ;;  %v3127_v58 = vmul.f32 1.442695, %v3104_v49 }
 0x6ae   : > { %5947 = vpow2.f32 %v4254_v56  ;;  %v3179_v0 = vand.u32 2147483647, %v7752_v31  ;;  %v3129_v23 = vmul.f32 1.442695, %v3105_v61  ;;  %v7810_v25 = vmul.f32 -0.5, %v7754_v36 }
 0x6af   : > { %5949 = vrcp.f32 %v4518_v42  ;;  %v3418_v42 = vrot.slane %v7580_v2, %v2296_v57  ;;  %v7829_v24 = vmul.f32 -0.5, %v7762_v7  ;;  %v4193_v47 = vmax.f32 %v7729_v35, 0.0 }
 0x6b0   : > { %v5936_v26 = vpop.eup %5935  ;;  %5951 = vlog2.f32 %v3173_v10  ;;  %vm7895_vm15 = vcmp.lt.f32.partialorder %v3179_v0, 0.0004427343  ;;  %v3434_v0 = vrot.slane %v7580_v2, %v2312_v9 }
 0x6b1   : > { %4552 = vst [vmem:[%s7774_s29] sm:$0xff] %v5936_v26  ;;  %5953 = vlog2.f32 %v3182_v59 }
 0x6b2   : > { %v5938_v48 = vpop.eup %5937  ;;  %5955 = vlog2.f32 %v3236_v44 }
 0x6b3   : > { %4553 = vst [vmem:[%s7774_s29 + $0x8] sm:$0xff] %v5938_v48  ;;  %5957 = vlog2.f32 %v3245_v45  ;;  %v4192_v45 = vmax.f32 %v7726_v50, 0.0  ;;  %v4199_v48 = vmax.f32 %v7733_v60, 0.0  ;;  %v4200_v50 = vmax.f32 %v7736_v4, 0.0 }
 0x6b4   : > { %v7781_v30 = vpop.eup %5939 }
 0x6b5   : > { %v7784_v62 = vpop.eup %5941  ;;  %v4294_v5 = vadd.f32 1.0, %v7781_v30  ;;  %v4297_v13 = vmul.f32 -0.5, %v7781_v30  ;;  %v4300_v37 = vand.u32 2147483647, %v7781_v30 }
 0x6b6   : > { %v7792_v14 = vpop.eup %5943  ;;  %v4303_v12 = vadd.f32 1.0, %v7784_v62  ;;  %v4306_v22 = vmul.f32 -0.5, %v7784_v62  ;;  %v4309_v41 = vand.u32 2147483647, %v7784_v62 }
 0x6b7   : > { %v5946_v3 = vpop.eup %5945  ;;  %5959 = vlog2.f32 %v4294_v5  ;;  %v4357_v53 = vadd.f32 1.0, %v7792_v14  ;;  %v4360_v34 = vmul.f32 -0.5, %v7792_v14  ;;  %v4298_v26 = vadd.f32 1.0, %v4297_v13 }
 0x6b8   : > { %v7798_v1 = vpop.eup %5947  ;;  %4559 = vst [vmem:[%s7774_s29 + $0x38] sm:$0xff] %v5946_v3  ;;  %5961 = vlog2.f32 %v4303_v12  ;;  %v4363_v59 = vand.u32 2147483647, %v7792_v14  ;;  %v4307_v46 = vadd.f32 1.0, %v4306_v22  ;;  %vm7838_vm11 = vcmp.lt.f32.partialorder %v4300_v37, 0.0004427343 }
 0x6b9   : > { %5963 = vlog2.f32 %v4357_v53  ;;  %v4366_v6 = vadd.f32 1.0, %v7798_v1  ;;  %v5950_v21 = vpop.eup %5949  ;;  %v4369_v56 = vmul.f32 -0.5, %v7798_v1  ;;  %v4361_v15 = vadd.f32 1.0, %v4360_v34 }
 0x6ba   : > { %5965 = vpow2.f32 %v3113_v55  ;;  %4560 = vst [vmem:[%s7774_s29 + $0x40] sm:$0xff] %v5950_v21  ;;  %v7820_v10 = vpop.eup %5951  ;;  %vm7842_vm12 = vcmp.lt.f32.partialorder %v4309_v41, 0.0004427343  ;;  %v4299_v60 = vmul.f32 %v7781_v30, %v4298_v26  ;;  %vm7850_vm13 = vcmp.lt.f32.partialorder %v4363_v59, 0.0004427343 }
 0x6bb   : > { %5967 = vlog2.f32 %v4366_v6  ;;  %v7826_v44 = vpop.eup %5953  ;;  %v4370_v49 = vadd.f32 1.0, %v4369_v56  ;;  %v4362_v37 = vmul.f32 %v7792_v14, %v4361_v15 }
 0x6bc   : > { %5969 = vpow2.f32 %v3115_v19  ;;  %v7832_v57 = vpop.eup %5955  ;;  %v4372_v19 = vand.u32 2147483647, %v7798_v1 }
 0x6bd   : > { %5971 = vpow2.f32 %v3127_v58  ;;  %v7836_v55 = vpop.eup %5957  ;;  %v4371_v41 = vmul.f32 %v7798_v1, %v4370_v49 }
 0x6be   : > { %5973 = vpow2.f32 %v3129_v23  ;;  %v4308_v23 = vmul.f32 %v7784_v62, %v4307_v46  ;;  %vm4373_vm14 = vcmp.lt.f32.partialorder %v4372_v19, 0.0004427343  ;;  %v3188_v19 = vand.u32 2147483647, %v7754_v36 }
 0x6c0   : > { %v4095_v5 = vpop.f32.mrb[28].mxu1  ;;  %vm7906_vm1 = vcmp.lt.f32.partialorder %v3188_v19, 0.0004427343 }
 0x6c1   : > { %v7847_v12 = vadd.f32 %v4095_v5, %v3418_v42  ;;  %v4097_v35 = vpop.f32.mrb[29].mxu1  ;;  %v5960_v3 = vpop.eup %5959 }
 0x6c2   : > { %v7855_v58 = vadd.f32 %v4097_v35, %v3422_v17  ;;  %v4099_v13 = vpop.f32.mrb[30].mxu1  ;;  %v5962_v6 = vpop.eup %5961  ;;  %v4296_v21 = vmul.f32 0.6931472, %v5960_v3 }
 0x6c3   : > { %v4204_v4 = vand.u32 2147483647, %v7847_v12  ;;  %v7859_v22 = vadd.f32 %v4099_v13, %v3418_v42  ;;  %v4101_v34 = vpop.f32.mrb[31].mxu1  ;;  %v5964_v56 = vpop.eup %5963  ;;  %v4305_v30 = vmul.f32 0.6931472, %v5962_v6 }
 0x6c4   : > { %v4205_v26 = vand.u32 2147483647, %v7855_v58  ;;  %v7864_v59 = vpop.eup %5965  ;;  %v4302_v5 = vsel %vm7838_vm11, %v4299_v60, %v4296_v21  ;;  %v4359_v35 = vmul.f32 0.6931472, %v5964_v56  ;;  %v7868_v46 = vadd.f32 %v4101_v34, %v3422_v17 }
 0x6c5   : > { %v4218_v62 = vsub.f32 0.0, %v4204_v4  ;;  %v5968_v42 = vpop.eup %5967  ;;  %v4388_v3 = vadd.f32 %v4302_v5, %v4192_v45  ;;  %v4311_v13 = vsel %vm7842_vm12, %v4308_v23, %v4305_v30  ;;  %v4211_v14 = vand.u32 2147483647, %v7859_v22 }
 0x6c6   : > { %v4219_v6 = vsub.f32 0.0, %v4205_v26  ;;  %v7873_v1 = vpop.eup %5969  ;;  %v4389_v15 = vadd.f32 %v4311_v13, %v4193_v47  ;;  %v4365_v49 = vsel %vm7850_vm13, %v4362_v37, %v4359_v35  ;;  %v4368_v52 = vmul.f32 0.6931472, %v5968_v42 }
 0x6c7   : > { %v4234_v60 = vmul.f32 1.442695, %v4218_v62  ;;  %v7877_v21 = vpop.eup %5971  ;;  %v4406_v17 = vmul.f32 1.442695, %v4388_v3  ;;  %v4395_v4 = vadd.f32 %v4365_v49, %v4199_v48  ;;  %v4225_v45 = vsub.f32 0.0, %v4211_v14 }
 0x6c8   : > { %v7879_v34 = vpop.eup %5973  ;;  %v4408_v61 = vmul.f32 1.442695, %v4389_v15  ;;  %v4374_v23 = vsel %vm4373_vm14, %v4371_v41, %v4368_v52  ;;  %v4236_v56 = vmul.f32 1.442695, %v4219_v6  ;;  %v3248_v30 = vmul.f32 -0.5, %v7768_v51 }
 0x6c9   : > { %5975 = vpow2.f32 %v4234_v60  ;;  %v4420_v47 = vmul.f32 1.442695, %v4395_v4  ;;  %v4396_v53 = vadd.f32 %v4374_v23, %v4200_v50  ;;  %v3177_v37 = vadd.f32 1.0, %v7801_v8 }
 0x6ca   : > { %5977 = vpow2.f32 %v4406_v17  ;;  %v4248_v26 = vmul.f32 1.442695, %v4225_v45  ;;  %v4212_v5 = vand.u32 2147483647, %v7868_v46  ;;  %v3186_v48 = vadd.f32 1.0, %v7810_v25 }
 0x6cb   : > { %5979 = vpow2.f32 %v4408_v61  ;;  %v4422_v35 = vmul.f32 1.442695, %v4396_v53  ;;  %v3240_v41 = vadd.f32 1.0, %v7829_v24  ;;  %v3242_v62 = vand.u32 2147483647, %v7762_v7  ;;  %v4431_v61 = vld [vmem:[%s7667_s24 + $0x28] sm:$0xff] }
 0x6cc   : > { %5981 = vpow2.f32 %v4420_v47  ;;  %v4226_v42 = vsub.f32 0.0, %v4212_v5  ;;  %v3175_v50 = vmul.f32 0.6931472, %v7820_v10  ;;  %v3249_v3 = vadd.f32 1.0, %v3248_v30  ;;  %v4437_v30 = vld [vmem:[%s7667_s24 + $0x58] sm:$0xff] }
 0x6cd   : > { %5983 = vpow2.f32 %v4236_v56  ;;  %v3251_v8 = vand.u32 2147483647, %v7768_v51  ;;  %v3184_v13 = vmul.f32 0.6931472, %v7826_v44  ;;  %v3238_v25 = vmul.f32 0.6931472, %v7832_v57 }
 0x6ce   : > { %5985 = vpow2.f32 %v4422_v35  ;;  %v4250_v6 = vmul.f32 1.442695, %v4226_v42  ;;  %v3178_v14 = vmul.f32 %v7752_v31, %v3177_v37  ;;  %v3247_v10 = vmul.f32 0.6931472, %v7836_v55 }
 0x6cf   : > { %5987 = vpow2.f32 %v4248_v26  ;;  %v3155_v15 = vadd.f32 1.0, %v7864_v59  ;;  %v3187_v44 = vmul.f32 %v7754_v36, %v3186_v48  ;;  %v3241_v49 = vmul.f32 %v7762_v7, %v3240_v41  ;;  %v4430_v36 = vld [vmem:[%s7667_s24 + $0x20] sm:$0xff] }
 0x6d0   : > { %v3164_v57 = vadd.f32 1.0, %v7873_v1  ;;  %5989 = vpow2.f32 %v4250_v6  ;;  %v3181_v31 = vsel %vm7895_vm15, %v3178_v14, %v3175_v50  ;;  %vm7910_vm2 = vcmp.lt.f32.partialorder %v3242_v62, 0.0004427343  ;;  %v4438_v62 = vld [vmem:[%s7667_s24 + $0x60] sm:$0xff] }
 0x6d1   : > { %v3250_v52 = vmul.f32 %v7768_v51, %v3249_v3  ;;  %v3190_v7 = vsel %vm7906_vm1, %v3187_v44, %v3184_v13  ;;  %v3244_v17 = vsel %vm7910_vm2, %v3241_v49, %v3238_v25  ;;  %vm7922_vm3 = vcmp.lt.f32.partialorder %v3251_v8, 0.0004427343 }
 0x6d2   : > { %v3218_v45 = vadd.f32 1.0, %v7877_v21  ;;  %5991 = vlog2.f32 %v3155_v15  ;;  %v3227_v56 = vadd.f32 1.0, %v7879_v34  ;;  %v3267_v37 = vadd.f32 %v3181_v31, %v3071_v11 }
 0x6d3   : > { %v7916_v60 = vpop.eup %5975  ;;  %v3253_v51 = vsel %vm7922_vm3, %v3250_v52, %v3247_v10  ;;  %v3079_v26 = vmax.f32 %v7705_v38, 0.0  ;;  %5993 = vlog2.f32 %v3164_v57  ;;  %v3268_v19 = vadd.f32 %v3190_v7, %v3072_v18 }
 0x6d4   : > { %v5978_v23 = vpop.eup %5977  ;;  %v4276_v47 = vadd.f32 1.0, %v7916_v60  ;;  %v3274_v35 = vadd.f32 %v3244_v17, %v3078_v20  ;;  %v3158_v38 = vmul.f32 -0.5, %v7864_v59  ;;  %v4279_v25 = vmul.f32 -0.5, %v7916_v60 }
 0x6d5   : > { %v5980_v53 = vpop.eup %5979  ;;  %v4444_v5 = vmul.f32 %v5978_v23, %v4430_v36  ;;  %v3275_v50 = vadd.f32 %v3253_v51, %v3079_v26  ;;  %v3167_v6 = vmul.f32 -0.5, %v7873_v1  ;;  %v7954_v15 = vadd.f32 %v7639_v32, %v7789_v54 }
 0x6d6   : > { %v5982_v48 = vpop.eup %5981  ;;  %v4445_v41 = vmul.f32 %v5980_v53, %v4431_v61  ;;  %5995 = vlog2.f32 %v4276_v47  ;;  %v7958_v57 = vadd.f32 %v7643_v39, %v7789_v54  ;;  %v4280_v52 = vadd.f32 1.0, %v4279_v25 }
 0x6d7   : > { %v7941_v42 = vpop.eup %5983  ;;  %5997 = vlog2.f32 %v3218_v45  ;;  %v4458_v33 = vadd.f32 %v4444_v5, %v3267_v37  ;;  %v4451_v11 = vmul.f32 %v5982_v48, %v4437_v30  ;;  %v3161_v7 = vand.u32 2147483647, %v7864_v59 }
 0x6d8   : > { %v5986_v3 = vpop.eup %5985  ;;  %5999 = vlog2.f32 %v3227_v56  ;;  %v4459_v8 = vadd.f32 %v4445_v41, %v3268_v19  ;;  %v4285_v43 = vadd.f32 1.0, %v7941_v42  ;;  %v4288_v31 = vmul.f32 -0.5, %v7941_v42 }
 0x6d9   : > { %v7945_v18 = vpop.eup %5987  ;;  %v5127_v63 = vmul.f32 -1.442695, %v4458_v33  ;;  %v4465_v20 = vadd.f32 %v4451_v11, %v3274_v35  ;;  %v4452_v13 = vmul.f32 %v5986_v3, %v4438_v62  ;;  %v4282_v17 = vand.u32 2147483647, %v7916_v60 }
 0x6da   : > { %v5128_v14 = vmul.f32 -1.442695, %v4459_v8  ;;  %6001 = vlog2.f32 %v4285_v43  ;;  %v4339_v24 = vadd.f32 1.0, %v7945_v18  ;;  %v7950_v10 = vpop.eup %5989  ;;  %v4342_v39 = vmul.f32 -0.5, %v7945_v18 }
 0x6db   : > { %6003 = vpow2.f32 %v5127_v63  ;;  %v5134_v44 = vmul.f32 -1.442695, %v4465_v20  ;;  %v4466_v49 = vadd.f32 %v4452_v13, %v3275_v50  ;;  %v4348_v32 = vadd.f32 1.0, %v7950_v10 }
 0x6dc   : > { %6005 = vpow2.f32 %v5128_v14  ;;  %v7965_v36 = vpop.eup %5991  ;;  %v7972_v4 = vadd.f32 1.0, %v3158_v38  ;;  %v7974_v16 = vadd.f32 1.0, %v3167_v6  ;;  %v3087_v2 = vand.u32 2147483647, %v7954_v15 }
 0x6dd   : > { %6007 = vpow2.f32 %v5134_v44  ;;  %v5135_v55 = vmul.f32 -1.442695, %v4466_v49  ;;  %v7970_v54 = vpop.eup %5993  ;;  %v3094_v45 = vand.u32 2147483647, %v7958_v57  ;;  %v4289_v61 = vadd.f32 1.0, %v4288_v31 }
 0x6de   : > { %6009 = vlog2.f32 %v4339_v24  ;;  %v4291_v23 = vand.u32 2147483647, %v7941_v42  ;;  %v4281_v47 = vmul.f32 %v7916_v60, %v4280_v52  ;;  %v4345_v53 = vand.u32 2147483647, %v7945_v18 }
 0x6df   : > { %6011 = vpow2.f32 %v5135_v55  ;;  %v4351_v37 = vmul.f32 -0.5, %v7950_v10  ;;  %v4190_v48 = vmax.f32 %v7847_v12, 0.0  ;;  %vm4283_vm4 = vcmp.lt.f32.partialorder %v4282_v17, 0.0004427343 }
 0x6e0   : > { %v5996_v9 = vpop.eup %5995  ;;  %6013 = vlog2.f32 %v4348_v32  ;;  %v5202_v51 = vpop.f32.mrb[32].mxu1  ;;  %v4343_v19 = vadd.f32 1.0, %v4342_v39  ;;  %v3101_v62 = vsub.f32 0.0, %v3087_v2  ;;  %v4191_v33 = vmax.f32 %v7855_v58, 0.0 }
 0x6e1   : > { %v7979_v56 = vpop.eup %5997  ;;  %v4278_v30 = vmul.f32 0.6931472, %v5996_v9  ;;  %v5203_v26 = vpop.f32.mrb[33].mxu1  ;;  %v4197_v11 = vmax.f32 %v7859_v22, 0.0  ;;  %vm7989_vm5 = vcmp.lt.f32.partialorder %v4291_v23, 0.0004427343  ;;  %v4290_v13 = vmul.f32 %v7941_v42, %v4289_v61 }
 0x6e2   : > { %v7984_v5 = vpop.eup %5999  ;;  %v5204_v35 = vadd.f32 %v5203_v26, %v5202_v51  ;;  %v5205_v41 = vpop.f32.mrb[34].mxu1  ;;  %vm7996_vm6 = vcmp.lt.f32.partialorder %v4345_v53, 0.0004427343  ;;  %v4352_v58 = vadd.f32 1.0, %v4351_v37  ;;  %v4344_v14 = vmul.f32 %v7945_v18, %v4343_v19 }
 0x6e3   : > { %v4284_v50 = vsel %vm4283_vm4, %v4281_v47, %v4278_v30  ;;  %v5206_v60 = vpop.f32.mrb[35].mxu1  ;;  %v4354_v24 = vand.u32 2147483647, %v7950_v10  ;;  %v4198_v19 = vmax.f32 %v7868_v46, 0.0  ;;  %v3121_v8 = vmul.f32 1.442695, %v3101_v62 }
 0x6e4   : > { %v6002_v3 = vpop.eup %6001  ;;  %v4386_v38 = vadd.f32 %v4284_v50, %v4190_v48  ;;  %v7993_v43 = vadd.f32 %v5204_v35, %v3434_v0  ;;  %v5207_v12 = vadd.f32 %v5206_v60, %v5205_v41  ;;  %v4353_v61 = vmul.f32 %v7950_v10, %v4352_v58 }
 0x6e5   : > { %v6004_v63 = vpop.eup %6003  ;;  %v4287_v20 = vmul.f32 0.6931472, %v6002_v3  ;;  %vm4355_vm7 = vcmp.lt.f32.partialorder %v4354_v24, 0.0004427343  ;;  %v3108_v10 = vsub.f32 0.0, %v3094_v45  ;;  %v3221_v50 = vmul.f32 -0.5, %v7877_v21 }
 0x6e6   : > { %v6006_v22 = vpop.eup %6005  ;;  %v4514_v6 = vadd.f32 1.0, %v6004_v63  ;;  %v4208_v44 = vand.u32 2147483647, %v7993_v43  ;;  %v4402_v55 = vmul.f32 1.442695, %v4386_v38  ;;  %v8005_v42 = vadd.f32 %v5207_v12, %v3434_v0 }
 0x6e7   : > { %v6008_v49 = vpop.eup %6007  ;;  %v4515_v31 = vadd.f32 1.0, %v6006_v22  ;;  %v4293_v52 = vsel %vm7989_vm5, %v4290_v13, %v4287_v20  ;;  %v3157_v3 = vmul.f32 0.6931472, %v7965_v36  ;;  %v3230_v38 = vmul.f32 -0.5, %v7879_v34 }
 0x6e8   : > { %v6010_v32 = vpop.eup %6009  ;;  %6015 = vrcp.f32 %v4514_v6  ;;  %v4521_v17 = vadd.f32 1.0, %v6008_v49  ;;  %v4387_v39 = vadd.f32 %v4293_v52, %v4191_v33  ;;  %v4222_v2 = vsub.f32 0.0, %v4208_v44 }
 0x6e9   : > { %v6012_v9 = vpop.eup %6011  ;;  %6017 = vrcp.f32 %v4515_v31  ;;  %v4341_v18 = vmul.f32 0.6931472, %v6010_v32  ;;  %v4215_v23 = vand.u32 2147483647, %v8005_v42  ;;  %v3170_v46 = vand.u32 2147483647, %v7873_v1 }
 0x6ea   : > { %v6014_v51 = vpop.eup %6013  ;;  %6019 = vrcp.f32 %v4521_v17  ;;  %v4522_v30 = vadd.f32 1.0, %v6012_v9  ;;  %v4404_v47 = vmul.f32 1.442695, %v4387_v39  ;;  %v4242_v53 = vmul.f32 1.442695, %v4222_v2 }
 0x6eb   : > { %6021 = vpow2.f32 %v4402_v55  ;;  %v4347_v0 = vsel %vm7996_vm6, %v4344_v14, %v4341_v18  ;;  %v4350_v37 = vmul.f32 0.6931472, %v6014_v51  ;;  %v4229_v26 = vsub.f32 0.0, %v4215_v23 }
 0x6ec   : > { %6023 = vrcp.f32 %v4522_v30  ;;  %v4393_v48 = vadd.f32 %v4347_v0, %v4197_v11  ;;  %v3160_v11 = vmul.f32 %v7864_v59, %v7972_v4  ;;  %v3166_v12 = vmul.f32 0.6931472, %v7970_v54  ;;  %v4428_v59 = vld [vmem:[%s7667_s24 + $0x10] sm:$0xff] }
 0x6ed   : > { %6025 = vpow2.f32 %v4404_v47  ;;  %v4356_v35 = vsel %vm4355_vm7, %v4353_v61, %v4350_v37  ;;  %v4256_v41 = vmul.f32 1.442695, %v4229_v26  ;;  %v3135_v63 = vmul.f32 1.442695, %v3108_v10  ;;  %v4436_v37 = vld [vmem:[%s7667_s24 + $0x50] sm:$0xff] }
 0x6ee   : > { %v4416_v33 = vmul.f32 1.442695, %v4393_v48  ;;  %v4394_v60 = vadd.f32 %v4356_v35, %v4198_v19  ;;  %6027 = vpow2.f32 %v4242_v53  ;;  %vm8023_vm8 = vcmp.lt.f32.partialorder %v3161_v7, 0.0004427343 }
 0x6ef   : > { %6029 = vpow2.f32 %v4256_v41  ;;  %v3169_v62 = vmul.f32 %v7873_v1, %v7974_v16  ;;  %v3222_v13 = vadd.f32 1.0, %v3221_v50  ;;  %v3163_v4 = vsel %vm8023_vm8, %v3160_v11, %v3157_v3 }
 0x6f0   : > { %6031 = vpow2.f32 %v4416_v33  ;;  %v4418_v45 = vmul.f32 1.442695, %v4394_v60  ;;  %v3224_v54 = vand.u32 2147483647, %v7877_v21  ;;  %v3231_v58 = vadd.f32 1.0, %v3230_v38 }
 0x6f1   : > { %v3069_v22 = vmax.f32 %v7748_v28, 0.0  ;;  %vm8035_vm9 = vcmp.lt.f32.partialorder %v3170_v46, 0.0004427343  ;;  %v3220_v1 = vmul.f32 0.6931472, %v7979_v56  ;;  %v3070_v14 = vmax.f32 %v7757_v29, 0.0 }
 0x6f2   : > { %v6016_v20 = vpop.eup %6015  ;;  %6033 = vpow2.f32 %v4418_v45  ;;  %v3172_v24 = vsel %vm8035_vm9, %v3169_v62, %v3166_v12  ;;  %v3233_v44 = vand.u32 2147483647, %v7879_v34  ;;  %v4429_v28 = vld [vmem:[%s7667_s24 + $0x18] sm:$0xff]  ;;  %v3223_v55 = vmul.f32 %v7877_v21, %v3222_v13  ;;  %v4435_v21 = vld [vmem:[%s7667_s24 + $0x48] sm:$0xff] }
 0x6f3   : > { %v6018_v25 = vpop.eup %6017  ;;  %6035 = vpow2.f32 %v3121_v8  ;;  %4556 = vst [vmem:[%s7774_s29 + $0x20] sm:$0xff] %v6016_v20  ;;  %v3265_v31 = vadd.f32 %v3163_v4, %v3069_v22  ;;  %v3229_v56 = vmul.f32 0.6931472, %v7984_v5  ;;  %vm8049_vm10 = vcmp.lt.f32.partialorder %v3224_v54, 0.0004427343 }
 0x6f4   : > { %v6020_v7 = vpop.eup %6019  ;;  %4557 = vst [vmem:[%s7774_s29 + $0x28] sm:$0xff] %v6018_v25  ;;  %6037 = vpow2.f32 %v3135_v63  ;;  %v3232_v29 = vmul.f32 %v7879_v34, %v3231_v58  ;;  %v3266_v2 = vadd.f32 %v3172_v24, %v3070_v14  ;;  %v3226_v9 = vsel %vm8049_vm10, %v3223_v55, %v3220_v1 }
 0x6f5   : > { %v6022_v16 = vpop.eup %6021  ;;  %4563 = vst [vmem:[%s7774_s29 + $0x58] sm:$0xff] %v6020_v7  ;;  %v3076_v5 = vmax.f32 %v7760_v40, 0.0  ;;  %vm8059_vm11 = vcmp.lt.f32.partialorder %v3233_v44, 0.0004427343  ;;  %v3077_v19 = vmax.f32 %v7766_v27, 0.0  ;;  %v4194_v7 = vmax.f32 %v7993_v43, 0.0 }
 0x6f6   : > { %v6024_v49 = vpop.eup %6023  ;;  %v4442_v52 = vmul.f32 %v6022_v16, %v4428_v59  ;;  %v3235_v34 = vsel %vm8059_vm11, %v3232_v29, %v3229_v56  ;;  %v4201_v1 = vmax.f32 %v8005_v42, 0.0 }
 0x6f7   : > { %v6026_v32 = vpop.eup %6025  ;;  %4564 = vst [vmem:[%s7774_s29 + $0x60] sm:$0xff] %v6024_v49  ;;  %v3272_v48 = vadd.f32 %v3226_v9, %v3076_v5  ;;  %v3273_v50 = vadd.f32 %v3235_v34, %v3077_v19 }
 0x6f8   : > { %v6028_v39 = vpop.eup %6027  ;;  %v4456_v18 = vadd.f32 %v4442_v52, %v3265_v31  ;;  %v4443_v61 = vmul.f32 %v6026_v32, %v4429_v28 }
 0x6f9   : > { %v6030_v23 = vpop.eup %6029  ;;  %v4312_v30 = vadd.f32 1.0, %v6028_v39  ;;  %v4315_v3 = vmul.f32 -0.5, %v6028_v39  ;;  %v4318_v20 = vand.u32 2147483647, %v6028_v39 }
 0x6fa   : > { %v6032_v47 = vpop.eup %6031  ;;  %v5125_v53 = vmul.f32 -1.442695, %v4456_v18  ;;  %v4457_v0 = vadd.f32 %v4443_v61, %v3266_v2  ;;  %v4375_v26 = vadd.f32 1.0, %v6030_v23  ;;  %v4378_v27 = vmul.f32 -0.5, %v6030_v23 }
 0x6fb   : > { %v4449_v10 = vmul.f32 %v6032_v47, %v4435_v21  ;;  %6039 = vlog2.f32 %v4312_v30  ;;  %v4316_v63 = vadd.f32 1.0, %v4315_v3  ;;  %v4381_v13 = vand.u32 2147483647, %v6030_v23 }
 0x6fc   : > { %v6034_v35 = vpop.eup %6033  ;;  %6041 = vpow2.f32 %v5125_v53  ;;  %v5126_v40 = vmul.f32 -1.442695, %v4457_v0  ;;  %v4379_v36 = vadd.f32 1.0, %v4378_v27  ;;  %vm4319_vm12 = vcmp.lt.f32.partialorder %v4318_v20, 0.0004427343  ;;  %v4432_v53 = vld [vmem:[%s7667_s24 + $0x30] sm:$0xff] }
 0x6fd   : > { %v8067_v41 = vpop.eup %6035  ;;  %v4463_v33 = vadd.f32 %v4449_v10, %v3272_v48  ;;  %v4450_v60 = vmul.f32 %v6034_v35, %v4436_v37  ;;  %6043 = vlog2.f32 %v4375_v26  ;;  %v4317_v54 = vmul.f32 %v6028_v39, %v4316_v63  ;;  %v4439_v48 = vld [vmem:[%s7667_s24 + $0x68] sm:$0xff]  ;;  %s6081_s24 = scalar_lea.vmem %s6080_s21, 3584 }
 0x6fe   : > { %6045 = vpow2.f32 %v5126_v40  ;;  %v8069_v38 = vpop.eup %6037  ;;  %v3191_v45 = vadd.f32 1.0, %v8067_v41  ;;  %v4380_v14 = vmul.f32 %v6030_v23, %v4379_v36  ;;  %vm4382_vm13 = vcmp.lt.f32.partialorder %v4381_v13, 0.0004427343  ;;  %p6083_p1 = scmp.lt.s32.totalorder %s6081_s24, %s6075_s25 }
 0x6ff   : > { %v5132_v8 = vmul.f32 -1.442695, %v4463_v33  ;;  %v4464_v46 = vadd.f32 %v4450_v60, %v3273_v50  ;;  %v3254_v12 = vadd.f32 1.0, %v8069_v38  ;;  %v3194_v31 = vmul.f32 -0.5, %v8067_v41 }
 0x700   : > { %v3257_v32 = vmul.f32 -0.5, %v8069_v38  ;;  %v3197_v9 = vand.u32 2147483647, %v8067_v41  ;;  %v3260_v21 = vand.u32 2147483647, %v8069_v38  ;;  %v3073_v0 = vmax.f32 %v7954_v15, 0.0  ;;  %p6084_p2 = por %p6083_p1, %p6082_p0 }
 0x701   : > { %6047 = vpow2.f32 %v5132_v8  ;;  %v5133_v11 = vmul.f32 -1.442695, %v4464_v46  ;;  %v3195_v39 = vadd.f32 1.0, %v3194_v31  ;;  %v3080_v35 = vmax.f32 %v7958_v57, 0.0 }
 0x702   : > { %v3258_v61 = vadd.f32 1.0, %v3257_v32  ;;  %vm3198_vm14 = vcmp.lt.f32.partialorder %v3197_v9, 0.0004427343  ;;  %vm3261_vm15 = vcmp.lt.f32.partialorder %v3260_v21, 0.0004427343  ;;  %p6085_p3 = pnand %p6084_p2, %p6078_p13 }
 0x703   : > { %6049 = vpow2.f32 %v5133_v11  ;;  %v3196_v5 = vmul.f32 %v8067_v41, %v3195_v39 }
 0x704   : > { %6051 = vlog2.f32 %v3191_v45  ;;  %v3259_v34 = vmul.f32 %v8069_v38, %v3258_v61 }
 0x705   : > { %v6040_v62 = vpop.eup %6039  ;;  %6053 = vlog2.f32 %v3254_v12 }
 0x706   : > { %v6042_v25 = vpop.eup %6041  ;;  %v4314_v4 = vmul.f32 0.6931472, %v6040_v62 }
 0x707   : > { %v6044_v58 = vpop.eup %6043  ;;  %v4512_v59 = vadd.f32 1.0, %v6042_v25 }
 0x708   : > { %v6046_v22 = vpop.eup %6045  ;;  %v4320_v6 = vsel %vm4319_vm12, %v4317_v54, %v4314_v4  ;;  %v4377_v16 = vmul.f32 0.6931472, %v6044_v58 }
 0x709   : > { %6055 = vrcp.f32 %v4512_v59  ;;  %v4513_v24 = vadd.f32 1.0, %v6046_v22  ;;  %v4390_v44 = vadd.f32 %v4320_v6, %v4194_v7 }
 0x70a   : > { %v4383_v28 = vsel %vm4382_vm13, %v4380_v14, %v4377_v16 }
 0x70b   : > { %v6048_v49 = vpop.eup %6047  ;;  %6057 = vrcp.f32 %v4513_v24  ;;  %v4410_v55 = vmul.f32 1.442695, %v4390_v44  ;;  %v4397_v56 = vadd.f32 %v4383_v28, %v4201_v1 }
 0x70c   : > { %v4519_v52 = vadd.f32 1.0, %v6048_v49 }
 0x70d   : > { %v6050_v43 = vpop.eup %6049  ;;  %6059 = vpow2.f32 %v4410_v55  ;;  %v4424_v17 = vmul.f32 1.442695, %v4397_v56 }
 0x70e   : > { %v6052_v42 = vpop.eup %6051  ;;  %6061 = vrcp.f32 %v4519_v52  ;;  %v4520_v29 = vadd.f32 1.0, %v6050_v43 }
 0x70f   : > { %6063 = vpow2.f32 %v4424_v17  ;;  %v6054_v2 = vpop.eup %6053  ;;  %v3193_v18 = vmul.f32 0.6931472, %v6052_v42 }
 0x710   : > { %6065 = vrcp.f32 %v4520_v29  ;;  %v3256_v51 = vmul.f32 0.6931472, %v6054_v2 }
 0x711   : > { %v3199_v47 = vsel %vm3198_vm14, %v3196_v5, %v3193_v18 }
 0x712   : > { %v3262_v26 = vsel %vm3261_vm15, %v3259_v34, %v3256_v51  ;;  %v3269_v10 = vadd.f32 %v3199_v47, %v3073_v0 }
 0x713   : > { %v6056_v23 = vpop.eup %6055  ;;  %v3276_v33 = vadd.f32 %v3262_v26, %v3080_v35 }
 0x714   : > { %4554 = vst [vmem:[%s7774_s29 + $0x10] sm:$0xff] %v6056_v23 }
 0x715   : > { %v6058_v30 = vpop.eup %6057 }
 0x716   : > { %4555 = vst [vmem:[%s7774_s29 + $0x18] sm:$0xff] %v6058_v30 }
 0x717   : > { %v6060_v37 = vpop.eup %6059 }
 0x718   : > { %v6062_v19 = vpop.eup %6061  ;;  %v4446_v40 = vmul.f32 %v6060_v37, %v4432_v53 }
 0x719   : > { %v6064_v41 = vpop.eup %6063  ;;  %4561 = vst [vmem:[%s7774_s29 + $0x48] sm:$0xff] %v6062_v19 }
 0x71a   : > { %v6066_v50 = vpop.eup %6065  ;;  %v4460_v60 = vadd.f32 %v4446_v40, %v3269_v10  ;;  %v4453_v3 = vmul.f32 %v6064_v41, %v4439_v48 }
 0x71b   : > { %4562 = vst [vmem:[%s7774_s29 + $0x50] sm:$0xff] %v6066_v50 }
 0x71c   : > { %v5129_v15 = vmul.f32 -1.442695, %v4460_v60  ;;  %v4467_v38 = vadd.f32 %v4453_v3, %v3276_v33 }
 0x71e   : > { %6067 = vpow2.f32 %v5129_v15  ;;  %v5136_v8 = vmul.f32 -1.442695, %v4467_v38 }
 0x720   : > { %6069 = vpow2.f32 %v5136_v8 }
 0x728   : > { %v6068_v46 = vpop.eup %6067 }
 0x729   : > { %v4516_v57 = vadd.f32 1.0, %v6068_v46 }
 0x72a   : > { %v6070_v45 = vpop.eup %6069 }
 0x72b   : > { %6071 = vrcp.f32 %v4516_v57  ;;  %v4523_v27 = vadd.f32 1.0, %v6070_v45 }
 0x72d   : > { %6073 = vrcp.f32 %v4523_v27 }
 0x735   : > { %v6072_v11 = vpop.eup %6071 }
 0x736   : > { %4558 = vst.msk [vmem:[%s7774_s29 + $0x30] sm:$0xff] %vm1231_vm0, %v6072_v11 }
 0x737   : > { %v6074_v12 = vpop.eup %6073 }
 0x738   : > { %4565 = vst.msk [vmem:[%s7774_s29 + $0x68] sm:$0xff] %vm1231_vm0, %v6074_v12 }
 0x739   : > { %6088 = shalt.err (!%p6085_p3)
}
 0x73a   : > { %s6089_s17 = scalar_lea.hbm %s8094_s15, 1792  ;;  %s6093_s19 = scalar_lea.hbm %s8220_s30, 7168 }
 0x73b   : > { %p6090_p4 = scmp.ne.s32.totalorder %s8094_s15, %s6089_s17  ;;  %p6094_p9 = scmp.lt.u32.totalorder %s8094_s15, %s8220_s30 }
 0x73c   : > { %p6095_p10 = scmp.lt.u32.totalorder %s6093_s19, %s6089_s17  ;;  %p6097_p12 = scmp.lt.u32.totalorder %s6089_s17, %s8094_s15 }
 0x73d   : > { %p6091_p7 = pnand %p6090_p4, %p6268_p5 }
 0x73e   : > { %p6096_p11 = por %p6095_p10, %p6094_p9 }
 0x73f   : > { %p6092_p8 = pneg %p6091_p7 }
 0x740   : > { %p6098_p13 = por %p6097_p12, %p6096_p11 }
 0x742   : > { %p6099_p0 = pnand %p6098_p13, %p6092_p8 }
 0x744   : > { %6102 = shalt.err (!%p6099_p0)
}
 0x745   : > { %s6143_s25 = smov 896   ;;  %s6144_s18 = smov 56  }
 0x746   : > { %5228 = dma.vmem_to_hbm [thread:$0]  (%p6268_p5), %s8098_s28, 1792, %s8094_s15, %s8104_s26, %s6143_s25, %s6143_s25, %s6144_s18  }
 0x747 PF: > { %s8221_s21 = sld [smem:[#allocation7_spill]]  ;;  %s8222_s24 = sld [smem:[#allocation5_spill]] }
 0x74d   : > { %p5234_p1 = scmp.ge.s32.totalorder %s8221_s21, 2  ;;  %s4631_s29 = sand.u32 1, %s8222_s24  }
 0x74e   : > { %s4632_s17 = scalar_lea.sflag [#allocation3], %s4631_s29 }
 0x74f   : > { %p5231_p2 = pnand %p5234_p1, %p6272_p6 }
 0x751   : > { %6120 = dma.done.wait (!%p5231_p2), %s4632_s17, 1792  }
 0x752   : > { %6122 = vsyncadd (!%p5231_p2), %s4632_s17, 4294965504  ;;  %s8224_s24 = sld [smem:[#allocation8_spill]]  ;;  %s8225_s19 = sld [smem:[#allocation6_spill]] }
 0x753   : > { %s8226_s23 = sld [smem:[#allocation9_spill]]  ;;  %s8227_s21 = smov %s6129_s22 }
 0x758   : > { %p27_p3 = scmp.ge.s32.totalorder %s8224_s24, 6   ;;  %s8228_s22 = smov %s8225_s19 }
 0x75a   :  { %29 = sbr.rel (!%p27_p3) target bundleno = 6 (0x6), region = 133 }
 0x761   :  { %4645 = vsyncpa [#allocation3], 1 }
 0x762   :  { %4647 = vsyncpa [#allocation3 + $0x1], 1 }

</bundles_post_ra>
